<compile_context>
chip_gen: v5e
topology: v5e:2x2
jax: 0.10.0
libtpu: 0.0.40
codegen_flags: <defaults>
</compile_context>

<pallas_src>
import math

import jax
import jax.numpy as jnp
from jax import lax
from jax.experimental import pallas as pl
from jax.experimental.pallas import tpu as pltpu

DROPOUT_P = 0.0  # identity dropout (asserted below)


def _make_attn_kernel(inv_scale_factor):
    scale = 1.0 / float(inv_scale_factor)

    def _attn_kernel(q_ref, kt_ref, v_ref, o_ref):
        # refs hold the full arrays in VMEM:
        #   q_ref: (G, S, D), kt_ref: (G, D, S), v_ref: (G, S, D), G = B * H
        q = q_ref[...]
        kt = kt_ref[...]
        v = v_ref[...]

        # Fold 1/inv_scale into q (scales an (G,S,D) tile, not (G,S,S) logits).
        q = q * scale

        # Batched qk = q @ k^T over all heads at once; kt is pre-transposed so
        # the contraction is on q's last dim vs kt's middle dim (native MXU
        # orientation, no in-kernel relayout of the RHS).
        qk = lax.dot_general(
            q, kt,
            dimension_numbers=(((2,), (1,)), ((0,), (0,))),
            preferred_element_type=jnp.float32,
            precision=lax.Precision.HIGHEST,
        )  # (G, S, S)

        # Numerically stable softmax along the last axis (exact reciprocal:
        # only G*S divides, the EUP has huge slack; keeps accuracy tight).
        m = jnp.max(qk, axis=-1, keepdims=True)
        e = jnp.exp(qk - m)
        denom = jnp.sum(e, axis=-1, keepdims=True)
        p = e * pl.reciprocal(denom, approx=False)

        # dropout_p == 0.0 -> identity

        out = lax.dot_general(
            p, v,
            dimension_numbers=(((2,), (1,)), ((0,), (0,))),
            preferred_element_type=jnp.float32,
            precision=lax.Precision.HIGHEST,
        )  # (G, S, D)
        o_ref[...] = out.astype(o_ref.dtype)

    return _attn_kernel


def sdpa_pallas(query, key, value, dropout_p=DROPOUT_P):
    assert dropout_p == 0.0, "non-zero dropout not implemented in this kernel"
    B, H, S, D = query.shape
    G = B * H
    inv_scale_factor = math.sqrt(D)

    # Fuse batch & heads wrapper-side; pre-transpose key to (G, D, S) so the
    # kernel's first matmul needs no in-kernel transpose/relayout of the RHS.
    q3 = query.reshape(G, S, D)
    k3t = jnp.transpose(key.reshape(G, S, D), (0, 2, 1))
    v3 = value.reshape(G, S, D)

    cost = pl.CostEstimate(
        flops=4 * G * S * S * D,           # two matmuls per head
        transcendentals=G * S * S,         # exp in softmax
        bytes_accessed=4 * G * S * D * 4,  # 3 inputs + 1 output, f32
    )

    out = pl.pallas_call(
        _make_attn_kernel(inv_scale_factor),
        out_shape=jax.ShapeDtypeStruct((G, S, D), query.dtype),
        in_specs=[pl.BlockSpec(memory_space=pltpu.MemorySpace.VMEM)] * 3,
        out_specs=pl.BlockSpec(memory_space=pltpu.MemorySpace.VMEM),
        cost_estimate=cost,
    )(q3, k3t, v3)
    return out.reshape(B, H, S, D)


def sdpa_ref(query, key, value):
    D = query.shape[-1]
    qk = jnp.einsum("bhsd,bhtd->bhst", query, key,
                    precision=lax.Precision.HIGHEST) / math.sqrt(D)
    p = jax.nn.softmax(qk, axis=-1)
    return jnp.einsum("bhst,bhtd->bhsd", p, value,
                      precision=lax.Precision.HIGHEST)


if __name__ == "__main__":
    k0, k1, k2 = jax.random.split(jax.random.PRNGKey(0), 3)
    shape = (1, 8, 20, 20)
    query = jax.random.normal(k0, shape, dtype=jnp.float32)
    key = jax.random.normal(k1, shape, dtype=jnp.float32)
    value = jax.random.normal(k2, shape, dtype=jnp.float32)

    out = sdpa_pallas(query, key, value)
    jax.block_until_ready(out)

    ref = sdpa_ref(query, key, value)
    assert out.shape == shape
    # Exact reciprocal + HIGHEST-precision matmuls -> tight tolerance.
    assert jnp.allclose(out, ref, atol=1e-5, rtol=1e-5), "mismatch vs reference"
    print("KERNEL_OK")
</pallas_src>

<mosaic_0001>
module attributes {stable_mosaic.version = 11 : i64} {
  func.func @_attn_kernel(%arg0: memref<8x20x20xf32, #tpu.memory_space<vmem>>, %arg1: memref<8x20x20xf32, #tpu.memory_space<vmem>>, %arg2: memref<8x20x20xf32, #tpu.memory_space<vmem>>, %arg3: memref<8x20x20xf32, #tpu.memory_space<vmem>>) attributes {dimension_semantics = [], scalar_prefetch = 0 : i64, scratch_operands = 0 : i64, tpu.core_type = #tpu.core_type<tc>} {
    %c0 = arith.constant 0 : index
    %c0_0 = arith.constant 0 : index
    %c0_1 = arith.constant 0 : index
    %0 = vector.load %arg0[%c0, %c0_0, %c0_1] : memref<8x20x20xf32, #tpu.memory_space<vmem>>, vector<8x20x20xf32>
    %c0_2 = arith.constant 0 : index
    %c0_3 = arith.constant 0 : index
    %c0_4 = arith.constant 0 : index
    %1 = vector.load %arg1[%c0_2, %c0_3, %c0_4] : memref<8x20x20xf32, #tpu.memory_space<vmem>>, vector<8x20x20xf32>
    %c0_5 = arith.constant 0 : index
    %c0_6 = arith.constant 0 : index
    %c0_7 = arith.constant 0 : index
    %2 = vector.load %arg2[%c0_5, %c0_6, %c0_7] : memref<8x20x20xf32, #tpu.memory_space<vmem>>, vector<8x20x20xf32>
    %cst = arith.constant 0.223606795 : f32
    %3 = vector.broadcast %cst : f32 to vector<8x20x20xf32>
    %4 = arith.mulf %0, %3 : vector<8x20x20xf32>
    %cst_8 = arith.constant dense<0.000000e+00> : vector<8x20x20xf32>
    %5 = tpu.matmul %4, %1, %cst_8 {dimension_numbers = #tpu.dot_dimension_numbers<[2], [1], [1], [2], [0, 0, 0, 1, 1, 2], [0], [0]>, precision = #tpu.contract_precision<fp32>} : vector<8x20x20xf32>, vector<8x20x20xf32>, vector<8x20x20xf32> -> vector<8x20x20xf32>
    %cst_9 = arith.constant dense<0xFF800000> : vector<8x20xf32>
    %6 = vector.multi_reduction <maximumf>, %5, %cst_9 [2] : vector<8x20x20xf32> to vector<8x20xf32>
    %7 = vector.shape_cast %6 : vector<8x20xf32> to vector<8x20x1xf32>
    %8 = vector.broadcast %7 : vector<8x20x1xf32> to vector<8x20x20xf32>
    %9 = arith.subf %5, %8 : vector<8x20x20xf32>
    %10 = math.exp %9 : vector<8x20x20xf32>
    %cst_10 = arith.constant dense<0.000000e+00> : vector<8x20xf32>
    %11 = vector.multi_reduction <add>, %10, %cst_10 [2] : vector<8x20x20xf32> to vector<8x20xf32>
    %12 = vector.shape_cast %11 : vector<8x20xf32> to vector<8x20x1xf32>
    %13 = tpu.reciprocal %12 : vector<8x20x1xf32> -> vector<8x20x1xf32>
    %14 = vector.broadcast %13 : vector<8x20x1xf32> to vector<8x20x20xf32>
    %15 = arith.mulf %10, %14 : vector<8x20x20xf32>
    %cst_11 = arith.constant dense<0.000000e+00> : vector<8x20x20xf32>
    %16 = tpu.matmul %15, %2, %cst_11 {dimension_numbers = #tpu.dot_dimension_numbers<[2], [1], [1], [2], [0, 0, 0, 1, 1, 2], [0], [0]>, precision = #tpu.contract_precision<fp32>} : vector<8x20x20xf32>, vector<8x20x20xf32>, vector<8x20x20xf32> -> vector<8x20x20xf32>
    %c0_12 = arith.constant 0 : index
    %c0_13 = arith.constant 0 : index
    %c0_14 = arith.constant 0 : index
    %17 = vector.load %arg3[%c0_12, %c0_13, %c0_14] : memref<8x20x20xf32, #tpu.memory_space<vmem>>, vector<8x20x20xf32>
    tpu.vector_store %arg3[%c0_12, %c0_13, %c0_14], %16 {strides = array<i32>} : memref<8x20x20xf32, #tpu.memory_space<vmem>>, vector<8x20x20xf32>,
    return
  }
}

</mosaic_0001>

<bundles_post_ra>
// kernel: tpu_custom_call.1
= control target key start
LH: loop header
LB: loop body
LE: loop exit
PB: predicated region body
PF: predicated region fallthrough
CT: control target
= control target key end

     0   :  { %vm120_vm0 = vcmask 1043456   ;;  %vm110_vm1 = vcmask 162816   ;;  %vm2086_vm2 = vcmask 158720   ;;  %s6594_s1 = inlined_call_operand.vmem [shape: f32[8,20,20], index: 1, kind: input, shape index: {}]   ;;  %s6595_s0 = inlined_call_operand.vmem [shape: f32[8,20,20], index: 0, kind: input, shape index: {}]   ;;  %s6596_s2 = inlined_call_operand.vmem [shape: f32[8,20,20], index: 2, kind: input, shape index: {}]   ;;  %s6597_s3 = inlined_call_operand.vmem [shape: f32[8,20,20], index: 3, kind: output, shape index: {}]  }
   0x1   :  { %v40_v0 = vld [vmem:[%s6594_s1 + $0x10] sm:$0xf]  ;;  %v39_v1 = vld [vmem:[%s6594_s1 + $0x8] sm:$0xff]  ;;  %v38_v2 = vld [vmem:[%s6594_s1] sm:$0xff] }
   0x2   :  { %v122_v3 = vsel %vm120_vm0, %v40_v0, 0  ;;  %v4779_v4 = vand.u32 4294901760, %v39_v1  ;;  %v4781_v5 = vand.u32 4294901760, %v38_v2  ;;  %v14_v6 = vld [vmem:[%s6595_s0] sm:$0xff]  ;;  %v43_v7 = vld [vmem:[%s6594_s1 + $0x28] sm:$0xf] }
   0x3   :  { %v4789_v8 = vand.u32 4294901760, %v122_v3  ;;  %v86_v9 = vmul.f32 0.2236068, %v14_v6  ;;  %v368_v10 = vsel %vm120_vm0, %v43_v7, 0  ;;  %v15_v11 = vld [vmem:[%s6595_s0 + $0x8] sm:$0xff]  ;;  %v42_v12 = vld [vmem:[%s6594_s1 + $0x20] sm:$0xff] }
   0x4   :  { %v188_v13 = vsub.f32 %v39_v1, %v4779_v4  ;;  %v4800_v14 = vsub.f32 %v38_v2, %v4781_v5  ;;  %v4802_v15 = vand.u32 4294901760, %v368_v10  ;;  %v87_v16 = vmul.f32 0.2236068, %v15_v11  ;;  %v16_v17 = vld [vmem:[%s6595_s0 + $0x10] sm:$0xf]  ;;  %v41_v37 = vld [vmem:[%s6594_s1 + $0x18] sm:$0xff] }
   0x5   :  { %v182_v18 = vsub.f32 %v122_v3, %v4789_v8  ;;  %264 = vmatpush.msra.mxu3 %v4789_v8  ;;  %138 = vmatpush.msra.mxu0 %v4789_v8  ;;  %v112_v19 = vsel %vm110_vm1, %v86_v9, 0  ;;  %v4811_v20 = vand.u32 4294901760, %v42_v12  ;;  %v88_v21 = vmul.f32 0.2236068, %v16_v17  ;;  %v17_v38 = vld [vmem:[%s6595_s0 + $0x18] sm:$0xff]  ;;  %v18_v56 = vld [vmem:[%s6595_s0 + $0x20] sm:$0xff] }
   0x6   :  { %v4813_v22 = vand.u32 4294901760, %v112_v19  ;;  %v189_v23 = vand.u32 4294901760, %v188_v13  ;;  %v4816_v24 = vsub.f32 %v368_v10, %v4802_v15  ;;  %v195_v25 = vand.u32 4294901760, %v4800_v14  ;;  %v19_v6 = vld [vmem:[%s6595_s0 + $0x28] sm:$0xf] }
   0x7   :  { %227 = vmatpush.msra.mxu2 %v182_v18  ;;  %266 = vmatpush.msra.mxu3 %v4779_v4  ;;  %v183_v26 = vand.u32 4294901760, %v182_v18  ;;  %v115_v27 = vsel %vm110_vm1, %v87_v16, 0  ;;  %v4822_v28 = vsub.f32 %v42_v12, %v4811_v20  ;;  %v118_v29 = vsel %vm110_vm1, %v88_v21, 0 }
   0x8   :  { %140 = vmatpush.msra.mxu0 %v4779_v4  ;;  %v144_v30 = vsub.f32 %v112_v19, %v4813_v22  ;;  %v190_v31 = vsub.f32 %v188_v13, %v189_v23  ;;  %v429_v32 = vand.u32 4294901760, %v4816_v24  ;;  %v196_v34 = vsub.f32 %v4800_v14, %v195_v25 }
   0x9   :  { %230 = vmatpush.msra.mxu2 %v188_v13  ;;  %v184_v33 = vsub.f32 %v182_v18, %v183_v26  ;;  %268 = vmatpush.msra.mxu3 %v4781_v5  ;;  %v4830_v35 = vand.u32 4294901760, %v115_v27  ;;  %v435_v36 = vand.u32 4294901760, %v4822_v28  ;;  %v4841_v41 = vand.u32 4294901760, %v118_v29 }
   0xa   :  { %142 = vmatpush.msra.mxu0 %v4781_v5  ;;  %v145_v39 = vand.u32 4294901760, %v144_v30  ;;  %v430_v40 = vsub.f32 %v4816_v24, %v429_v32  ;;  %v191_v43 = vand.u32 4294901760, %v190_v31  ;;  %v387_v48 = vand.u32 4294901760, %v41_v37 }
   0xb   :  { %v185_v42 = vand.u32 4294901760, %v184_v33  ;;  %233 = vmatpush.msra.mxu2 %v4800_v14  ;;  %v152_v44 = vsub.f32 %v115_v27, %v4830_v35  ;;  %v436_v45 = vsub.f32 %v4822_v28, %v435_v36  ;;  %v89_v49 = vmul.f32 0.2236068, %v17_v38  ;;  %v44_v27 = vld [vmem:[%s6594_s1 + $0x30] sm:$0xff] }
   0xc   :  { %304 = vmatpush.msrb.mxu0 %v183_v26  ;;  %236 = vmatmul.f32.vlgmr.msra.gmra.mxu2 %v144_v30  ;;  %v146_v46 = vsub.f32 %v144_v30, %v145_v39  ;;  %v431_v47 = vand.u32 4294901760, %v430_v40  ;;  %v197_v50 = vand.u32 4294901760, %v196_v34  ;;  %v440_v54 = vsub.f32 %v41_v37, %v387_v48 }
   0xd   :  { %272 = vmatmul.f32.vlgmr.msra.gmra.mxu3 %v145_v39  ;;  %186 = vmatpush.msra.mxu1 %v185_v42  ;;  %v153_v51 = vand.u32 4294901760, %v152_v44  ;;  %v437_v52 = vand.u32 4294901760, %v436_v45  ;;  %v359_v55 = vsel %vm110_vm1, %v89_v49, 0  ;;  %v160_v58 = vsub.f32 %v118_v29, %v4841_v41  ;;  %v21_v42 = vld [vmem:[%s6595_s0 + $0x38] sm:$0xff] }
   0xe   :  { %384 = vmatpush.msrb.mxu2 %v4802_v15  ;;  %v147_v53 = vand.u32 4294901760, %v146_v46  ;;  %432 = vmatpush.msrb.mxu3 %v431_v47  ;;  %v441_v59 = vand.u32 4294901760, %v440_v54  ;;  %v4853_v60 = vand.u32 4294901760, %v359_v55  ;;  %v90_v61 = vmul.f32 0.2236068, %v18_v56 }
   0xf   :  { %308 = vmatpush.msrb.mxu0 %v189_v23  ;;  %192 = vmatpush.msra.mxu1 %v191_v43  ;;  %v154_v57 = vsub.f32 %v152_v44, %v153_v51  ;;  %v161_v0 = vand.u32 4294901760, %v160_v58  ;;  %v91_v9 = vmul.f32 0.2236068, %v19_v6  ;;  %v46_v23 = vld [vmem:[%s6594_s1 + $0x40] sm:$0xf]  ;;  %v4905_v29 = vand.u32 4294901760, %v44_v27 }
  0x10   :  { %386 = vmatpush.msrb.mxu2 %v4811_v20  ;;  %148 = vmatmul.f32.vlgmr.msra.gmra.mxu0 %v147_v53  ;;  %v442_v62 = vsub.f32 %v440_v54, %v441_v59  ;;  %v4858_v2 = vsub.f32 %v359_v55, %v4853_v60  ;;  %v362_v3 = vsel %vm110_vm1, %v90_v61, 0  ;;  %v93_v45 = vmul.f32 0.2236068, %v21_v42  ;;  %v22_v55 = vld [vmem:[%s6595_s0 + $0x40] sm:$0xf]  ;;  %v48_v6 = vld [vmem:[%s6594_s1 + $0x50] sm:$0xff] }
  0x11   :  { %438 = vmatpush.msrb.mxu3 %v437_v52  ;;  %198 = vmatpush.msra.mxu1 %v197_v50  ;;  %v155_v63 = vand.u32 4294901760, %v154_v57  ;;  %v162_v7 = vsub.f32 %v160_v58, %v161_v0  ;;  %v365_v12 = vsel %vm110_vm1, %v91_v9, 0  ;;  %v686_v33 = vsub.f32 %v44_v27, %v4905_v29  ;;  %v49_v61 = vld [vmem:[%s6594_s1 + $0x58] sm:$0xf] }
  0x12   :  { %388 = vmatpush.msrb.mxu2 %v387_v48  ;;  %200 = vmatmul.f32.vlgmr.msra.gmra.mxu1 %v4813_v22  ;;  %v443_v1 = vand.u32 4294901760, %v442_v62  ;;  %v608_v49 = vsel %vm110_vm1, %v93_v45, 0  ;;  %v94_v56 = vmul.f32 0.2236068, %v22_v55 }
  0x13   :  { %312 = vmatpush.msrb.mxu0 %v195_v25  ;;  %340 = vmatpush.msrb.mxu1 %v4789_v8  ;;  %v391_v8 = vand.u32 4294901760, %v4858_v2  ;;  %v614_v25 = vsel %vm120_vm0, %v46_v23, 0 }
  0x14   :  { %550 = vmatpush.msra.mxu2 %v429_v32  ;;  %444 = vmatpush.msrb.mxu3 %v443_v1 }
  0x15   :  { %241 = vmatmul.f32.gmra.mxu2 %v152_v44  ;;  %278 = vmatmul.f32.gmra.mxu3 %v153_v51  ;;  %v392_v10 = vsub.f32 %v4858_v2, %v391_v8  ;;  %v687_v44 = vand.u32 4294901760, %v686_v33  ;;  %v4933_v51 = vand.u32 4294901760, %v608_v49 }
  0x16   :  { %342 = vmatpush.msrb.mxu1 %v4779_v4  ;;  %473 = vmatpush.msra.mxu0 %v4816_v24  ;;  %v4870_v4 = vand.u32 4294901760, %v362_v3  ;;  %v45_v24 = vld [vmem:[%s6594_s1 + $0x38] sm:$0xff] }
  0x17   :  { %554 = vmatpush.msra.mxu2 %v435_v36  ;;  %586 = vmatpush.msra.mxu3 %v4802_v15  ;;  %v393_v13 = vand.u32 4294901760, %v392_v10  ;;  %v4897_v26 = vand.u32 4294901760, %v45_v24  ;;  %v644_v53 = vsub.f32 %v608_v49, %v4933_v51 }
  0x18   :  { %344 = vmatpush.msrb.mxu1 %v4781_v5  ;;  %156 = vmatmul.f32.gmra.mxu0 %v155_v63  ;;  %v163_v5 = vand.u32 4294901760, %v162_v7  ;;  %v398_v11 = vsub.f32 %v362_v3, %v4870_v4  ;;  %v860_v63 = vsel %vm120_vm0, %v49_v61, 0 }
  0x19   :  { %476 = vmatpush.msra.mxu0 %v4822_v28  ;;  %588 = vmatpush.msra.mxu3 %v4811_v20  ;;  %v680_v30 = vsub.f32 %v45_v24, %v4897_v26  ;;  %v875_v1 = vand.u32 4294901760, %v860_v63 }
  0x1a   :  { %510 = vmatpush.msra.mxu1 %v4802_v15  ;;  %558 = vmatpush.msra.mxu2 %v441_v59  ;;  %v399_v14 = vand.u32 4294901760, %v398_v11  ;;  %v405_v15 = vand.u32 4294901760, %v365_v12 }
  0x1b   :  { %204 = vmatmul.f32.gmra.mxu1 %v4830_v35  ;;  %479 = vmatpush.msra.mxu0 %v440_v54  ;;  %v681_v40 = vand.u32 4294901760, %v680_v30  ;;  %v645_v54 = vand.u32 4294901760, %v644_v53  ;;  %v920_v7 = vsub.f32 %v860_v63, %v875_v1 }
  0x1c   :  { %512 = vmatpush.msra.mxu1 %v4811_v20  ;;  %590 = vmatpush.msra.mxu3 %v387_v48  ;;  %v400_v16 = vsub.f32 %v398_v11, %v399_v14  ;;  %v406_v17 = vsub.f32 %v365_v12, %v405_v15 }
  0x1d   :  { %246 = vmatmul.f32.gmra.mxu2 %v160_v58  ;;  %284 = vmatmul.f32.gmra.mxu3 %v161_v0  ;;  %v682_v43 = vsub.f32 %v680_v30, %v681_v40  ;;  %v646_v57 = vsub.f32 %v644_v53, %v645_v54  ;;  %v611_v58 = vsel %vm110_vm1, %v94_v56, 0  ;;  %v23_v0 = vld [vmem:[%s6595_s0 + $0x48] sm:$0xff] }
  0x1e   :  { %514 = vmatpush.msra.mxu1 %v387_v48  ;;  %v401_v18 = vand.u32 4294901760, %v400_v16  ;;  %v407_v19 = vand.u32 4294901760, %v406_v17  ;;  %v688_v48 = vsub.f32 %v686_v33, %v687_v44 }
  0x1f   :  { %v683_v47 = vand.u32 4294901760, %v682_v43  ;;  %v647_v59 = vand.u32 4294901760, %v646_v57 }
  0x20   :  { %164 = vmatmul.f32.gmra.mxu0 %v163_v5  ;;  %v408_v20 = vsub.f32 %v406_v17, %v407_v19  ;;  %v689_v52 = vand.u32 4294901760, %v688_v48  ;;  %v47_v5 = vld [vmem:[%s6594_s1 + $0x48] sm:$0xff] }
  0x21   :  { %v879_v12 = vand.u32 4294901760, %v47_v5 }
  0x22   :  { %v409_v21 = vand.u32 4294901760, %v408_v20  ;;  %v24_v20 = vld [vmem:[%s6595_s0 + $0x50] sm:$0xff] }
  0x23   :  { %208 = vmatmul.f32.gmra.mxu1 %v4841_v41 }
  0x25   :  { %394 = vmatmul.f32.vlgmr.msrb.gmra.mxu2 %v393_v13  ;;  %446 = vmatmul.f32.vlgmr.msrb.gmra.mxu3 %v4853_v60 }
  0x28   :  { %314 = vmatmul.f32.vlgmr.msrb.gmra.mxu0 %v4813_v22 }
  0x2b   :  { %346 = vmatmul.f32.vlgmr.msrb.gmra.mxu1 %v4813_v22  ;;  %v4895_v22 = vand.u32 4294901760, %v614_v25 }
  0x2d   :  { %402 = vmatmul.f32.gmra.mxu2 %v401_v18  ;;  %450 = vmatmul.f32.gmra.mxu3 %v4870_v4  ;;  %v674_v28 = vsub.f32 %v614_v25, %v4895_v22  ;;  %v932_v18 = vsub.f32 %v47_v5, %v879_v12  ;;  %v96_v25 = vmul.f32 0.2236068, %v24_v20 }
  0x2e   :  { %630 = vmatpush.msrb.mxu0 %v4895_v22  ;;  %756 = vmatpush.msrb.mxu3 %v4895_v22 }
  0x2f   :  { %719 = vmatpush.msrb.mxu2 %v674_v28  ;;  %v675_v31 = vand.u32 4294901760, %v674_v28  ;;  %v933_v24 = vand.u32 4294901760, %v932_v18 }
  0x30   :  { %318 = vmatmul.f32.gmra.mxu0 %v4830_v35  ;;  %758 = vmatpush.msrb.mxu3 %v4897_v26 }
  0x31   :  { %632 = vmatpush.msrb.mxu0 %v4897_v26  ;;  %722 = vmatpush.msrb.mxu2 %v680_v30  ;;  %v676_v32 = vsub.f32 %v674_v28, %v675_v31  ;;  %v934_v27 = vsub.f32 %v932_v18, %v933_v24  ;;  %v854_v28 = vsel %vm110_vm1, %v96_v25, 0 }
  0x32   :  { %760 = vmatpush.msrb.mxu3 %v4905_v29  ;;  %v889_v30 = vand.u32 4294901760, %v854_v28 }
  0x33   :  { %350 = vmatmul.f32.gmra.mxu1 %v4830_v35  ;;  %634 = vmatpush.msrb.mxu0 %v4905_v29  ;;  %v677_v34 = vand.u32 4294901760, %v676_v32  ;;  %v20_v35 = vld [vmem:[%s6595_s0 + $0x30] sm:$0xff] }
  0x34   :  { %725 = vmatpush.msrb.mxu2 %v686_v33  ;;  %v92_v36 = vmul.f32 0.2236068, %v20_v35  ;;  %v890_v32 = vsub.f32 %v854_v28, %v889_v30 }
  0x35   :  { %410 = vmatmul.f32.gmra.mxu2 %v409_v21  ;;  %454 = vmatmul.f32.gmra.mxu3 %v405_v15 }
  0x36   :  { %678 = vmatpush.msrb.mxu1 %v677_v34  ;;  %v605_v37 = vsel %vm110_vm1, %v92_v36, 0  ;;  %v891_v33 = vand.u32 4294901760, %v890_v32  ;;  %v25_v34 = vld [vmem:[%s6595_s0 + $0x58] sm:$0xf] }
  0x37   :  { %v4926_v38 = vand.u32 4294901760, %v605_v37  ;;  %v97_v35 = vmul.f32 0.2236068, %v25_v34 }
  0x38   :  { %322 = vmatmul.f32.gmra.mxu0 %v4841_v41  ;;  %684 = vmatpush.msrb.mxu1 %v683_v47  ;;  %v892_v36 = vsub.f32 %v890_v32, %v891_v33 }
  0x39   :  { %v636_v39 = vsub.f32 %v605_v37, %v4926_v38  ;;  %v857_v37 = vsel %vm110_vm1, %v97_v35, 0 }
  0x3a   :  { %690 = vmatpush.msrb.mxu1 %v689_v52 }
  0x3b   :  { %354 = vmatmul.f32.gmra.mxu1 %v4841_v41  ;;  %v637_v41 = vand.u32 4294901760, %v636_v39 }
  0x3d   :  { %560 = vmatmul.f32.vlgmr.msra.gmra.mxu2 %v4853_v60  ;;  %592 = vmatmul.f32.vlgmr.msra.gmra.mxu3 %v4853_v60  ;;  %v638_v46 = vsub.f32 %v636_v39, %v637_v41  ;;  %v4943_v60 = vand.u32 4294901760, %v611_v58 }
  0x3e   :  { %876 = vmatpush.msra.mxu2 %v875_v1 }
  0x3f   :  { %v639_v50 = vand.u32 4294901760, %v638_v46  ;;  %v652_v62 = vsub.f32 %v611_v58, %v4943_v60 }
  0x40   :  { %482 = vmatmul.f32.vlgmr.msra.gmra.mxu0 %v4858_v2  ;;  %v95_v2 = vmul.f32 0.2236068, %v23_v0 }
  0x41   :  { %796 = vmatpush.msra.mxu0 %v675_v31  ;;  %v653_v3 = vand.u32 4294901760, %v652_v62  ;;  %v935_v31 = vand.u32 4294901760, %v934_v27 }
  0x43   :  { %518 = vmatmul.f32.vlgmr.msra.gmra.mxu1 %v391_v8  ;;  %800 = vmatpush.msra.mxu0 %v681_v40  ;;  %v877_v8 = vand.u32 4294901760, %v48_v6  ;;  %v654_v9 = vsub.f32 %v652_v62, %v653_v3  ;;  %v897_v40 = vand.u32 4294901760, %v857_v37 }
  0x44   :  { %832 = vmatpush.msra.mxu1 %v4895_v22 }
  0x45   :  { %564 = vmatmul.f32.gmra.mxu2 %v4870_v4  ;;  %596 = vmatmul.f32.gmra.mxu3 %v4870_v4  ;;  %v851_v4 = vsel %vm110_vm1, %v95_v2, 0  ;;  %v926_v13 = vsub.f32 %v48_v6, %v877_v8  ;;  %v898_v42 = vsub.f32 %v857_v37, %v897_v40 }
  0x46   :  { %804 = vmatpush.msra.mxu0 %v687_v44  ;;  %834 = vmatpush.msra.mxu1 %v4897_v26  ;;  %v4962_v10 = vand.u32 4294901760, %v851_v4 }
  0x47   :  { %878 = vmatpush.msra.mxu2 %v877_v8  ;;  %v899_v45 = vand.u32 4294901760, %v898_v42 }
  0x48   :  { %487 = vmatmul.f32.gmra.mxu0 %v398_v11  ;;  %836 = vmatpush.msra.mxu1 %v4905_v29  ;;  %v921_v11 = vand.u32 4294901760, %v920_v7 }
  0x49   :  { %880 = vmatpush.msra.mxu2 %v879_v12 }
  0x4a   :  { %v922_v16 = vsub.f32 %v920_v7, %v921_v11 }
  0x4b   :  { %524 = vmatmul.f32.gmra.mxu1 %v399_v14  ;;  %v655_v14 = vand.u32 4294901760, %v654_v9 }
  0x4c   :  { %v923_v21 = vand.u32 4294901760, %v922_v16 }
  0x4d   :  { %568 = vmatmul.f32.gmra.mxu2 %v405_v15  ;;  %600 = vmatmul.f32.gmra.mxu3 %v405_v15  ;;  %v4965_v15 = vsub.f32 %v851_v4, %v4962_v10 }
  0x4e   :  { %924 = vmatpush.msra.mxu3 %v923_v21 }
  0x50   :  { %492 = vmatmul.f32.gmra.mxu0 %v406_v17  ;;  %v927_v17 = vand.u32 4294901760, %v926_v13 }
  0x52   :  { %v928_v23 = vsub.f32 %v926_v13, %v927_v17 }
  0x53   :  { %530 = vmatmul.f32.gmra.mxu1 %v407_v19  ;;  %v883_v19 = vand.u32 4294901760, %v4965_v15 }
  0x54   :  { %v929_v26 = vand.u32 4294901760, %v928_v23 }
  0x55   :  { %728 = vmatmul.f32.vlgmr.msrb.gmra.mxu2 %v636_v39  ;;  %764 = vmatmul.f32.vlgmr.msrb.gmra.mxu3 %v637_v41  ;;  %v884_v22 = vsub.f32 %v4965_v15, %v883_v19  ;;  %v893_v39 = vand.u32 4294901760, %v892_v36 }
  0x56   :  { %1042 = vmatpush.msrb.mxu2 %v921_v11  ;;  %930 = vmatpush.msra.mxu3 %v929_v26 }
  0x57   :  { %v885_v29 = vand.u32 4294901760, %v884_v22 }
  0x58   :  { %640 = vmatmul.f32.vlgmr.msrb.gmra.mxu0 %v639_v50  ;;  %1046 = vmatpush.msrb.mxu2 %v927_v17 }
  0x59   :  { %965 = vmatpush.msrb.mxu0 %v920_v7  ;;  %936 = vmatpush.msra.mxu3 %v935_v31 }
  0x5a   :  { %1050 = vmatpush.msrb.mxu2 %v933_v24 }
  0x5b   :  { %692 = vmatmul.f32.vlgmr.msrb.gmra.mxu1 %v4926_v38  ;;  %968 = vmatpush.msrb.mxu0 %v926_v13 }
  0x5c   :  { %1002 = vmatpush.msrb.mxu1 %v875_v1  ;;  %1078 = vmatpush.msrb.mxu3 %v875_v1 }
  0x5d   :  { %733 = vmatmul.f32.gmra.mxu2 %v644_v53  ;;  %770 = vmatmul.f32.gmra.mxu3 %v645_v54 }
  0x5e   :  { %1004 = vmatpush.msrb.mxu1 %v877_v8  ;;  %971 = vmatpush.msrb.mxu0 %v932_v18 }
  0x5f   :  { %1080 = vmatpush.msrb.mxu3 %v877_v8 }
  0x60   :  { %648 = vmatmul.f32.gmra.mxu0 %v647_v59  ;;  %1006 = vmatpush.msrb.mxu1 %v879_v12 }
  0x61   :  { %1082 = vmatpush.msrb.mxu3 %v879_v12 }
  0x63   :  { %696 = vmatmul.f32.gmra.mxu1 %v4933_v51 }
  0x65   :  { %738 = vmatmul.f32.gmra.mxu2 %v652_v62  ;;  %776 = vmatmul.f32.gmra.mxu3 %v653_v3 }
  0x68   :  { %656 = vmatmul.f32.gmra.mxu0 %v655_v14 }
  0x6b   :  { %700 = vmatmul.f32.gmra.mxu1 %v4943_v60 }
  0x6d   :  { %886 = vmatmul.f32.vlgmr.msra.gmra.mxu2 %v885_v29  ;;  %938 = vmatmul.f32.vlgmr.msra.gmra.mxu3 %v4962_v10 }
  0x70   :  { %806 = vmatmul.f32.vlgmr.msra.gmra.mxu0 %v4926_v38 }
  0x73   :  { %838 = vmatmul.f32.vlgmr.msra.gmra.mxu1 %v4926_v38  ;;  %v900_v38 = vsub.f32 %v898_v42, %v899_v45 }
  0x75   :  { %894 = vmatmul.f32.gmra.mxu2 %v893_v39  ;;  %942 = vmatmul.f32.gmra.mxu3 %v889_v30  ;;  %v901_v47 = vand.u32 4294901760, %v900_v38 }
  0x78   :  { %810 = vmatmul.f32.gmra.mxu0 %v4933_v51 }
  0x7b   :  { %842 = vmatmul.f32.gmra.mxu1 %v4933_v51 }
  0x7d   :  { %902 = vmatmul.f32.gmra.mxu2 %v901_v47  ;;  %946 = vmatmul.f32.gmra.mxu3 %v897_v40 }
  0x80   :  { %814 = vmatmul.f32.gmra.mxu0 %v4943_v60 }
  0x83   :  { %846 = vmatmul.f32.gmra.mxu1 %v4943_v60 }
  0x85   :  { %1052 = vmatmul.f32.vlgmr.msrb.gmra.mxu2 %v4962_v10  ;;  %1084 = vmatmul.f32.vlgmr.msrb.gmra.mxu3 %v4962_v10 }
  0x88   :  { %974 = vmatmul.f32.vlgmr.msrb.gmra.mxu0 %v4965_v15 }
  0x8b   :  { %1010 = vmatmul.f32.vlgmr.msrb.gmra.mxu1 %v883_v19 }
  0x8d   :  { %v149_v41 = vpop.f32.mrf.mxu0  ;;  %1056 = vmatmul.f32.gmra.mxu2 %v889_v30  ;;  %1088 = vmatmul.f32.gmra.mxu3 %v889_v30 }
  0x8f   :  { %v201_v43 = vpop.f32.mrf.mxu1  ;;  %v237_v44 = vpop.f32.mrf.mxu2 }
  0x90   :  { %v273_v46 = vpop.f32.mrf.mxu3  ;;  %v202_v53 = vadd.f32 %v201_v43, %v149_v41  ;;  %979 = vmatmul.f32.gmra.mxu0 %v890_v32 }
  0x92   :  { %v238_v51 = vadd.f32 %v237_v44, %v202_v53 }
  0x93   :  { %1016 = vmatmul.f32.gmra.mxu1 %v891_v33 }
  0x94   :  { %v274_v58 = vadd.f32 %v273_v46, %v238_v51  ;;  %v51_v51 = vld [vmem:[%s6594_s1 + $0x68] sm:$0xff] }
  0x95   :  { %v157_v48 = vpop.f32.mrf.mxu0  ;;  %1060 = vmatmul.f32.gmra.mxu2 %v897_v40  ;;  %1092 = vmatmul.f32.gmra.mxu3 %v897_v40 }
  0x98   :  { %v205_v49 = vpop.f32.mrf.mxu1  ;;  %v242_v50 = vpop.f32.mrf.mxu2  ;;  %984 = vmatmul.f32.gmra.mxu0 %v898_v42 }
  0x99   :  { %v279_v52 = vpop.f32.mrf.mxu3  ;;  %v206_v59 = vadd.f32 %v205_v49, %v157_v48 }
  0x9b   :  { %v243_v0 = vadd.f32 %v242_v50, %v206_v59  ;;  %1022 = vmatmul.f32.gmra.mxu1 %v899_v45  ;;  %v50_v59 = vld [vmem:[%s6594_s1 + $0x60] sm:$0xff] }
  0x9d   :  { %v165_v54 = vpop.f32.mrf.mxu0  ;;  %v280_v6 = vadd.f32 %v279_v52, %v243_v0  ;;  %v52_v52 = vld [vmem:[%s6594_s1 + $0x70] sm:$0xf] }
  0x9e   :  { %v1106_v53 = vsel %vm120_vm0, %v52_v52, 0  ;;  %v53_v52 = vld [vmem:[%s6594_s1 + $0x78] sm:$0xff] }
  0xa0   :  { %v209_v55 = vpop.f32.mrf.mxu1  ;;  %v247_v56 = vpop.f32.mrf.mxu2 }
  0xa1   :  { %v285_v57 = vpop.f32.mrf.mxu3  ;;  %v210_v7 = vadd.f32 %v209_v55, %v165_v54  ;;  %v1121_v55 = vand.u32 4294901760, %v1106_v53 }
  0xa3   :  { %v248_v10 = vadd.f32 %v247_v56, %v210_v7  ;;  %v1166_v56 = vsub.f32 %v1106_v53, %v1121_v55  ;;  %1122 = vmatpush.msra.mxu0 %v1121_v55  ;;  %1248 = vmatpush.msra.mxu3 %v1121_v55 }
  0xa5   :  { %v315_v61 = vpop.f32.mrf.mxu0  ;;  %v286_v14 = vadd.f32 %v285_v57, %v248_v10  ;;  %1211 = vmatpush.msra.mxu2 %v1166_v56  ;;  %v1123_v57 = vand.u32 4294901760, %v51_v51 }
  0xa6   :  { %v316_v60 = vadd.f32 %v315_v61, %v274_v58  ;;  %v1167_v58 = vand.u32 4294901760, %v1166_v56  ;;  %v26_v61 = vld [vmem:[%s6595_s0 + $0x60] sm:$0xff] }
  0xa7   :  { %1124 = vmatpush.msra.mxu0 %v1123_v57  ;;  %1250 = vmatpush.msra.mxu3 %v1123_v57  ;;  %v98_v0 = vmul.f32 0.2236068, %v26_v61 }
  0xa8   :  { %v347_v62 = vpop.f32.mrf.mxu1  ;;  %v395_v63 = vpop.f32.mrf.mxu2 }
  0xa9   :  { %v447_v1 = vpop.f32.mrf.mxu3  ;;  %v4992_v2 = vadd.f32 %v347_v62, %v316_v60  ;;  %v1172_v60 = vsub.f32 %v51_v51, %v1123_v57  ;;  %v1168_v62 = vsub.f32 %v1166_v56, %v1167_v58 }
  0xaa   :  { %v448_v23 = vadd.f32 %v447_v1, %v395_v63  ;;  %v1125_v63 = vand.u32 4294901760, %v50_v59 }
  0xab   :  { %v2080_v3 = vsel %vm110_vm1, %v4992_v2, -inf  ;;  %1214 = vmatpush.msra.mxu2 %v1172_v60  ;;  %v1169_v1 = vand.u32 4294901760, %v1168_v62  ;;  %v1173_v7 = vand.u32 4294901760, %v1172_v60 }
  0xac   :  { %2081 = vmax.xlane.f32.xlu0 %v2080_v3  ;;  %v1178_v3 = vsub.f32 %v50_v59, %v1125_v63  ;;  %1126 = vmatpush.msra.mxu0 %v1125_v63 }
  0xad   :  { %v319_v8 = vpop.f32.mrf.mxu0  ;;  %1252 = vmatpush.msra.mxu3 %v1125_v63  ;;  %1170 = vmatpush.msra.mxu1 %v1169_v1 }
  0xae   :  { %v320_v4 = vadd.f32 %v319_v8, %v280_v6  ;;  %v1097_v6 = vsel %vm110_vm1, %v98_v0, 0  ;;  %1288 = vmatpush.msrb.mxu0 %v1167_v58  ;;  %1217 = vmatpush.msra.mxu2 %v1178_v3 }
  0xaf   :  { %v5030_v8 = vand.u32 4294901760, %v1097_v6 }
  0xb0   :  { %v351_v9 = vpop.f32.mrf.mxu1  ;;  %v403_v5 = vpop.f32.mrf.mxu2  ;;  %1292 = vmatpush.msrb.mxu0 %v1173_v7 }
  0xb1   :  { %v4996_v11 = vadd.f32 %v351_v9, %v320_v4  ;;  %v451_v12 = vpop.f32.mrf.mxu3  ;;  %v1174_v4 = vsub.f32 %v1172_v60, %v1173_v7  ;;  %v1179_v9 = vand.u32 4294901760, %v1178_v3 }
  0xb2   :  { %v452_v30 = vadd.f32 %v451_v12, %v403_v5  ;;  %v1128_v5 = vsub.f32 %v1097_v6, %v5030_v8 }
  0xb3   :  { %v2083_v13 = vsel %vm110_vm1, %v4996_v11, -inf  ;;  %v1175_v10 = vand.u32 4294901760, %v1174_v4  ;;  %v1180_v12 = vsub.f32 %v1178_v3, %v1179_v9  ;;  %1296 = vmatpush.msrb.mxu0 %v1179_v9 }
  0xb4   :  { %2084 = vmax.xlane.f32.xlu0 %v2083_v13  ;;  %1220 = vmatmul.f32.vlgmr.msra.gmra.mxu2 %v1128_v5  ;;  %v1129_v13 = vand.u32 4294901760, %v1128_v5 }
  0xb5   :  { %v323_v15 = vpop.f32.mrf.mxu0  ;;  %1176 = vmatpush.msra.mxu1 %v1175_v10 }
  0xb6   :  { %v324_v16 = vadd.f32 %v323_v15, %v286_v14  ;;  %v1181_v14 = vand.u32 4294901760, %v1180_v12  ;;  %v1130_v15 = vsub.f32 %v1128_v5, %v1129_v13  ;;  %1256 = vmatmul.f32.vlgmr.msra.gmra.mxu3 %v1129_v13 }
  0xb8   :  { %v355_v17 = vpop.f32.mrf.mxu1  ;;  %v411_v18 = vpop.f32.mrf.mxu2  ;;  %1182 = vmatpush.msra.mxu1 %v1181_v14 }
  0xb9   :  { %v455_v19 = vpop.f32.mrf.mxu3  ;;  %v5000_v20 = vadd.f32 %v355_v17, %v324_v16  ;;  %v1131_v16 = vand.u32 4294901760, %v1130_v15  ;;  %1184 = vmatmul.f32.vlgmr.msra.gmra.mxu1 %v5030_v8  ;;  %v27_v17 = vld [vmem:[%s6595_s0 + $0x68] sm:$0xff] }
  0xba   :  { %v456_v41 = vadd.f32 %v455_v19, %v411_v18  ;;  %1324 = vmatpush.msrb.mxu1 %v1121_v55  ;;  %v99_v18 = vmul.f32 0.2236068, %v27_v17  ;;  %v1371_v55 = vand.u32 4294901760, %v53_v52 }
  0xbb   :  { %v2087_v21 = vsel %vm2086_vm2, %v5000_v20, -inf  ;;  %1132 = vmatmul.f32.vlgmr.msra.gmra.mxu0 %v1131_v16 }
  0xbc   :  { %2088 = vmax.xlane.f32.xlu1 %v2087_v21  ;;  %1326 = vmatpush.msrb.mxu1 %v1123_v57  ;;  %v1100_v19 = vsel %vm110_vm1, %v99_v18, 0  ;;  %v1424_v61 = vsub.f32 %v53_v52, %v1371_v55 }
  0xbd   :  { %v483_v24 = vpop.f32.mrf.mxu0 }
  0xbe   :  { %v484_v25 = vadd.f32 %v483_v24, %v448_v23  ;;  %1328 = vmatpush.msrb.mxu1 %v1125_v63  ;;  %v5040_v23 = vand.u32 4294901760, %v1100_v19  ;;  %v30_v63 = vld [vmem:[%s6595_s0 + $0x80] sm:$0xff]  ;;  %v1425_v3 = vand.u32 4294901760, %v1424_v61 }
  0xbf   :  { %v102_v6 = vmul.f32 0.2236068, %v30_v63 }
  0xc0   :  { %v519_v22 = vpop.f32.mrf.mxu1  ;;  %v561_v26 = vpop.f32.mrf.mxu2  ;;  %v1136_v24 = vsub.f32 %v1100_v19, %v5040_v23  ;;  %v1426_v5 = vsub.f32 %v1424_v61, %v1425_v3  ;;  %v31_v19 = vld [vmem:[%s6595_s0 + $0x88] sm:$0xf] }
  0xc1   :  { %v520_v27 = vadd.f32 %v519_v22, %v484_v25  ;;  %v593_v28 = vpop.f32.mrf.mxu3  ;;  %1188 = vmatmul.f32.gmra.mxu1 %v5040_v23  ;;  %v1346_v10 = vsel %vm110_vm1, %v102_v6, 0 }
  0xc2   :  { %1225 = vmatmul.f32.gmra.mxu2 %v1136_v24  ;;  %v1137_v22 = vand.u32 4294901760, %v1136_v24  ;;  %v5101_v14 = vand.u32 4294901760, %v1346_v10  ;;  %v1427_v15 = vand.u32 4294901760, %v1426_v5 }
  0xc3   :  { %v562_v29 = vadd.f32 %v561_v26, %v520_v27  ;;  %v28_v26 = vld [vmem:[%s6595_s0 + $0x70] sm:$0xf] }
  0xc4   :  { %v100_v27 = vmul.f32 0.2236068, %v28_v26  ;;  %1262 = vmatmul.f32.gmra.mxu3 %v1137_v22  ;;  %v5104_v17 = vsub.f32 %v1346_v10, %v5101_v14 }
  0xc5   :  { %v5004_v31 = vadd.f32 %v593_v28, %v562_v29  ;;  %v488_v32 = vpop.f32.mrf.mxu0  ;;  %v1138_v28 = vsub.f32 %v1136_v24, %v1137_v22  ;;  %v103_v24 = vmul.f32 0.2236068, %v31_v19  ;;  %v58_v19 = vld [vmem:[%s6594_s1 + $0xa0] sm:$0xf] }
  0xc6   :  { %v489_v33 = vadd.f32 %v488_v32, %v452_v30  ;;  %v1103_v29 = vsel %vm110_vm1, %v100_v27, 0  ;;  %v1383_v18 = vand.u32 4294901760, %v5104_v17 }
  0xc7   :  { %v2090_v34 = vsel %vm110_vm1, %v5004_v31, -inf  ;;  %v1139_v32 = vand.u32 4294901760, %v1138_v28  ;;  %v1349_v27 = vsel %vm110_vm1, %v103_v24, 0  ;;  %v1598_v24 = vsel %vm120_vm0, %v58_v19, 0 }
  0xc8   :  { %v525_v35 = vpop.f32.mrf.mxu1  ;;  %2091 = vmax.xlane.f32.xlu1 %v2090_v34  ;;  %v565_v36 = vpop.f32.mrf.mxu2  ;;  %v55_v34 = vld [vmem:[%s6594_s1 + $0x88] sm:$0xf]  ;;  %v1384_v26 = vsub.f32 %v5104_v17, %v1383_v18 }
  0xc9   :  { %v526_v37 = vadd.f32 %v525_v35, %v489_v33  ;;  %v597_v39 = vpop.f32.mrf.mxu3  ;;  %v5052_v33 = vand.u32 4294901760, %v1103_v29  ;;  %1140 = vmatmul.f32.gmra.mxu0 %v1139_v32 }
  0xca   :  { %v1385_v28 = vand.u32 4294901760, %v1384_v26  ;;  %v5184_v26 = vand.u32 4294901760, %v1598_v24 }
  0xcb   :  { %v566_v40 = vadd.f32 %v565_v36, %v526_v37  ;;  %v1144_v36 = vsub.f32 %v1103_v29, %v5052_v33  ;;  %v1352_v37 = vsel %vm120_vm0, %v55_v34, 0  ;;  %1192 = vmatmul.f32.gmra.mxu1 %v5052_v33  ;;  %v5116_v29 = vand.u32 4294901760, %v1349_v27 }
  0xcd   :  { %v5008_v42 = vadd.f32 %v597_v39, %v566_v40  ;;  %v493_v43 = vpop.f32.mrf.mxu0  ;;  %v29_v39 = vld [vmem:[%s6595_s0 + $0x78] sm:$0xff]  ;;  %v5065_v40 = vand.u32 4294901760, %v1352_v37  ;;  %1230 = vmatmul.f32.gmra.mxu2 %v1144_v36  ;;  %v5119_v34 = vsub.f32 %v1349_v27, %v5116_v29 }
  0xce   :  { %v494_v44 = vadd.f32 %v493_v43, %v456_v41  ;;  %v101_v41 = vmul.f32 0.2236068, %v29_v39  ;;  %v57_v27 = vld [vmem:[%s6594_s1 + $0x98] sm:$0xff] }
  0xcf   :  { %v2093_v45 = vsel %vm110_vm1, %v5008_v42, -inf  ;;  %1368 = vmatpush.msrb.mxu2 %v5065_v40  ;;  %1494 = vmatpush.msra.mxu1 %v5065_v40 }
  0xd0   :  { %v531_v46 = vpop.f32.mrf.mxu1  ;;  %2094 = vmax.xlane.f32.xlu2 %v2093_v45  ;;  %v569_v38 = vpop.f32.mrf.mxu2  ;;  %v54_v45 = vld [vmem:[%s6594_s1 + $0x80] sm:$0xff] }
  0xd1   :  { %v532_v47 = vadd.f32 %v531_v46, %v494_v44  ;;  %v601_v48 = vpop.f32.mrf.mxu3  ;;  %v1145_v44 = vand.u32 4294901760, %v1144_v36  ;;  %v1412_v46 = vsub.f32 %v1352_v37, %v5065_v40  ;;  %v1391_v37 = vand.u32 4294901760, %v5119_v34 }
  0xd3   :  { %v570_v49 = vadd.f32 %v569_v38, %v532_v47  ;;  %v1369_v38 = vand.u32 4294901760, %v54_v45  ;;  %v1343_v47 = vsel %vm110_vm1, %v101_v41, 0  ;;  %1268 = vmatmul.f32.gmra.mxu3 %v1145_v44  ;;  %1457 = vmatpush.msra.mxu0 %v1412_v46 }
  0xd4   :  { %v5081_v53 = vand.u32 4294901760, %v1343_v47  ;;  %1330 = vmatmul.f32.vlgmr.msrb.gmra.mxu1 %v5030_v8 }
  0xd5   :  { %v5012_v50 = vadd.f32 %v601_v48, %v570_v49  ;;  %v5038_v21 = vpop.f32.mrf.mxu0  ;;  %v1146_v49 = vsub.f32 %v1144_v36, %v1145_v44  ;;  %1370 = vmatpush.msrb.mxu2 %v1369_v38  ;;  %v1418_v56 = vsub.f32 %v54_v45, %v1369_v38  ;;  %1496 = vmatpush.msra.mxu1 %v1369_v38 }
  0xd6   :  { %v5084_v57 = vsub.f32 %v1343_v47, %v5081_v53  ;;  %v1392_v44 = vsub.f32 %v5119_v34, %v1391_v37 }
  0xd7   :  { %v2096_v54 = vsel %vm2086_vm2, %v5012_v50, -inf  ;;  %v1147_v51 = vand.u32 4294901760, %v1146_v49  ;;  %1372 = vmatpush.msrb.mxu2 %v1371_v55  ;;  %v1419_v59 = vand.u32 4294901760, %v1418_v56  ;;  %1460 = vmatpush.msra.mxu0 %v1418_v56 }
  0xd8   :  { %2097 = vmax.xlane.f32.xlu2 %v2096_v54  ;;  %v5044_v25 = vpop.f32.mrf.mxu1  ;;  %v5050_v30 = vpop.f32.mrf.mxu2  ;;  %v1413_v54 = vand.u32 4294901760, %v1412_v46  ;;  %v1375_v62 = vand.u32 4294901760, %v5084_v57  ;;  %1498 = vmatpush.msra.mxu1 %v1371_v55 }
  0xd9   :  { %v5067_v43 = vpop.f32.mrf.mxu3  ;;  %1148 = vmatmul.f32.gmra.mxu0 %v1147_v51  ;;  %v1420_v1 = vsub.f32 %v1418_v56, %v1419_v59  ;;  %v694_v39 = vadd.f32 %v5044_v25, %v5038_v21 }
  0xda   :  { %v1414_v58 = vsub.f32 %v1412_v46, %v1413_v54  ;;  %1534 = vmatpush.msra.mxu2 %v1413_v54  ;;  %1463 = vmatpush.msra.mxu0 %v1424_v61  ;;  %v1376_v4 = vsub.f32 %v5084_v57, %v1375_v62 }
  0xdb   :  { %v1421_v9 = vand.u32 4294901760, %v1420_v1  ;;  %v730_v47 = vadd.f32 %v5050_v30, %v694_v39 }
  0xdc   :  { %v1415_v0 = vand.u32 4294901760, %v1414_v58  ;;  %1538 = vmatpush.msra.mxu2 %v1419_v59  ;;  %v1377_v13 = vand.u32 4294901760, %v1376_v4  ;;  %1334 = vmatmul.f32.gmra.mxu1 %v5040_v23 }
  0xdd   :  { %v5057_v35 = vpop.f32.mrf.mxu0  ;;  %v766_v21 = vadd.f32 %v5067_v43, %v730_v47 }
  0xde   :  { %1416 = vmatpush.msrb.mxu3 %v1415_v0  ;;  %1542 = vmatpush.msra.mxu2 %v1425_v3 }
  0xdf   :  { %1378 = vmatmul.f32.vlgmr.msrb.gmra.mxu2 %v1377_v13 }
  0xe0   :  { %v5076_v48 = vpop.f32.mrf.mxu1  ;;  %v5086_v60 = vpop.f32.mrf.mxu2  ;;  %1422 = vmatpush.msrb.mxu3 %v1421_v9 }
  0xe1   :  { %v5099_v12 = vpop.f32.mrf.mxu3  ;;  %1298 = vmatmul.f32.vlgmr.msrb.gmra.mxu0 %v5030_v8 }
  0xe2   :  { %1428 = vmatpush.msrb.mxu3 %v1427_v15  ;;  %1614 = vmatpush.msrb.mxu0 %v5184_v26 }
  0xe3   :  { %1430 = vmatmul.f32.vlgmr.msrb.gmra.mxu3 %v5081_v53 }
  0xe4   :  { %1570 = vmatpush.msra.mxu3 %v5065_v40  ;;  %1338 = vmatmul.f32.gmra.mxu1 %v5052_v33 }
  0xe5   :  { %v5093_v7 = vpop.f32.mrf.mxu0 }
  0xe6   :  { %1572 = vmatpush.msra.mxu3 %v1369_v38  ;;  %v1393_v38 = vand.u32 4294901760, %v1392_v44  ;;  %v1658_v44 = vsub.f32 %v1598_v24, %v5184_v26 }
  0xe7   :  { %1386 = vmatmul.f32.gmra.mxu2 %v1385_v28  ;;  %v32_v28 = vld [vmem:[%s6595_s0 + $0x90] sm:$0xff] }
  0xe8   :  { %v701_v16 = vpop.f32.mrf.mxu1  ;;  %v739_v22 = vpop.f32.mrf.mxu2  ;;  %1574 = vmatpush.msra.mxu3 %v1371_v55  ;;  %1703 = vmatpush.msrb.mxu2 %v1658_v44 }
  0xe9   :  { %v777_v32 = vpop.f32.mrf.mxu3  ;;  %1302 = vmatmul.f32.gmra.mxu0 %v5040_v23  ;;  %v702_v51 = vadd.f32 %v701_v16, %v5093_v7 }
  0xea   :  { %1740 = vmatpush.msrb.mxu3 %v5184_v26 }
  0xeb   :  { %1434 = vmatmul.f32.gmra.mxu3 %v5101_v14  ;;  %v740_v63 = vadd.f32 %v739_v22, %v702_v51 }
  0xec   :  { %1502 = vmatmul.f32.vlgmr.msra.gmra.mxu1 %v1375_v62 }
  0xed   :  { %v807_v8 = vpop.f32.mrf.mxu0 }
  0xee   :  { %v808_v55 = vadd.f32 %v807_v8, %v766_v21  ;;  %v56_v8 = vld [vmem:[%s6594_s1 + $0x90] sm:$0xff] }
  0xef   :  { %1394 = vmatmul.f32.gmra.mxu2 %v1393_v38 }
  0xf0   :  { %v839_v36 = vpop.f32.mrf.mxu1  ;;  %v887_v46 = vpop.f32.mrf.mxu2 }
  0xf1   :  { %v939_v49 = vpop.f32.mrf.mxu3  ;;  %1306 = vmatmul.f32.gmra.mxu0 %v5052_v33  ;;  %v698_v33 = vadd.f32 %v5076_v48, %v5057_v35 }
  0xf3   :  { %1438 = vmatmul.f32.gmra.mxu3 %v5116_v29  ;;  %v735_v61 = vadd.f32 %v5086_v60, %v698_v33 }
  0xf4   :  { %1508 = vmatmul.f32.gmra.mxu1 %v1383_v18 }
  0xf5   :  { %v811_v23 = vpop.f32.mrf.mxu0 }
  0xf7   :  { %1544 = vmatmul.f32.vlgmr.msra.gmra.mxu2 %v5081_v53 }
  0xf8   :  { %v843_v52 = vpop.f32.mrf.mxu1  ;;  %v895_v43 = vpop.f32.mrf.mxu2 }
  0xf9   :  { %1466 = vmatmul.f32.vlgmr.msra.gmra.mxu0 %v5084_v57  ;;  %v943_v48 = vpop.f32.mrf.mxu3  ;;  %v772_v57 = vadd.f32 %v5099_v12, %v735_v61 }
  0xfa   :  { %v944_v39 = vadd.f32 %v943_v48, %v895_v43 }
  0xfb   :  { %1576 = vmatmul.f32.vlgmr.msra.gmra.mxu3 %v5081_v53  ;;  %v812_v6 = vadd.f32 %v811_v23, %v772_v57  ;;  %v60_v57 = vld [vmem:[%s6594_s1 + $0xb0] sm:$0xff] }
  0xfc   :  { %1514 = vmatmul.f32.gmra.mxu1 %v1391_v37  ;;  %v33_v37 = vld [vmem:[%s6595_s0 + $0x98] sm:$0xff] }
  0xfd   :  { %v815_v58 = vpop.f32.mrf.mxu0  ;;  %v5168_v13 = vadd.f32 %v843_v52, %v812_v6  ;;  %v1659_v52 = vand.u32 4294901760, %v1658_v44 }
  0xff   :  { %1548 = vmatmul.f32.gmra.mxu2 %v5101_v14  ;;  %v2102_v22 = vsel %vm110_vm1, %v5168_v13, -inf  ;;  %v1660_v61 = vsub.f32 %v1658_v44, %v1659_v52 }
 0x100   :  { %v847_v1 = vpop.f32.mrf.mxu1  ;;  %v5158_v60 = vpop.f32.mrf.mxu2 }
 0x101   :  { %1471 = vmatmul.f32.gmra.mxu0 %v5104_v17  ;;  %v5164_v5 = vpop.f32.mrf.mxu3  ;;  %v940_v17 = vadd.f32 %v939_v49, %v887_v46  ;;  %v34_v46 = vld [vmem:[%s6595_s0 + $0xa0] sm:$0xf]  ;;  %v1661_v6 = vand.u32 4294901760, %v1660_v61 }
 0x102   :  { %v106_v21 = vmul.f32 0.2236068, %v34_v46 }
 0x103   :  { %1580 = vmatmul.f32.gmra.mxu3 %v5101_v14  ;;  %1662 = vmatpush.msrb.mxu1 %v1661_v6 }
 0x104   :  { %v1595_v48 = vsel %vm110_vm1, %v106_v21, 0 }
 0x105   :  { %v975_v7 = vpop.f32.mrf.mxu0 }
 0x107   :  { %1552 = vmatmul.f32.gmra.mxu2 %v5116_v29 }
 0x108   :  { %v1011_v16 = vpop.f32.mrf.mxu1 }
 0x109   :  { %1476 = vmatmul.f32.gmra.mxu0 %v5119_v34  ;;  %v5197_v34 = vand.u32 4294901760, %v56_v8 }
 0x10b   :  { %1584 = vmatmul.f32.gmra.mxu3 %v5116_v29  ;;  %v976_v29 = vadd.f32 %v975_v7, %v940_v17  ;;  %v5214_v23 = vsub.f32 %v56_v8, %v5197_v34  ;;  %v948_v8 = vadd.f32 %v5164_v5, %v5158_v60 }
 0x10d   :  { %v1671_v43 = vand.u32 4294901760, %v5214_v23 }
 0x11f   :  { %v2082_v40 = vpop.xlane.xlu0 %2081 }
 0x120   :  { %v2153_v41 = vsub.f32 %v4992_v2, %v2082_v40  ;;  %v980_v40 = vpop.f32.mrf.mxu0 }
 0x122   :  { %v2177_v45 = vmul.f32 1.442695, %v2153_v41 }
 0x124   :  { %4653 = vpow2.f32 %v2177_v45  ;;  %v105_v45 = vmul.f32 0.2236068, %v33_v37 }
 0x127   :  { %v2085_v25 = vpop.xlane.xlu0 %2084 }
 0x128   :  { %v2154_v2 = vsub.f32 %v4996_v11, %v2085_v25  ;;  %v5146_v11 = vadd.f32 %v839_v36, %v808_v55  ;;  %v104_v36 = vmul.f32 0.2236068, %v32_v28  ;;  %v5217_v25 = vpop.f32.mrf.mxu3  ;;  %v1592_v55 = vsel %vm110_vm1, %v105_v45, 0  ;;  %v985_v44 = vpop.f32.mrf.mxu0 }
 0x129   :  { %v5226_v51 = vand.u32 4294901760, %v1592_v55 }
 0x12a   :  { %v5136_v54 = vpop.eup %4653  ;;  %v2179_v30 = vmul.f32 1.442695, %v2154_v2  ;;  %v2099_v3 = vsel %vm110_vm1, %v5146_v11, -inf  ;;  %v1589_v49 = vsel %vm110_vm1, %v104_v36, 0 }
 0x12b   :  { %v2225_v56 = vsel %vm110_vm1, %v5136_v54, 0.0 }
 0x12c   :  { %4655 = vpow2.f32 %v2179_v30  ;;  %2226 = vadd.xlane.f32.xlu0 %v2225_v56  ;;  %v5220_v30 = vand.u32 4294901760, %v1589_v49  ;;  %v1012_v56 = vadd.f32 %v1011_v16, %v976_v29  ;;  %v5253_v16 = vand.u32 4294901760, %v1595_v48 }
 0x12f   :  { %v2089_v59 = vpop.xlane.xlu1 %2088 }
 0x130   :  { %v2155_v35 = vsub.f32 %v5000_v20, %v2089_v59  ;;  %v778_v20 = vadd.f32 %v777_v32, %v740_v63  ;;  %v5195_v32 = vand.u32 4294901760, %v57_v27  ;;  %v1017_v59 = vpop.f32.mrf.mxu1  ;;  %v61_v63 = vld [vmem:[%s6594_s1 + $0xb8] sm:$0xf] }
 0x131   :  { %v1844_v17 = vsel %vm120_vm0, %v61_v63, 0 }
 0x132   :  { %v5150_v62 = vpop.eup %4655  ;;  %v2181_v0 = vmul.f32 1.442695, %v2155_v35  ;;  %v816_v9 = vadd.f32 %v815_v58, %v778_v20  ;;  %v1664_v47 = vsub.f32 %v57_v27, %v5195_v32  ;;  %1742 = vmatpush.msrb.mxu3 %v5195_v32  ;;  %1616 = vmatpush.msrb.mxu0 %v5195_v32  ;;  %v1620_v35 = vsub.f32 %v1589_v49, %v5220_v30 }
 0x133   :  { %v2228_v53 = vsel %vm110_vm1, %v5150_v62, 0.0  ;;  %v981_v20 = vadd.f32 %v980_v40, %v944_v39  ;;  %v5259_v27 = vand.u32 4294901760, %v60_v57 }
 0x134   :  { %4657 = vpow2.f32 %v2181_v0  ;;  %2100 = vmax.xlane.f32.xlu0 %v2099_v3  ;;  %2229 = vadd.xlane.f32.xlu1 %v2228_v53  ;;  %v5172_v14 = vadd.f32 %v847_v1, %v816_v9  ;;  %v1665_v33 = vand.u32 4294901760, %v1664_v47  ;;  %v1672_v3 = vsub.f32 %v5214_v23, %v1671_v43  ;;  %v59_v9 = vld [vmem:[%s6594_s1 + $0xa8] sm:$0xff] }
 0x135   :  { %1706 = vmatpush.msrb.mxu2 %v1664_v47  ;;  %1744 = vmatpush.msrb.mxu3 %v5197_v34  ;;  %v5241_v53 = vsub.f32 %v1592_v55, %v5226_v51  ;;  %v1621_v7 = vand.u32 4294901760, %v1620_v35  ;;  %v5264_v36 = vand.u32 4294901760, %v59_v9  ;;  %v1018_v39 = vadd.f32 %v1017_v59, %v981_v20 }
 0x136   :  { %v5204_v41 = vsel %vm2086_vm2, %v5172_v14, -inf  ;;  %v1666_v1 = vsub.f32 %v1664_v47, %v1665_v33  ;;  %1618 = vmatpush.msrb.mxu0 %v5197_v34  ;;  %v5273_v60 = vsub.f32 %v60_v57, %v5259_v27  ;;  %v1089_v47 = vpop.f32.mrf.mxu3 }
 0x137   :  { %1709 = vmatpush.msrb.mxu2 %v5214_v23  ;;  %1748 = vmatmul.f32.vlgmr.msrb.gmra.mxu3 %v1621_v7  ;;  %v1622_v19 = vsub.f32 %v1620_v35, %v1621_v7  ;;  %v1629_v24 = vand.u32 4294901760, %v5241_v53 }
 0x138   :  { %1712 = vmatmul.f32.vlgmr.msrb.gmra.mxu2 %v1620_v35  ;;  %1780 = vmatpush.msra.mxu0 %v1659_v52  ;;  %v986_v52 = vadd.f32 %v985_v44, %v948_v8  ;;  %v1023_v59 = vpop.f32.mrf.mxu1 }
 0x139   :  { %v1623_v45 = vand.u32 4294901760, %v1622_v19  ;;  %v1630_v49 = vsub.f32 %v5241_v53, %v1629_v24 }
 0x13a   :  { %v5162_v4 = vpop.eup %4657  ;;  %1784 = vmatpush.msra.mxu0 %v1665_v33 }
 0x13b   :  { %v2092_v10 = vpop.xlane.xlu1 %2091  ;;  %v2231_v12 = vsel %vm2086_vm2, %v5162_v4, 0.0  ;;  %1624 = vmatmul.f32.vlgmr.msrb.gmra.mxu0 %v1623_v45 }
 0x13c   :  { %v2156_v15 = vsub.f32 %v5004_v31, %v2092_v10  ;;  %2232 = vadd.xlane.f32.xlu2 %v2231_v12  ;;  %v5180_v31 = vpop.f32.mrf.mxu2  ;;  %v35_v10 = vld [vmem:[%s6595_s0 + $0xa8] sm:$0xff]  ;;  %v1667_v12 = vand.u32 4294901760, %v1666_v1  ;;  %1788 = vmatpush.msra.mxu0 %v1671_v43  ;;  %v36_v43 = vld [vmem:[%s6595_s0 + $0xb0] sm:$0xff] }
 0x13d   :  { %v1054_v28 = vadd.f32 %v5180_v31, %v1012_v56  ;;  %v107_v37 = vmul.f32 0.2236068, %v35_v10  ;;  %v5277_v31 = vsub.f32 %v59_v9, %v5264_v36  ;;  %v1911_v56 = vand.u32 4294901760, %v5273_v60 }
 0x13e   :  { %v2183_v18 = vmul.f32 1.442695, %v2156_v15  ;;  %v1673_v15 = vand.u32 4294901760, %v1672_v3  ;;  %1668 = vmatpush.msrb.mxu1 %v1667_v12  ;;  %v108_v35 = vmul.f32 0.2236068, %v36_v43  ;;  %v1093_v19 = vpop.f32.mrf.mxu3 }
 0x13f   :  { %v1835_v5 = vsel %vm110_vm1, %v107_v37, 0  ;;  %v1917_v33 = vand.u32 4294901760, %v5277_v31  ;;  %1754 = vmatmul.f32.gmra.mxu3 %v1629_v24  ;;  %v5304_v57 = vadd.f32 %v5217_v25, %v1054_v28 }
 0x140   :  { %4659 = vpow2.f32 %v2183_v18  ;;  %1674 = vmatpush.msrb.mxu1 %v1673_v15  ;;  %1717 = vmatmul.f32.gmra.mxu2 %v5241_v53  ;;  %v1024_v53 = vadd.f32 %v1023_v59, %v986_v52 }
 0x141   :  { %1676 = vmatmul.f32.vlgmr.msrb.gmra.mxu1 %v5220_v30  ;;  %v1918_v20 = vsub.f32 %v5277_v31, %v1917_v33  ;;  %v2108_v15 = vsel %vm110_vm1, %v5304_v57, -inf }
 0x142   :  { %1816 = vmatpush.msra.mxu1 %v5184_v26 }
 0x143   :  { %v2095_v38 = vpop.xlane.xlu2 %2094 }
 0x144   :  { %v2157_v2 = vsub.f32 %v5008_v42, %v2095_v38  ;;  %2103 = vmax.xlane.f32.xlu2 %v2102_v22  ;;  %v1057_v18 = vpop.f32.mrf.mxu2  ;;  %v5257_v22 = vand.u32 4294901760, %v1844_v17  ;;  %v5270_v38 = vsub.f32 %v1595_v48, %v5253_v16  ;;  %v1912_v48 = vsub.f32 %v5273_v60, %v1911_v56  ;;  %1818 = vmatpush.msra.mxu1 %v5195_v32 }
 0x146   :  { %v5228_v58 = vpop.eup %4659  ;;  %v2185_v42 = vmul.f32 1.442695, %v2157_v2  ;;  %1860 = vmatpush.msra.mxu2 %v5257_v22  ;;  %v1904_v46 = vsub.f32 %v1844_v17, %v5257_v22  ;;  %v5282_v2 = vand.u32 4294901760, %v1835_v5  ;;  %v1637_v1 = vand.u32 4294901760, %v5270_v38  ;;  %1820 = vmatpush.msra.mxu1 %v5197_v34  ;;  %v5370_v52 = vpop.f32.mrf.mxu3 }
 0x147   :  { %v2234_v0 = vsel %vm110_vm1, %v5228_v58, 0.0  ;;  %v1913_v26 = vand.u32 4294901760, %v1912_v48  ;;  %v1919_v34 = vand.u32 4294901760, %v1918_v20 }
 0x148   :  { %4661 = vpow2.f32 %v2185_v42  ;;  %2235 = vadd.xlane.f32.xlu1 %v2234_v0  ;;  %v1905_v21 = vand.u32 4294901760, %v1904_v46  ;;  %1862 = vmatpush.msra.mxu2 %v5259_v27  ;;  %v1058_v42 = vadd.f32 %v1057_v18, %v1018_v39  ;;  %v5298_v63 = vsub.f32 %v1835_v5, %v5282_v2  ;;  %v37_v18 = vld [vmem:[%s6595_s0 + $0xb8] sm:$0xf] }
 0x149   :  { %v1631_v0 = vand.u32 4294901760, %v1630_v49  ;;  %1949 = vmatpush.msrb.mxu0 %v1904_v46  ;;  %v1638_v32 = vsub.f32 %v5270_v38, %v1637_v1  ;;  %1680 = vmatmul.f32.gmra.mxu1 %v5226_v51  ;;  %v109_v8 = vmul.f32 0.2236068, %v37_v18  ;;  %v63_v49 = vld [vmem:[%s6596_s2 + $0x8] sm:$0xff] }
 0x14a   :  { %v1906_v61 = vsub.f32 %v1904_v46, %v1905_v21  ;;  %1864 = vmatpush.msra.mxu2 %v5264_v36  ;;  %v5308_v6 = vadd.f32 %v1089_v47, %v1058_v42  ;;  %v1867_v9 = vand.u32 4294901760, %v5298_v63  ;;  %1760 = vmatmul.f32.gmra.mxu3 %v1637_v1  ;;  %v67_v18 = vld [vmem:[%s6596_s2 + $0x28] sm:$0xf] }
 0x14b   :  { %v2098_v29 = vpop.xlane.xlu2 %2097  ;;  %1632 = vmatmul.f32.gmra.mxu0 %v1631_v0  ;;  %1722 = vmatmul.f32.gmra.mxu2 %v5270_v38  ;;  %v1639_v37 = vand.u32 4294901760, %v1638_v32  ;;  %v1841_v39 = vsel %vm110_vm1, %v109_v8, 0 }
 0x14c   :  { %v2158_v40 = vsub.f32 %v5012_v50, %v2098_v29  ;;  %v1907_v3 = vand.u32 4294901760, %v1906_v61  ;;  %2026 = vmatpush.msrb.mxu2 %v1905_v21  ;;  %v1061_v7 = vpop.f32.mrf.mxu2  ;;  %v2111_v24 = vsel %vm110_vm1, %v5308_v6, -inf  ;;  %v1868_v28 = vsub.f32 %v5298_v63, %v1867_v9  ;;  %1986 = vmatpush.msrb.mxu1 %v5257_v22 }
 0x14d   :  { %v1062_v12 = vadd.f32 %v1061_v7, %v1024_v53  ;;  %1952 = vmatpush.msrb.mxu0 %v5273_v60  ;;  %v1881_v46 = vand.u32 4294901760, %v1841_v39 }
 0x14e   :  { %v5279_v50 = vpop.eup %4661  ;;  %v2187_v23 = vmul.f32 1.442695, %v2158_v40  ;;  %1908 = vmatpush.msra.mxu3 %v1907_v3  ;;  %2030 = vmatpush.msrb.mxu2 %v1911_v56  ;;  %v1869_v44 = vand.u32 4294901760, %v1868_v28  ;;  %v5379_v20 = vpop.f32.mrf.mxu3 }
 0x14f   :  { %v2237_v55 = vsel %vm110_vm1, %v5279_v50, 0.0  ;;  %v5334_v40 = vadd.f32 %v1093_v19, %v1062_v12  ;;  %1988 = vmatpush.msrb.mxu1 %v5259_v27  ;;  %1955 = vmatpush.msrb.mxu0 %v5277_v31  ;;  %v1882_v5 = vsub.f32 %v1841_v39, %v1881_v46  ;;  %v2913_v19 = vsel %vm120_vm0, %v67_v18, 0 }
 0x150   :  { %4663 = vpow2.f32 %v2187_v23  ;;  %2238 = vadd.xlane.f32.xlu0 %v2237_v55  ;;  %2106 = vmax.xlane.f32.xlu1 %v5204_v41  ;;  %v1838_v41 = vsel %vm110_vm1, %v108_v35, 0  ;;  %v62_v55 = vld [vmem:[%s6596_s2] sm:$0xff]  ;;  %v5398_v8 = vand.u32 4294901760, %v2913_v19 }
 0x151   :  { %v5312_v10 = vand.u32 4294901760, %v1838_v41  ;;  %1914 = vmatpush.msra.mxu3 %v1913_v26  ;;  %2034 = vmatpush.msrb.mxu2 %v1917_v33  ;;  %v2114_v38 = vsel %vm2086_vm2, %v5334_v40, -inf  ;;  %v1883_v31 = vand.u32 4294901760, %v1882_v5  ;;  %v2686_v42 = vand.u32 4294901760, %v62_v55 }
 0x152   :  { %1990 = vmatpush.msrb.mxu1 %v5264_v36 }
 0x153   :  { %v1874_v29 = vsub.f32 %v1838_v41, %v5312_v10  ;;  %1920 = vmatpush.msra.mxu3 %v1919_v34  ;;  %1640 = vmatmul.f32.gmra.mxu0 %v1639_v37  ;;  %v1884_v47 = vsub.f32 %v1882_v5, %v1883_v31 }
 0x154   :  { %1684 = vmatmul.f32.gmra.mxu1 %v5253_v16  ;;  %1870 = vmatmul.f32.vlgmr.msra.gmra.mxu2 %v1869_v44  ;;  %v1221_v59 = vpop.f32.mrf.mxu2  ;;  %v5403_v44 = vsub.f32 %v2913_v19, %v5398_v8 }
 0x155   :  { %2062 = vmatpush.msrb.mxu3 %v5257_v22  ;;  %v1875_v45 = vand.u32 4294901760, %v1874_v29  ;;  %v1885_v23 = vand.u32 4294901760, %v1884_v47 }
 0x156   :  { %v5314_v25 = vpop.eup %4663  ;;  %1922 = vmatmul.f32.vlgmr.msra.gmra.mxu3 %v5282_v2  ;;  %v5387_v12 = vpop.f32.mrf.mxu3 }
 0x157   :  { %v2240_v17 = vsel %vm2086_vm2, %v5314_v25, 0.0  ;;  %2064 = vmatpush.msrb.mxu3 %v5259_v27  ;;  %v1876_v60 = vsub.f32 %v1874_v29, %v1875_v45 }
 0x158   :  { %2109 = vmax.xlane.f32.xlu0 %v2108_v15  ;;  %2241 = vadd.xlane.f32.xlu2 %v2240_v17 }
 0x159   :  { %2112 = vmax.xlane.f32.xlu1 %v2111_v24  ;;  %2066 = vmatpush.msrb.mxu3 %v5264_v36  ;;  %v1877_v22 = vand.u32 4294901760, %v1876_v60 }
 0x15b   :  { %1790 = vmatmul.f32.vlgmr.msra.gmra.mxu0 %v5220_v30 }
 0x15c   :  { %1822 = vmatmul.f32.vlgmr.msra.gmra.mxu1 %v5220_v30  ;;  %1878 = vmatmul.f32.gmra.mxu2 %v1877_v22  ;;  %v5360_v30 = vpop.f32.mrf.mxu1  ;;  %v2974_v22 = vand.u32 4294901760, %v5403_v44 }
 0x15e   :  { %1926 = vmatmul.f32.gmra.mxu3 %v5312_v10 }
 0x160   :  { %2115 = vmax.xlane.f32.xlu2 %v2114_v38 }
 0x163   :  { %1794 = vmatmul.f32.gmra.mxu0 %v5226_v51 }
 0x164   :  { %1826 = vmatmul.f32.gmra.mxu1 %v5226_v51  ;;  %1886 = vmatmul.f32.gmra.mxu2 %v1885_v23  ;;  %v1133_v51 = vpop.f32.mrf.mxu0  ;;  %v5375_v56 = vpop.f32.mrf.mxu1 }
 0x165   :  { %v1186_v24 = vadd.f32 %v5360_v30, %v1133_v51 }
 0x166   :  { %1930 = vmatmul.f32.gmra.mxu3 %v1881_v46 }
 0x167   :  { %v1222_v38 = vadd.f32 %v1221_v59, %v1186_v24 }
 0x16b   :  { %1798 = vmatmul.f32.gmra.mxu0 %v5253_v16 }
 0x16c   :  { %1830 = vmatmul.f32.gmra.mxu1 %v5253_v16  ;;  %2036 = vmatmul.f32.vlgmr.msrb.gmra.mxu2 %v5282_v2  ;;  %v64_v16 = vld [vmem:[%s6596_s2 + $0x10] sm:$0xf]  ;;  %v5377_v61 = vpop.f32.mrf.mxu0  ;;  %v5381_v7 = vpop.f32.mrf.mxu1 }
 0x16d   :  { %v2667_v27 = vsel %vm120_vm0, %v64_v16, 0 }
 0x16e   :  { %2068 = vmatmul.f32.vlgmr.msrb.gmra.mxu3 %v5282_v2  ;;  %v2682_v36 = vand.u32 4294901760, %v2667_v27  ;;  %v2684_v2 = vand.u32 4294901760, %v63_v49 }
 0x170   :  { %v2727_v21 = vsub.f32 %v2667_v27, %v2682_v36  ;;  %2683 = vmatpush.msra.mxu0 %v2682_v36  ;;  %2809 = vmatpush.msra.mxu3 %v2682_v36  ;;  %v2733_v43 = vsub.f32 %v63_v49, %v2684_v2 }
 0x172   :  { %v2728_v33 = vand.u32 4294901760, %v2727_v21  ;;  %2772 = vmatpush.msra.mxu2 %v2727_v21  ;;  %2685 = vmatpush.msra.mxu0 %v2684_v2  ;;  %v2734_v48 = vand.u32 4294901760, %v2733_v43 }
 0x173   :  { %1958 = vmatmul.f32.vlgmr.msrb.gmra.mxu0 %v5298_v63  ;;  %2811 = vmatpush.msra.mxu3 %v2684_v2  ;;  %v2739_v63 = vsub.f32 %v62_v55, %v2686_v42 }
 0x174   :  { %1994 = vmatmul.f32.vlgmr.msrb.gmra.mxu1 %v1867_v9  ;;  %2040 = vmatmul.f32.gmra.mxu2 %v5312_v10  ;;  %v2729_v35 = vsub.f32 %v2727_v21, %v2728_v33  ;;  %v2735_v1 = vsub.f32 %v2733_v43, %v2734_v48  ;;  %v5383_v9 = vpop.f32.mrf.mxu2  ;;  %v5389_v15 = vpop.f32.mrf.mxu1 }
 0x175   :  { %2775 = vmatpush.msra.mxu2 %v2733_v43  ;;  %2813 = vmatpush.msra.mxu3 %v2686_v42  ;;  %v2740_v3 = vand.u32 4294901760, %v2739_v63 }
 0x176   :  { %2072 = vmatmul.f32.gmra.mxu3 %v5312_v10  ;;  %v2730_v0 = vand.u32 4294901760, %v2729_v35  ;;  %2687 = vmatpush.msra.mxu0 %v2686_v42  ;;  %v2736_v41 = vand.u32 4294901760, %v2735_v1  ;;  %v5385_v10 = vpop.f32.mrf.mxu0 }
 0x177   :  { %2778 = vmatpush.msra.mxu2 %v2739_v63  ;;  %v2741_v53 = vsub.f32 %v2739_v63, %v2740_v3 }
 0x178   :  { %2849 = vmatpush.msrb.mxu0 %v2728_v33  ;;  %2731 = vmatpush.msra.mxu1 %v2730_v0  ;;  %v1258_v33 = vadd.f32 %v5370_v52, %v1222_v38 }
 0x179   :  { %v2742_v26 = vand.u32 4294901760, %v2741_v53  ;;  %2929 = vmatpush.msrb.mxu2 %v5398_v8 }
 0x17a   :  { %2853 = vmatpush.msrb.mxu0 %v2734_v48  ;;  %2737 = vmatpush.msra.mxu1 %v2736_v41 }
 0x17b   :  { %1963 = vmatmul.f32.gmra.mxu0 %v1874_v29 }
 0x17c   :  { %2000 = vmatmul.f32.gmra.mxu1 %v1875_v45  ;;  %2044 = vmatmul.f32.gmra.mxu2 %v1881_v46  ;;  %v5391_v17 = vpop.f32.mrf.mxu2  ;;  %v5416_v51 = vpop.f32.mrf.mxu1 }
 0x17d   :  { %2857 = vmatpush.msrb.mxu0 %v2740_v3  ;;  %2743 = vmatpush.msra.mxu1 %v2742_v26 }
 0x17e   :  { %2076 = vmatmul.f32.gmra.mxu3 %v1881_v46  ;;  %v1299_v34 = vpop.f32.mrf.mxu0  ;;  %v66_v46 = vld [vmem:[%s6596_s2 + $0x20] sm:$0xff] }
 0x17f   :  { %2885 = vmatpush.msrb.mxu1 %v2682_v36  ;;  %v2975_v36 = vsub.f32 %v5403_v44, %v2974_v22  ;;  %v1300_v53 = vadd.f32 %v1299_v34, %v1258_v33 }
 0x181   :  { %2887 = vmatpush.msrb.mxu1 %v2684_v2  ;;  %v2976_v43 = vand.u32 4294901760, %v2975_v36 }
 0x183   :  { %1968 = vmatmul.f32.gmra.mxu0 %v1882_v5  ;;  %2889 = vmatpush.msrb.mxu1 %v2686_v42  ;;  %v5411_v5 = vpop.f32.mrf.mxu3 }
 0x184   :  { %2006 = vmatmul.f32.gmra.mxu1 %v1883_v31  ;;  %v5414_v31 = vand.u32 4294901760, %v66_v46  ;;  %v5421_v27 = vpop.f32.mrf.mxu2  ;;  %2977 = vmatpush.msrb.mxu3 %v2976_v43 }
 0x186   :  { %v5427_v49 = vsub.f32 %v66_v46, %v5414_v31  ;;  %2931 = vmatpush.msrb.mxu2 %v5414_v31  ;;  %v5430_v21 = vpop.f32.mrf.mxu0 }
 0x188   :  { %v2980_v35 = vand.u32 4294901760, %v5427_v49 }
 0x18a   :  { %v2981_v19 = vsub.f32 %v5427_v49, %v2980_v35 }
 0x18b   :  { %v5456_v34 = vpop.f32.mrf.mxu3 }
 0x18c   :  { %v2982_v46 = vand.u32 4294901760, %v2981_v19 }
 0x18e   :  { %v5471_v36 = vpop.f32.mrf.mxu0  ;;  %2983 = vmatpush.msrb.mxu3 %v2982_v46 }
 0x19f   :  { %v2227_v32 = vpop.xlane.xlu0 %2226 }
 0x1a0   :  { %4665 = vrcp.f32 %v2227_v32  ;;  %v2306_v47 = vand.u32 2147483647, %v2227_v32  ;;  %v2308_v23 = vand.u32 2147483648, %v2227_v32  ;;  %vm2302_vm4 = vweird.f32 %v2227_v32 }
 0x1a2   :  { %v2309_v59 = vor.u32 1.1754944e-38, %v2308_v23  ;;  %vm2307_vm6 = vcmp.eq.f32.partialorder %v2306_v47, 8.507059e+37  ;;  %v5464_v47 = vpop.f32.mrf.mxu2 }
 0x1a6   :  { %v4666_v28 = vpop.eup %4665 }
 0x1a7   :  { %v2298_v29 = vmul.f32 %v4666_v28, %v2227_v32  ;;  %v2101_v37 = vpop.xlane.xlu0 %2100  ;;  %v5400_v39 = vpop.xlane.xlu1 %2229  ;;  %vm2303_vm3 = vweird.f32 %v4666_v28 }
 0x1a8   :  { %v2159_v45 = vsub.f32 %v5146_v11, %v2101_v37  ;;  %4667 = vrcp.f32 %v5400_v39  ;;  %v65_v11 = vld [vmem:[%s6596_s2 + $0x18] sm:$0xff]  ;;  %vm2304_vm5 = vmor %vm2302_vm4, %vm2303_vm3  ;;  %v2320_v32 = vand.u32 2147483647, %v5400_v39  ;;  %v2322_v18 = vand.u32 2147483648, %v5400_v39 }
 0x1a9   :  { %v2299_v60 = vsub.f32 1.0, %v2298_v29  ;;  %v5432_v2 = vand.u32 4294901760, %v65_v11  ;;  %vm2316_vm8 = vweird.f32 %v5400_v39 }
 0x1aa   :  { %v2189_v30 = vmul.f32 1.442695, %v2159_v45  ;;  %v5460_v45 = vpop.f32.mrf.mxu1  ;;  %vm2321_vm10 = vcmp.eq.f32.partialorder %v2320_v32, 8.507059e+37  ;;  %v5506_v46 = vpop.f32.mrf.mxu2 }
 0x1ab   :  { %v2300_v16 = vmul.f32 %v4666_v28, %v2299_v60  ;;  %v5437_v48 = vsub.f32 %v65_v11, %v5432_v2  ;;  %2933 = vmatpush.msrb.mxu2 %v5432_v2  ;;  %v5467_v11 = vadd.f32 %v5389_v15, %v1300_v53 }
 0x1ac   :  { %4669 = vpow2.f32 %v2189_v30  ;;  %v2323_v30 = vor.u32 1.1754944e-38, %v2322_v18 }
 0x1ad   :  { %v2301_v55 = vadd.f32 %v4666_v28, %v2300_v16  ;;  %v2986_v24 = vand.u32 4294901760, %v5437_v48 }
 0x1ae   :  { %v4668_v42 = vpop.eup %4667 }
 0x1af   :  { %v2305_v63 = vsel %vm2304_vm5, %v4666_v28, %v2301_v55  ;;  %v2312_v0 = vmul.f32 %v4668_v42, %v5400_v39  ;;  %v5441_v1 = vpop.xlane.xlu2 %2232  ;;  %vm2317_vm7 = vweird.f32 %v4668_v42  ;;  %v2987_v38 = vsub.f32 %v5437_v48, %v2986_v24 }
 0x1b0   :  { %v2310_v3 = vsel %vm2307_vm6, %v2309_v59, %v2305_v63  ;;  %4671 = vrcp.f32 %v5441_v1  ;;  %vm2318_vm9 = vmor %vm2316_vm8, %vm2317_vm7  ;;  %vm2330_vm12 = vweird.f32 %v5441_v1 }
 0x1b1   :  { %v2633_v52 = vmul.f32 %v5136_v54, %v2310_v3  ;;  %v2313_v41 = vsub.f32 1.0, %v2312_v0  ;;  %v2988_v55 = vand.u32 4294901760, %v2987_v38  ;;  %v1190_v0 = vadd.f32 %v5375_v56, %v5377_v61 }
 0x1b2   :  { %v5445_v26 = vpop.eup %4669  ;;  %v2334_v56 = vand.u32 2147483647, %v5441_v1 }
 0x1b3   :  { %v2314_v28 = vmul.f32 %v4668_v42, %v2313_v41  ;;  %v2243_v29 = vsel %vm110_vm1, %v5445_v26, 0.0  ;;  %v2658_v54 = vsel %vm110_vm1, %v2633_v52, 0  ;;  %2989 = vmatpush.msrb.mxu3 %v2988_v55 }
 0x1b4   :  { %2244 = vadd.xlane.f32.xlu0 %v2243_v29  ;;  %v5458_v37 = vand.u32 4294901760, %v2658_v54  ;;  %v5501_v29 = vpop.f32.mrf.mxu1  ;;  %vm2335_vm14 = vcmp.eq.f32.partialorder %v2334_v56, 8.507059e+37 }
 0x1b5   :  { %v2315_v60 = vadd.f32 %v4668_v42, %v2314_v28  ;;  %v5497_v28 = vpop.f32.mrf.mxu3 }
 0x1b6   :  { %v4672_v23 = vpop.eup %4671  ;;  %2745 = vmatmul.f32.vlgmr.msra.gmra.mxu1 %v5458_v37  ;;  %v2689_v16 = vsub.f32 %v2658_v54, %v5458_v37 }
 0x1b7   :  { %v2319_v33 = vsel %vm2318_vm9, %v4668_v42, %v2315_v60  ;;  %v2326_v39 = vmul.f32 %v4672_v23, %v5441_v1  ;;  %v2104_v43 = vpop.xlane.xlu2 %2103  ;;  %3055 = vmatpush.msra.mxu1 %v5398_v8  ;;  %v2336_v42 = vand.u32 2147483648, %v5441_v1  ;;  %vm2331_vm11 = vweird.f32 %v4672_v23  ;;  %v5508_v60 = vpop.f32.mrf.mxu0 }
 0x1b8   :  { %v2324_v59 = vsel %vm2321_vm10, %v2323_v30, %v2319_v33  ;;  %v2160_v63 = vsub.f32 %v5168_v13, %v2104_v43  ;;  %2781 = vmatmul.f32.vlgmr.msra.gmra.mxu2 %v2689_v16  ;;  %v2690_v15 = vand.u32 4294901760, %v2689_v16  ;;  %v2117_v13 = vsel %vm110_vm1, %v5467_v11, -inf  ;;  %vm2332_vm13 = vmor %vm2330_vm12, %vm2331_vm11 }
 0x1b9   :  { %v2327_v3 = vsub.f32 1.0, %v2326_v39  ;;  %v2634_v52 = vmul.f32 %v5150_v62, %v2324_v59  ;;  %3057 = vmatpush.msra.mxu1 %v5414_v31  ;;  %3095 = vmatpush.msra.mxu2 %v2974_v22  ;;  %v1227_v1 = vadd.f32 %v5383_v9, %v1190_v0 }
 0x1ba   :  { %v2191_v41 = vmul.f32 1.442695, %v2160_v63  ;;  %2817 = vmatmul.f32.vlgmr.msra.gmra.mxu3 %v2690_v15  ;;  %v2691_v53 = vsub.f32 %v2689_v16, %v2690_v15 }
 0x1bb   :  { %v2328_v32 = vmul.f32 %v4672_v23, %v2327_v3  ;;  %v5486_v61 = vpop.xlane.xlu1 %2235  ;;  %v2661_v62 = vsel %vm110_vm1, %v2634_v52, 0  ;;  %3059 = vmatpush.msra.mxu1 %v5432_v2  ;;  %3131 = vmatpush.msra.mxu3 %v5398_v8  ;;  %v2337_v8 = vor.u32 1.1754944e-38, %v2336_v42  ;;  %v1264_v30 = vadd.f32 %v5379_v20, %v1227_v1 }
 0x1bc   :  { %4673 = vpow2.f32 %v2191_v41  ;;  %2118 = vmax.xlane.f32.xlu0 %v2117_v13  ;;  %3099 = vmatpush.msra.mxu2 %v2980_v35  ;;  %v2692_v18 = vand.u32 4294901760, %v2691_v53  ;;  %v5495_v19 = vand.u32 4294901760, %v2661_v62  ;;  %v2350_v15 = vand.u32 2147483648, %v5486_v61 }
 0x1bd   :  { %v2329_v22 = vadd.f32 %v4672_v23, %v2328_v32  ;;  %4675 = vrcp.f32 %v5486_v61  ;;  %3133 = vmatpush.msra.mxu3 %v5414_v31  ;;  %v1304_v63 = vadd.f32 %v5430_v21, %v1264_v30  ;;  %v5532_v3 = vpop.f32.mrf.mxu3  ;;  %v5540_v21 = vpop.f32.mrf.mxu2  ;;  %vm2344_vm3 = vweird.f32 %v5486_v61 }
 0x1be   :  { %3103 = vmatpush.msra.mxu2 %v2986_v24  ;;  %2693 = vmatmul.f32.vlgmr.msra.gmra.mxu0 %v2692_v18  ;;  %v2697_v35 = vsub.f32 %v2661_v62, %v5495_v19  ;;  %v1432_v32 = vadd.f32 %v5411_v5, %v5421_v27  ;;  %v2351_v56 = vor.u32 1.1754944e-38, %v2350_v15 }
 0x1bf   :  { %v2333_v54 = vsel %vm2332_vm13, %v4672_v23, %v2329_v22  ;;  %2749 = vmatmul.f32.gmra.mxu1 %v5495_v19  ;;  %3018 = vmatpush.msra.mxu0 %v5403_v44  ;;  %v1472_v53 = vpop.f32.mrf.mxu0  ;;  %v5547_v62 = vadd.f32 %v5416_v51, %v1304_v63 }
 0x1c0   :  { %v2338_v38 = vsel %vm2335_vm14, %v2337_v8, %v2333_v54  ;;  %3135 = vmatpush.msra.mxu3 %v5432_v2  ;;  %2786 = vmatmul.f32.gmra.mxu2 %v2697_v35  ;;  %v2698_v31 = vand.u32 4294901760, %v2697_v35 }
 0x1c1   :  { %v2635_v9 = vmul.f32 %v5162_v4, %v2338_v38  ;;  %3021 = vmatpush.msra.mxu0 %v5427_v49  ;;  %v1194_v4 = vadd.f32 %v5381_v7, %v5385_v10  ;;  %v5537_v7 = vpop.f32.mrf.mxu1 }
 0x1c2   :  { %v5513_v24 = vpop.eup %4673  ;;  %2823 = vmatmul.f32.gmra.mxu3 %v2698_v31  ;;  %v2699_v33 = vsub.f32 %v2697_v35, %v2698_v31 }
 0x1c3   :  { %v4676_v23 = vpop.eup %4675  ;;  %v5517_v16 = vpop.xlane.xlu0 %2238  ;;  %v2246_v44 = vsel %vm110_vm1, %v5513_v24, 0.0  ;;  %v2664_v2 = vsel %vm110_vm1, %v2635_v9, 0  ;;  %3024 = vmatpush.msra.mxu0 %v5437_v48  ;;  %v2348_v48 = vand.u32 2147483647, %v5486_v61  ;;  %v1232_v10 = vadd.f32 %v5391_v17, %v1194_v4 }
 0x1c4   :  { %v2107_v55 = vpop.xlane.xlu1 %2106  ;;  %v2340_v39 = vmul.f32 %v4676_v23, %v5486_v61  ;;  %4677 = vrcp.f32 %v5517_v16  ;;  %2247 = vadd.xlane.f32.xlu1 %v2246_v44  ;;  %v2700_v49 = vand.u32 4294901760, %v2699_v33  ;;  %v5528_v59 = vand.u32 4294901760, %v2664_v2 }
 0x1c5   :  { %v2161_v20 = vsub.f32 %v5172_v14, %v2107_v55  ;;  %vm2345_vm15 = vweird.f32 %v4676_v23  ;;  %vm2349_vm5 = vcmp.eq.f32.partialorder %v2348_v48, 8.507059e+37  ;;  %v1270_v5 = vadd.f32 %v5387_v12, %v1232_v10  ;;  %v1549_v15 = vpop.f32.mrf.mxu2 }
 0x1c6   :  { %v2341_v43 = vsub.f32 1.0, %v2340_v39  ;;  %2701 = vmatmul.f32.gmra.mxu0 %v2700_v49  ;;  %v2705_v14 = vsub.f32 %v2664_v2, %v5528_v59  ;;  %vm2346_vm4 = vmor %vm2344_vm3, %vm2345_vm15  ;;  %v2364_v51 = vand.u32 2147483648, %v5517_v16  ;;  %v1468_v55 = vadd.f32 %v5508_v60, %v1432_v32  ;;  %v5569_v39 = vpop.f32.mrf.mxu3 }
 0x1c7   :  { %v2193_v0 = vmul.f32 1.442695, %v2161_v20  ;;  %2753 = vmatmul.f32.gmra.mxu1 %v5528_v59  ;;  %vm2358_vm7 = vweird.f32 %v5517_v16  ;;  %v2120_v49 = vsel %vm110_vm1, %v5547_v62, -inf }
 0x1c8   :  { %v2342_v52 = vmul.f32 %v4676_v23, %v2341_v43  ;;  %2791 = vmatmul.f32.gmra.mxu2 %v2705_v14  ;;  %v2706_v13 = vand.u32 4294901760, %v2705_v14  ;;  %v2365_v4 = vor.u32 1.1754944e-38, %v2364_v51 }
 0x1c9   :  { %4679 = vpow2.f32 %v2193_v0 }
 0x1ca   :  { %v4678_v42 = vpop.eup %4677  ;;  %v2343_v41 = vadd.f32 %v4676_v23, %v2342_v52  ;;  %2829 = vmatmul.f32.gmra.mxu3 %v2706_v13  ;;  %v2707_v9 = vsub.f32 %v2705_v14, %v2706_v13  ;;  %v1440_v52 = vadd.f32 %v5497_v28, %v5506_v46 }
 0x1cb   :  { %v2354_v17 = vmul.f32 %v4678_v42, %v5517_v16  ;;  %v2110_v22 = vpop.xlane.xlu0 %2109  ;;  %v5550_v18 = vpop.xlane.xlu2 %2241  ;;  %vm2359_vm6 = vweird.f32 %v4678_v42 }
 0x1cc   :  { %v2347_v8 = vsel %vm2346_vm4, %v4676_v23, %v2343_v41  ;;  %v2162_v61 = vsub.f32 %v5304_v57, %v2110_v22  ;;  %4681 = vrcp.f32 %v5550_v18  ;;  %v2113_v1 = vpop.xlane.xlu1 %2112  ;;  %v2362_v57 = vand.u32 2147483647, %v5517_v16  ;;  %vm2360_vm8 = vmor %vm2358_vm7, %vm2359_vm6  ;;  %v1477_v41 = vpop.f32.mrf.mxu0 }
 0x1cd   :  { %v2352_v27 = vsel %vm2349_vm5, %v2351_v56, %v2347_v8  ;;  %v2355_v54 = vsub.f32 1.0, %v2354_v17  ;;  %v2163_v31 = vsub.f32 %v5308_v6, %v2113_v1  ;;  %v2708_v44 = vand.u32 4294901760, %v2707_v9 }
 0x1ce   :  { %v2636_v35 = vmul.f32 %v5228_v58, %v2352_v27  ;;  %v2195_v38 = vmul.f32 1.442695, %v2162_v61  ;;  %v1436_v6 = vadd.f32 %v5456_v34, %v5464_v47  ;;  %v1515_v34 = vpop.f32.mrf.mxu1  ;;  %v1308_v47 = vadd.f32 %v5471_v36, %v1270_v5  ;;  %v1585_v9 = vpop.f32.mrf.mxu3 }
 0x1cf   :  { %v5558_v23 = vpop.eup %4679  ;;  %v2356_v30 = vmul.f32 %v4678_v42, %v2355_v54  ;;  %v2197_v12 = vmul.f32 1.442695, %v2163_v31  ;;  %2891 = vmatmul.f32.vlgmr.msrb.gmra.mxu1 %v5458_v37  ;;  %2709 = vmatmul.f32.gmra.mxu0 %v2708_v44  ;;  %vm2363_vm9 = vcmp.eq.f32.partialorder %v2362_v57, 8.507059e+37  ;;  %v1504_v36 = vadd.f32 %v5501_v29, %v1468_v55 }
 0x1d0   :  { %4683 = vpow2.f32 %v2195_v38  ;;  %v2249_v58 = vsel %vm2086_vm2, %v5558_v23, 0.0  ;;  %v2904_v2 = vsel %vm110_vm1, %v2636_v35, 0  ;;  %v2376_v56 = vand.u32 2147483647, %v5550_v18 }
 0x1d1   :  { %v2357_v33 = vadd.f32 %v4678_v42, %v2356_v30  ;;  %2250 = vadd.xlane.f32.xlu2 %v2249_v58  ;;  %4685 = vpow2.f32 %v2197_v12  ;;  %v5572_v20 = vand.u32 4294901760, %v2904_v2  ;;  %v2378_v28 = vand.u32 2147483648, %v5550_v18  ;;  %v1553_v12 = vpop.f32.mrf.mxu2 }
 0x1d2   :  { %v4682_v60 = vpop.eup %4681  ;;  %vm2372_vm11 = vweird.f32 %v5550_v18  ;;  %v1546_v5 = vadd.f32 %v5540_v21, %v1504_v36  ;;  %v5613_v31 = vadd.f32 %v5460_v45, %v1308_v47  ;;  %vm2377_vm13 = vcmp.eq.f32.partialorder %v2376_v56, 8.507059e+37 }
 0x1d3   :  { %v2361_v16 = vsel %vm2360_vm8, %v4678_v42, %v2357_v33  ;;  %v2368_v43 = vmul.f32 %v4682_v60, %v5550_v18  ;;  %v2116_v63 = vpop.xlane.xlu2 %2115  ;;  %v5581_v48 = vsub.f32 %v2904_v2, %v5572_v20  ;;  %2991 = vmatmul.f32.vlgmr.msrb.gmra.mxu3 %v5572_v20  ;;  %v1473_v42 = vadd.f32 %v1472_v53, %v1436_v6 }
 0x1d4   :  { %v2366_v0 = vsel %vm2363_vm9, %v2365_v4, %v2361_v16  ;;  %v2164_v14 = vsub.f32 %v5334_v40, %v2116_v63  ;;  %vm2373_vm10 = vweird.f32 %v4682_v60  ;;  %v2379_v54 = vor.u32 1.1754944e-38, %v2378_v28 }
 0x1d5   :  { %v2369_v10 = vsub.f32 1.0, %v2368_v43  ;;  %v2637_v13 = vmul.f32 %v5279_v50, %v2366_v0  ;;  %v2936_v17 = vand.u32 4294901760, %v5581_v48  ;;  %v1478_v50 = vadd.f32 %v1477_v41, %v1440_v52  ;;  %vm2374_vm12 = vmor %vm2372_vm11, %vm2373_vm10 }
 0x1d6   :  { %v5587_v32 = vpop.eup %4683  ;;  %v2199_v46 = vmul.f32 1.442695, %v2164_v14  ;;  %v5610_v38 = vpop.f32.mrf.mxu1  ;;  %v1510_v21 = vadd.f32 %v5537_v7, %v1473_v42  ;;  %v5618_v55 = vadd.f32 %v5532_v3, %v1546_v5  ;;  %v2123_v7 = vsel %vm2086_vm2, %v5613_v31, -inf }
 0x1d7   :  { %v2370_v22 = vmul.f32 %v4682_v60, %v2369_v10  ;;  %v2252_v40 = vsel %vm110_vm1, %v5587_v32, 0.0  ;;  %v2907_v29 = vsel %vm110_vm1, %v2637_v13, 0  ;;  %v5595_v53 = vpop.eup %4685  ;;  %2895 = vmatmul.f32.gmra.mxu1 %v5495_v19  ;;  %v2937_v8 = vsub.f32 %v5581_v48, %v2936_v17  ;;  %2859 = vmatmul.f32.vlgmr.msrb.gmra.mxu0 %v5458_v37  ;;  %v5637_v16 = vpop.f32.mrf.mxu3 }
 0x1d8   :  { %4687 = vpow2.f32 %v2199_v46  ;;  %2253 = vadd.xlane.f32.xlu1 %v2252_v40  ;;  %v5601_v61 = vand.u32 4294901760, %v2907_v29  ;;  %v2255_v27 = vsel %vm110_vm1, %v5595_v53, 0.0  ;;  %v1516_v57 = vadd.f32 %v1515_v34, %v1478_v50  ;;  %v5632_v34 = vpop.f32.mrf.mxu0 }
 0x1d9   :  { %v2371_v1 = vadd.f32 %v4682_v60, %v2370_v22  ;;  %2121 = vmax.xlane.f32.xlu2 %v2120_v49  ;;  %2256 = vadd.xlane.f32.xlu0 %v2255_v27  ;;  %v2938_v51 = vand.u32 4294901760, %v2937_v8  ;;  %v1550_v6 = vadd.f32 %v1549_v15, %v1510_v21  ;;  %v5645_v52 = vpop.f32.mrf.mxu2  ;;  %v70_v8 = vld [vmem:[%s6596_s2 + $0x40] sm:$0xf]  ;;  %v69_v27 = vld [vmem:[%s6596_s2 + $0x38] sm:$0xff]  ;;  %v68_v21 = vld [vmem:[%s6596_s2 + $0x30] sm:$0xff] }
 0x1da   :  { %v2943_v35 = vsub.f32 %v2907_v29, %v5601_v61 }
 0x1db   :  { %v2375_v18 = vsel %vm2374_vm12, %v4682_v60, %v2371_v1  ;;  %2939 = vmatmul.f32.vlgmr.msrb.gmra.mxu2 %v2938_v51  ;;  %2995 = vmatmul.f32.gmra.mxu3 %v5601_v61  ;;  %v1554_v60 = vadd.f32 %v1553_v12, %v1516_v57  ;;  %v5635_v47 = vadd.f32 %v5569_v39, %v1550_v6  ;;  %v3178_v57 = vand.u32 4294901760, %v68_v21 }
 0x1dc   :  { %v2380_v30 = vsel %vm2377_vm13, %v2379_v54, %v2375_v18  ;;  %v2944_v37 = vand.u32 4294901760, %v2943_v35 }
 0x1dd   :  { %v2638_v44 = vmul.f32 %v5314_v25, %v2380_v30  ;;  %v2126_v25 = vsel %vm110_vm1, %v5618_v55, -inf  ;;  %v5639_v43 = vadd.f32 %v1585_v9, %v1554_v60 }
 0x1de   :  { %v5621_v58 = vpop.eup %4687  ;;  %v2945_v45 = vsub.f32 %v2943_v35, %v2944_v37  ;;  %v5641_v15 = vpop.f32.mrf.mxu1 }
 0x1df   :  { %v2258_v33 = vsel %vm2086_vm2, %v5621_v58, 0.0  ;;  %v2910_v2 = vsel %vm110_vm1, %v2638_v44, 0  ;;  %2899 = vmatmul.f32.gmra.mxu1 %v5528_v59  ;;  %2863 = vmatmul.f32.gmra.mxu0 %v5495_v19  ;;  %v2129_v19 = vsel %vm110_vm1, %v5635_v47, -inf  ;;  %v2132_v39 = vsel %vm2086_vm2, %v5639_v43, -inf  ;;  %v5655_v36 = vpop.f32.mrf.mxu3 }
 0x1e0   :  { %2124 = vmax.xlane.f32.xlu1 %v2123_v7  ;;  %v2946_v3 = vand.u32 4294901760, %v2945_v45  ;;  %v2950_v4 = vand.u32 4294901760, %v2910_v2  ;;  %v5653_v10 = vpop.f32.mrf.mxu0  ;;  %v3231_v45 = vsub.f32 %v68_v21, %v3178_v57 }
 0x1e1   :  { %2259 = vadd.xlane.f32.xlu2 %v2258_v33  ;;  %2127 = vmax.xlane.f32.xlu0 %v2126_v25  ;;  %v5659_v41 = vpop.f32.mrf.mxu2 }
 0x1e2   :  { %v2951_v49 = vsub.f32 %v2910_v2, %v2950_v4  ;;  %v3232_v33 = vand.u32 4294901760, %v3231_v45 }
 0x1e3   :  { %2947 = vmatmul.f32.gmra.mxu2 %v2946_v3  ;;  %2999 = vmatmul.f32.gmra.mxu3 %v2950_v4 }
 0x1e4   :  { %v2952_v63 = vand.u32 4294901760, %v2951_v49  ;;  %v3233_v3 = vsub.f32 %v3231_v45, %v3232_v33 }
 0x1e6   :  { %v2953_v0 = vsub.f32 %v2951_v49, %v2952_v63  ;;  %v5657_v42 = vpop.f32.mrf.mxu1 }
 0x1e7   :  { %3063 = vmatmul.f32.vlgmr.msra.gmra.mxu1 %v2936_v17  ;;  %2867 = vmatmul.f32.gmra.mxu0 %v5528_v59  ;;  %v5666_v59 = vpop.f32.mrf.mxu3 }
 0x1e8   :  { %2130 = vmax.xlane.f32.xlu1 %v2129_v19  ;;  %v2954_v14 = vand.u32 4294901760, %v2953_v0  ;;  %v5664_v13 = vpop.f32.mrf.mxu0 }
 0x1e9   :  { %2133 = vmax.xlane.f32.xlu2 %v2132_v39  ;;  %v5670_v28 = vpop.f32.mrf.mxu2 }
 0x1eb   :  { %2955 = vmatmul.f32.gmra.mxu2 %v2954_v14  ;;  %3137 = vmatmul.f32.vlgmr.msra.gmra.mxu3 %v5572_v20 }
 0x1ee   :  { %v5668_v56 = vpop.f32.mrf.mxu1 }
 0x1ef   :  { %3069 = vmatmul.f32.gmra.mxu1 %v2944_v37  ;;  %3027 = vmatmul.f32.vlgmr.msra.gmra.mxu0 %v5581_v48  ;;  %v5675_v48 = vpop.f32.mrf.mxu3 }
 0x1f0   :  { %v5673_v46 = vpop.f32.mrf.mxu0 }
 0x1f1   :  { %v5679_v17 = vpop.f32.mrf.mxu2 }
 0x1f3   :  { %3105 = vmatmul.f32.vlgmr.msra.gmra.mxu2 %v5572_v20  ;;  %3141 = vmatmul.f32.gmra.mxu3 %v5601_v61 }
 0x1f6   :  { %v5677_v20 = vpop.f32.mrf.mxu1 }
 0x1f7   :  { %3075 = vmatmul.f32.gmra.mxu1 %v2952_v63  ;;  %3032 = vmatmul.f32.gmra.mxu0 %v2943_v35  ;;  %v5683_v40 = vpop.f32.mrf.mxu3  ;;  %v3176_v35 = vand.u32 4294901760, %v69_v27 }
 0x1f8   :  { %v5681_v22 = vpop.f32.mrf.mxu0 }
 0x1f9   :  { %v5687_v50 = vpop.f32.mrf.mxu2  ;;  %v3225_v30 = vsub.f32 %v69_v27, %v3176_v35 }
 0x1fb   :  { %3109 = vmatmul.f32.gmra.mxu2 %v5601_v61  ;;  %3145 = vmatmul.f32.gmra.mxu3 %v2950_v4  ;;  %v3159_v61 = vsel %vm120_vm0, %v70_v8, 0  ;;  %v3226_v44 = vand.u32 4294901760, %v3225_v30  ;;  %v1678_v8 = vadd.f32 %v5610_v38, %v5632_v34 }
 0x1fc   :  { %v3174_v1 = vand.u32 4294901760, %v3159_v61 }
 0x1fd   :  { %v3227_v7 = vsub.f32 %v3225_v30, %v3226_v44 }
 0x1fe   :  { %v5685_v29 = vpop.f32.mrf.mxu1  ;;  %v3219_v51 = vsub.f32 %v3159_v61, %v3174_v1  ;;  %3301 = vmatpush.msrb.mxu3 %v3174_v1  ;;  %3175 = vmatpush.msrb.mxu0 %v3174_v1 }
 0x1ff   :  { %3037 = vmatmul.f32.gmra.mxu0 %v2951_v49  ;;  %v5698_v54 = vpop.f32.mrf.mxu3  ;;  %v3228_v2 = vand.u32 4294901760, %v3227_v7  ;;  %v3234_v49 = vand.u32 4294901760, %v3233_v3 }
 0x200   :  { %v5693_v5 = vpop.f32.mrf.mxu0  ;;  %v3220_v9 = vand.u32 4294901760, %v3219_v51  ;;  %3264 = vmatpush.msrb.mxu2 %v3219_v51  ;;  %3303 = vmatpush.msrb.mxu3 %v3176_v35 }
 0x201   :  { %3177 = vmatpush.msrb.mxu0 %v3176_v35  ;;  %v5705_v37 = vpop.f32.mrf.mxu2 }
 0x202   :  { %v3221_v12 = vsub.f32 %v3219_v51, %v3220_v9  ;;  %3267 = vmatpush.msrb.mxu2 %v3225_v30  ;;  %3305 = vmatpush.msrb.mxu3 %v3178_v57 }
 0x203   :  { %3113 = vmatmul.f32.gmra.mxu2 %v2950_v4  ;;  %3179 = vmatpush.msrb.mxu0 %v3178_v57 }
 0x204   :  { %v3222_v6 = vand.u32 4294901760, %v3221_v12  ;;  %3270 = vmatpush.msrb.mxu2 %v3231_v45 }
 0x205   :  { %3341 = vmatpush.msra.mxu0 %v3220_v9 }
 0x206   :  { %v5700_v18 = vpop.f32.mrf.mxu1  ;;  %3223 = vmatpush.msrb.mxu1 %v3222_v6 }
 0x207   :  { %3345 = vmatpush.msra.mxu0 %v3226_v44  ;;  %v5709_v4 = vpop.f32.mrf.mxu3 }
 0x208   :  { %v5707_v60 = vpop.f32.mrf.mxu0  ;;  %3229 = vmatpush.msrb.mxu1 %v3228_v2 }
 0x209   :  { %3349 = vmatpush.msra.mxu0 %v3232_v33  ;;  %v5713_v63 = vpop.f32.mrf.mxu2 }
 0x20a   :  { %3235 = vmatpush.msrb.mxu1 %v3234_v49 }
 0x20c   :  { %3377 = vmatpush.msra.mxu1 %v3174_v1 }
 0x20e   :  { %v5711_v25 = vpop.f32.mrf.mxu1  ;;  %3379 = vmatpush.msra.mxu1 %v3176_v35  ;;  %v1714_v35 = vadd.f32 %v5645_v52, %v1678_v8 }
 0x20f   :  { %v5717_v39 = vpop.f32.mrf.mxu3 }
 0x210   :  { %3381 = vmatpush.msra.mxu1 %v3178_v57  ;;  %v5715_v19 = vpop.f32.mrf.mxu0  ;;  %6600 = vst [vmem:[#allocation2_spill] sm:$0xff] %v5717_v39  ;;  %v1750_v34 = vadd.f32 %v5637_v16, %v1714_v35 }
 0x211   :  { %v5723_v61 = vpop.f32.mrf.mxu2 }
 0x212   :  { %v1792_v49 = vadd.f32 %v5673_v46, %v1750_v34  ;;  %v1682_v34 = vadd.f32 %v5641_v15, %v5653_v10  ;;  %v71_v15 = vld [vmem:[%s6596_s2 + $0x48] sm:$0xff] }
 0x216   :  { %v5719_v14 = vpop.f32.mrf.mxu1 }
 0x217   :  { %6601 = vst [vmem:[#allocation3_spill] sm:$0xff] %v5719_v14  ;;  %v5729_v6 = vpop.f32.mrf.mxu3 }
 0x218   :  { %v5727_v12 = vpop.f32.mrf.mxu0  ;;  %6602 = vst [vmem:[#allocation4_spill] sm:$0xff] %v5729_v6 }
 0x219   :  { %v5734_v33 = vpop.f32.mrf.mxu2 }
 0x21a   :  { %6603 = vst [vmem:[#allocation5_spill] sm:$0xff] %v5734_v33 }
 0x227   :  { %v2245_v0 = vpop.xlane.xlu0 %2244 }
 0x228   :  { %4689 = vrcp.f32 %v2245_v0  ;;  %v2392_v30 = vand.u32 2147483648, %v2245_v0  ;;  %v2390_v45 = vand.u32 2147483647, %v2245_v0  ;;  %vm2386_vm15 = vweird.f32 %v2245_v0 }
 0x22a   :  { %vm2391_vm4 = vcmp.eq.f32.partialorder %v2390_v45, 8.507059e+37  ;;  %v72_v45 = vld [vmem:[%s6596_s2 + $0x50] sm:$0xff] }
 0x22e   :  { %v4690_v27 = vpop.eup %4689 }
 0x22f   :  { %v2382_v51 = vmul.f32 %v4690_v27, %v2245_v0  ;;  %v2119_v21 = vpop.xlane.xlu0 %2118  ;;  %vm2387_vm14 = vweird.f32 %v4690_v27 }
 0x230   :  { %v2165_v1 = vsub.f32 %v5467_v11, %v2119_v21  ;;  %vm2388_vm3 = vmor %vm2386_vm15, %vm2387_vm14  ;;  %v2393_v11 = vor.u32 1.1754944e-38, %v2392_v30 }
 0x231   :  { %v2383_v9 = vsub.f32 1.0, %v2382_v51 }
 0x232   :  { %v2201_v57 = vmul.f32 1.442695, %v2165_v1 }
 0x233   :  { %v2384_v44 = vmul.f32 %v4690_v27, %v2383_v9  ;;  %v5731_v38 = vpop.f32.mrf.mxu1 }
 0x234   :  { %4691 = vpow2.f32 %v2201_v57 }
 0x235   :  { %v2385_v7 = vadd.f32 %v4690_v27, %v2384_v44 }
 0x237   :  { %v2389_v52 = vsel %vm2388_vm3, %v4690_v27, %v2385_v7  ;;  %v5736_v2 = vpop.xlane.xlu1 %2247  ;;  %v73_v27 = vld [vmem:[%s6596_s2 + $0x58] sm:$0xf] }
 0x238   :  { %v2394_v3 = vsel %vm2391_vm4, %v2393_v11, %v2389_v52  ;;  %4693 = vrcp.f32 %v5736_v2  ;;  %v3405_v46 = vsel %vm120_vm0, %v73_v27, 0  ;;  %v1686_v11 = vadd.f32 %v5657_v42, %v5664_v13 }
 0x239   :  { %v2639_v8 = vmul.f32 %v5445_v26, %v2394_v3  ;;  %v5757_v26 = vadd.f32 %v5668_v56, %v1792_v49  ;;  %v5759_v9 = vand.u32 4294901760, %v3405_v46  ;;  %v1924_v52 = vadd.f32 %v5675_v48, %v5679_v17 }
 0x23a   :  { %v5741_v51 = vpop.eup %4691  ;;  %v5778_v49 = vand.u32 4294901760, %v72_v45  ;;  %v5787_v27 = vand.u32 4294901760, %v71_v15  ;;  %v2404_v42 = vand.u32 2147483647, %v5736_v2  ;;  %v2406_v13 = vand.u32 2147483648, %v5736_v2 }
 0x23b   :  { %6604 = vst [vmem:[#allocation6_spill] sm:$0xff] %v5741_v51  ;;  %v2261_v16 = vsel %vm110_vm1, %v5741_v51, 0.0  ;;  %v3150_v0 = vsel %vm110_vm1, %v2639_v8, 0  ;;  %v5749_v21 = vpop.f32.mrf.mxu0  ;;  %v3465_v56 = vsub.f32 %v3405_v46, %v5759_v9  ;;  %3421 = vmatpush.msra.mxu2 %v5759_v9  ;;  %v5783_v8 = vpop.f32.mrf.mxu2  ;;  %v1724_v6 = vadd.f32 %v5670_v28, %v1686_v11 }
 0x23c   :  { %2262 = vadd.xlane.f32.xlu0 %v2261_v16  ;;  %v5751_v1 = vand.u32 4294901760, %v3150_v0  ;;  %6605 = vst [vmem:[#allocation7_spill] sm:$0xff] %v5757_v26  ;;  %v5761_v57 = vpop.f32.mrf.mxu1  ;;  %v2135_v16 = vsel %vm110_vm1, %v5757_v26, -inf  ;;  %v3471_v17 = vsub.f32 %v72_v45, %v5778_v49  ;;  %v3477_v51 = vsub.f32 %v71_v15, %v5787_v27 }
 0x23d   :  { %v5754_v35 = vpop.f32.mrf.mxu3  ;;  %3423 = vmatpush.msra.mxu2 %v5778_v49  ;;  %v1719_v26 = vadd.f32 %v5659_v41, %v1682_v34  ;;  %vm2400_vm6 = vweird.f32 %v5736_v2  ;;  %v1960_v41 = vadd.f32 %v5707_v60, %v1924_v52  ;;  %v2407_v28 = vor.u32 1.1754944e-38, %v2406_v13 }
 0x23e   :  { %v4694_v30 = vpop.eup %4693  ;;  %3237 = vmatmul.f32.vlgmr.msrb.gmra.mxu1 %v5751_v1  ;;  %v3181_v44 = vsub.f32 %v3150_v0, %v5751_v1  ;;  %v3466_v0 = vand.u32 4294901760, %v3465_v56  ;;  %v3472_v39 = vand.u32 4294901760, %v3471_v17  ;;  %v3478_v14 = vand.u32 4294901760, %v3477_v51 }
 0x23f   :  { %v2396_v7 = vmul.f32 %v4694_v30, %v5736_v2  ;;  %3547 = vmatpush.msrb.mxu1 %v5759_v9  ;;  %vm2401_vm5 = vweird.f32 %v4694_v30  ;;  %3425 = vmatpush.msra.mxu2 %v5787_v27  ;;  %vm2405_vm8 = vcmp.eq.f32.partialorder %v2404_v42, 8.507059e+37  ;;  %v1762_v60 = vadd.f32 %v5666_v59, %v1724_v6 }
 0x240   :  { %3273 = vmatmul.f32.vlgmr.msrb.gmra.mxu2 %v3181_v44  ;;  %v3182_v3 = vand.u32 4294901760, %v3181_v44  ;;  %vm2402_vm7 = vmor %vm2400_vm6, %vm2401_vm5  ;;  %v3473_v2 = vsub.f32 %v3471_v17, %v3472_v39  ;;  %v3479_v15 = vsub.f32 %v3477_v51, %v3478_v14 }
 0x241   :  { %v2397_v10 = vsub.f32 1.0, %v2396_v7  ;;  %v3467_v7 = vsub.f32 %v3465_v56, %v3466_v0  ;;  %3549 = vmatpush.msrb.mxu1 %v5778_v49  ;;  %3587 = vmatpush.msrb.mxu2 %v3466_v0 }
 0x242   :  { %3309 = vmatmul.f32.vlgmr.msrb.gmra.mxu3 %v3182_v3  ;;  %v3183_v48 = vsub.f32 %v3181_v44, %v3182_v3  ;;  %v3474_v0 = vand.u32 4294901760, %v3473_v2  ;;  %v3480_v13 = vand.u32 4294901760, %v3479_v15 }
 0x243   :  { %v2398_v46 = vmul.f32 %v4694_v30, %v2397_v10  ;;  %v2702_v45 = vpop.f32.mrf.mxu0  ;;  %v3468_v10 = vand.u32 4294901760, %v3467_v7  ;;  %3551 = vmatpush.msrb.mxu1 %v5787_v27  ;;  %3591 = vmatpush.msrb.mxu2 %v3472_v39  ;;  %v2787_v42 = vpop.f32.mrf.mxu2 }
 0x244   :  { %2136 = vmax.xlane.f32.xlu0 %v2135_v16  ;;  %v3184_v33 = vand.u32 4294901760, %v3183_v48  ;;  %v5799_v3 = vpop.xlane.xlu2 %2250  ;;  %v1756_v16 = vadd.f32 %v5655_v36, %v1719_v26  ;;  %v2751_v59 = vadd.f32 %v5761_v57, %v2702_v45 }
 0x245   :  { %v2399_v44 = vadd.f32 %v4694_v30, %v2398_v46  ;;  %4695 = vrcp.f32 %v5799_v3  ;;  %v5805_v34 = vpop.f32.mrf.mxu3  ;;  %3469 = vmatpush.msra.mxu3 %v3468_v10  ;;  %v5808_v46 = vpop.f32.mrf.mxu1  ;;  %3595 = vmatpush.msrb.mxu2 %v3478_v14  ;;  %v5828_v14 = vadd.f32 %v5693_v5, %v1762_v60  ;;  %vm2414_vm10 = vweird.f32 %v5799_v3 }
 0x246   :  { %3185 = vmatmul.f32.vlgmr.msrb.gmra.mxu0 %v3184_v33  ;;  %v1996_v33 = vadd.f32 %v5700_v18, %v1960_v41  ;;  %v5825_v18 = vadd.f32 %v5681_v22, %v1756_v16  ;;  %v2418_v22 = vand.u32 2147483647, %v5799_v3 }
 0x247   :  { %v2403_v11 = vsel %vm2402_vm7, %v4694_v30, %v2399_v44  ;;  %3510 = vmatpush.msrb.mxu0 %v3465_v56  ;;  %v2747_v30 = vadd.f32 %v5731_v38, %v5749_v21  ;;  %3475 = vmatpush.msra.mxu3 %v3474_v0  ;;  %v2420_v56 = vand.u32 2147483648, %v5799_v3 }
 0x248   :  { %v2408_v48 = vsel %vm2405_vm8, %v2407_v28, %v2403_v11  ;;  %vm5863_vm11 = vcmp.eq.f32.partialorder %v2418_v22, 8.507059e+37 }
 0x249   :  { %v2640_v52 = vmul.f32 %v5513_v24, %v2408_v48  ;;  %3513 = vmatpush.msrb.mxu0 %v3471_v17  ;;  %v1928_v24 = vadd.f32 %v5683_v40, %v5687_v50  ;;  %3481 = vmatpush.msra.mxu3 %v3480_v13  ;;  %v5836_v40 = vadd.f32 %v5698_v54, %v5705_v37  ;;  %v2421_v2 = vor.u32 1.1754944e-38, %v2420_v56 }
 0x24a   :  { %v5839_v50 = vadd.f32 %v5713_v63, %v1996_v33  ;;  %v2788_v63 = vadd.f32 %v2787_v42, %v2751_v59 }
 0x24b   :  { %v5815_v36 = vpop.xlane.xlu1 %2253  ;;  %v3153_v26 = vsel %vm110_vm1, %v2640_v52, 0  ;;  %v5818_v39 = vpop.eup %4695  ;;  %3516 = vmatpush.msrb.mxu0 %v3477_v51  ;;  %v2783_v51 = vadd.f32 %v5783_v8, %v2747_v30  ;;  %3623 = vmatpush.msrb.mxu3 %v5759_v9  ;;  %v5853_v37 = vadd.f32 %v5715_v19, %v1928_v24 }
 0x24c   :  { %4697 = vrcp.f32 %v5815_v36  ;;  %v2410_v6 = vmul.f32 %v5818_v39, %v5799_v3  ;;  %v5832_v38 = vand.u32 4294901760, %v3153_v26  ;;  %v2122_v21 = vpop.xlane.xlu2 %2121  ;;  %v5843_v5 = vpop.xlane.xlu0 %2256  ;;  %v2432_v8 = vand.u32 2147483647, %v5815_v36 }
 0x24d   :  { %v2710_v17 = vpop.f32.mrf.mxu0  ;;  %v2166_v7 = vsub.f32 %v5547_v62, %v2122_v21  ;;  %4699 = vrcp.f32 %v5843_v5  ;;  %v5849_v54 = vpop.f32.mrf.mxu3  ;;  %3625 = vmatpush.msrb.mxu3 %v5778_v49  ;;  %vm2415_vm9 = vweird.f32 %v5818_v39  ;;  %v2434_v45 = vand.u32 2147483648, %v5815_v36 }
 0x24e   :  { %v2411_v57 = vsub.f32 1.0, %v2410_v6  ;;  %3241 = vmatmul.f32.gmra.mxu1 %v5832_v38  ;;  %v3189_v9 = vsub.f32 %v3153_v26, %v5832_v38  ;;  %v2819_v41 = vadd.f32 %v5754_v35, %v2783_v51  ;;  %v2892_v28 = vpop.f32.mrf.mxu1  ;;  %vm5872_vm12 = vmor %vm2414_vm10, %vm2415_vm9  ;;  %v5877_v3 = vadd.f32 %v5805_v34, %v2788_v63  ;;  %v2792_v0 = vpop.f32.mrf.mxu2 }
 0x24f   :  { %v2203_v62 = vmul.f32 1.442695, %v2166_v7  ;;  %3627 = vmatpush.msrb.mxu3 %v5787_v27  ;;  %vm2428_vm13 = vweird.f32 %v5815_v36  ;;  %vm5880_vm14 = vcmp.eq.f32.partialorder %v2432_v8, 8.507059e+37  ;;  %v2435_v33 = vor.u32 1.1754944e-38, %v2434_v45 }
 0x250   :  { %v2412_v44 = vmul.f32 %v5818_v39, %v2411_v57  ;;  %3278 = vmatmul.f32.gmra.mxu2 %v3189_v9  ;;  %v3190_v11 = vand.u32 4294901760, %v3189_v9  ;;  %v2755_v34 = vadd.f32 %v5808_v46, %v2710_v17  ;;  %vm2442_vm15 = vweird.f32 %v5843_v5 }
 0x251   :  { %4701 = vpow2.f32 %v2203_v62  ;;  %v2448_v17 = vand.u32 2147483648, %v5843_v5 }
 0x252   :  { %v4698_v10 = vpop.eup %4697  ;;  %v2413_v49 = vadd.f32 %v5818_v39, %v2412_v44  ;;  %3315 = vmatmul.f32.gmra.mxu3 %v3190_v11  ;;  %v3191_v30 = vsub.f32 %v3189_v9, %v3190_v11  ;;  %v5906_v62 = vadd.f32 %v2792_v0, %v2755_v34 }
 0x253   :  { %v2424_v15 = vmul.f32 %v4698_v10, %v5815_v36  ;;  %v2125_v16 = vpop.xlane.xlu1 %2124  ;;  %v4700_v60 = vpop.eup %4699  ;;  %vm2429_vm3 = vweird.f32 %v4698_v10 }
 0x254   :  { %v2167_v48 = vsub.f32 %v5613_v31, %v2125_v16  ;;  %v2417_v52 = vsel %vm5872_vm12, %v5818_v39, %v2413_v49  ;;  %v2438_v42 = vmul.f32 %v4700_v60, %v5843_v5  ;;  %v5891_v26 = vpop.xlane.xlu2 %2259  ;;  %v2128_v24 = vpop.xlane.xlu0 %2127  ;;  %v2446_v31 = vand.u32 2147483647, %v5843_v5  ;;  %vm2430_vm5 = vmor %vm2428_vm13, %vm2429_vm3 }
 0x255   :  { %v2425_v13 = vsub.f32 1.0, %v2424_v15  ;;  %v2860_v51 = vpop.f32.mrf.mxu0  ;;  %4703 = vrcp.f32 %v5891_v26  ;;  %v2422_v46 = vsel %vm5863_vm11, %v2421_v2, %v2417_v52  ;;  %v2168_v57 = vsub.f32 %v5618_v55, %v2128_v24 }
 0x256   :  { %v2205_v59 = vmul.f32 1.442695, %v2167_v48  ;;  %v5895_v39 = vpop.f32.mrf.mxu3  ;;  %v2439_v22 = vsub.f32 1.0, %v2438_v42  ;;  %v2861_v21 = vadd.f32 %v2860_v51, %v2819_v41  ;;  %v3192_v63 = vand.u32 4294901760, %v3191_v30  ;;  %v2896_v36 = vpop.f32.mrf.mxu1 }
 0x257   :  { %v2426_v6 = vmul.f32 %v4698_v10, %v2425_v13  ;;  %v5900_v56 = vpop.eup %4701  ;;  %vm2443_vm4 = vweird.f32 %v4700_v60  ;;  %v2207_v44 = vmul.f32 1.442695, %v2168_v57  ;;  %v2641_v41 = vmul.f32 %v5558_v23, %v2422_v46 }
 0x258   :  { %4705 = vpow2.f32 %v2205_v59  ;;  %v2440_v8 = vmul.f32 %v4700_v60, %v2439_v22  ;;  %v2893_v9 = vadd.f32 %v2892_v28, %v2861_v21  ;;  %3193 = vmatmul.f32.gmra.mxu0 %v3192_v63  ;;  %v2264_v55 = vsel %vm110_vm1, %v5900_v56, 0.0  ;;  %vm2444_vm6 = vmor %vm2442_vm15, %vm2443_vm4 }
 0x259   :  { %v2427_v7 = vadd.f32 %v4698_v10, %v2426_v6  ;;  %4707 = vpow2.f32 %v2207_v44  ;;  %2265 = vadd.xlane.f32.xlu1 %v2264_v55  ;;  %vm2447_vm7 = vcmp.eq.f32.partialorder %v2446_v31, 8.507059e+37  ;;  %v2449_v23 = vor.u32 1.1754944e-38, %v2448_v17 }
 0x25a   :  { %v2441_v11 = vadd.f32 %v4700_v60, %v2440_v8  ;;  %4625 = vst.msk [vmem:[%s6597_s3] sm:$0xff] %vm110_vm1, %v2893_v9  ;;  %v3156_v15 = vsel %vm110_vm1, %v2641_v41, 0  ;;  %v2460_v27 = vand.u32 2147483647, %v5891_v26  ;;  %v2462_v5 = vand.u32 2147483648, %v5891_v26 }
 0x25b   :  { %v2431_v45 = vsel %vm2430_vm5, %v4698_v10, %v2427_v7  ;;  %v2131_v19 = vpop.xlane.xlu1 %2130  ;;  %v4704_v28 = vpop.eup %4703  ;;  %v5925_v48 = vand.u32 4294901760, %v3156_v15  ;;  %vm2456_vm9 = vweird.f32 %v5891_v26  ;;  %v2831_v44 = vadd.f32 %v5849_v54, %v5906_v62 }
 0x25c   :  { %v2436_v49 = vsel %vm5880_vm14, %v2435_v33, %v2431_v45  ;;  %v2169_v10 = vsub.f32 %v5635_v47, %v2131_v19  ;;  %v2445_v16 = vsel %vm2444_vm6, %v4700_v60, %v2441_v11  ;;  %v2452_v35 = vmul.f32 %v4704_v28, %v5891_v26  ;;  %v2134_v52 = vpop.xlane.xlu2 %2133 }
 0x25d   :  { %v2642_v2 = vmul.f32 %v5587_v32, %v2436_v49  ;;  %v2450_v0 = vsel %vm2447_vm7, %v2449_v23, %v2445_v16  ;;  %v2864_v13 = vpop.f32.mrf.mxu0  ;;  %3245 = vmatmul.f32.gmra.mxu1 %v5925_v48  ;;  %v2170_v42 = vsub.f32 %v5639_v43, %v2134_v52  ;;  %v3197_v24 = vsub.f32 %v3156_v15, %v5925_v48 }
 0x25e   :  { %v5927_v47 = vpop.eup %4705  ;;  %v2209_v33 = vmul.f32 1.442695, %v2169_v10  ;;  %v5930_v30 = vpop.f32.mrf.mxu2  ;;  %v2453_v34 = vsub.f32 1.0, %v2452_v35  ;;  %v2865_v60 = vadd.f32 %v2864_v13, %v5877_v3  ;;  %vm2457_vm8 = vweird.f32 %v4704_v28 }
 0x25f   :  { %v3396_v32 = vsel %vm110_vm1, %v2642_v2, 0  ;;  %v5937_v59 = vpop.f32.mrf.mxu3  ;;  %v2267_v31 = vsel %vm2086_vm2, %v5927_v47, 0.0  ;;  %v5943_v51 = vpop.eup %4707  ;;  %3283 = vmatmul.f32.gmra.mxu2 %v3197_v24  ;;  %v3198_v21 = vand.u32 4294901760, %v3197_v24  ;;  %v2643_v43 = vmul.f32 %v5595_v53, %v2450_v0  ;;  %vm2458_vm10 = vmor %vm2456_vm9, %vm2457_vm8 }
 0x260   :  { %4709 = vpow2.f32 %v2209_v33  ;;  %v5941_v6 = vand.u32 4294901760, %v3396_v32  ;;  %v2454_v46 = vmul.f32 %v4704_v28, %v2453_v34  ;;  %v2897_v22 = vadd.f32 %v2896_v36, %v2865_v60  ;;  %2268 = vadd.xlane.f32.xlu2 %v2267_v31  ;;  %v2900_v55 = vpop.f32.mrf.mxu1 }
 0x261   :  { %v2002_v3 = vadd.f32 %v5711_v25, %v5853_v37  ;;  %v2270_v57 = vsel %vm110_vm1, %v5943_v51, 0.0  ;;  %v2211_v63 = vmul.f32 1.442695, %v2170_v42  ;;  %3321 = vmatmul.f32.gmra.mxu3 %v3198_v21  ;;  %v3199_v53 = vsub.f32 %v3197_v24, %v3198_v21  ;;  %v6614_v42 = vld [vmem:[#allocation5_spill] sm:$0xff] }
 0x262   :  { %v5952_v17 = vsub.f32 %v3396_v32, %v5941_v6  ;;  %v2455_v7 = vadd.f32 %v4704_v28, %v2454_v46  ;;  %4626 = vst.msk [vmem:[%s6597_s3 + $0x8] sm:$0xff] %vm110_vm1, %v2897_v22  ;;  %2271 = vadd.xlane.f32.xlu1 %v2270_v57  ;;  %v3399_v25 = vsel %vm110_vm1, %v2643_v43, 0  ;;  %v2463_v37 = vor.u32 1.1754944e-38, %v2462_v5 }
 0x263   :  { %v5962_v26 = vadd.f32 %v5677_v20, %v5825_v18  ;;  %v5965_v9 = vand.u32 4294901760, %v3399_v25  ;;  %vm2461_vm11 = vcmp.eq.f32.partialorder %v2460_v27, 8.507059e+37  ;;  %v3200_v41 = vand.u32 4294901760, %v3199_v53 }
 0x264   :  { %v3428_v8 = vand.u32 4294901760, %v5952_v17  ;;  %v2459_v45 = vsel %vm2458_vm10, %v4704_v28, %v2455_v7  ;;  %v5973_v20 = vadd.f32 %v5685_v29, %v5828_v14  ;;  %4711 = vpow2.f32 %v2211_v63 }
 0x265   :  { %v2464_v11 = vsel %vm2461_vm11, %v2463_v37, %v2459_v45  ;;  %v2868_v49 = vpop.f32.mrf.mxu0  ;;  %v5979_v10 = vsub.f32 %v3399_v25, %v5965_v9  ;;  %3201 = vmatmul.f32.gmra.mxu0 %v3200_v41  ;;  %3383 = vmatmul.f32.vlgmr.msra.gmra.mxu1 %v5751_v1  ;;  %v1970_v29 = vadd.f32 %v5727_v12, %v5836_v40  ;;  %v2138_v14 = vsel %vm110_vm1, %v5962_v26, -inf  ;;  %v6612_v40 = vld [vmem:[#allocation3_spill] sm:$0xff] }
 0x266   :  { %v5969_v19 = vpop.eup %4709  ;;  %v2948_v36 = vpop.f32.mrf.mxu2  ;;  %v3429_v18 = vsub.f32 %v5952_v17, %v3428_v8  ;;  %v2869_v54 = vadd.f32 %v2868_v49, %v2831_v44  ;;  %v2644_v28 = vmul.f32 %v5621_v58, %v2464_v11  ;;  %v2042_v27 = vadd.f32 %v5723_v61, %v2002_v3 }
 0x267   :  { %v2273_v62 = vsel %vm110_vm1, %v5969_v19, 0.0  ;;  %v3436_v2 = vand.u32 4294901760, %v5979_v10  ;;  %v3000_v16 = vpop.f32.mrf.mxu3  ;;  %v2141_v58 = vsel %vm2086_vm2, %v5973_v20, -inf  ;;  %v5998_v12 = vadd.f32 %v5709_v4, %v5839_v50  ;;  %v6613_v4 = vld [vmem:[#allocation2_spill] sm:$0xff] }
 0x268   :  { %2274 = vadd.xlane.f32.xlu0 %v2273_v62  ;;  %v3430_v23 = vand.u32 4294901760, %v3429_v18  ;;  %v2901_v15 = vadd.f32 %v2900_v55, %v2869_v54  ;;  %2139 = vmax.xlane.f32.xlu2 %v2138_v14  ;;  %v3402_v35 = vsel %vm110_vm1, %v2644_v28, 0  ;;  %v2008_v61 = vadd.f32 %v6612_v40, %v1970_v29  ;;  %v3064_v31 = vpop.f32.mrf.mxu1 }
 0x269   :  { %v5994_v52 = vand.u32 4294901760, %v3402_v35  ;;  %3483 = vmatmul.f32.vlgmr.msra.gmra.mxu3 %v5941_v6  ;;  %v3437_v0 = vsub.f32 %v5979_v10, %v3436_v2  ;;  %v6015_v50 = vadd.f32 %v6613_v4, %v2042_v27  ;;  %v2993_v34 = vadd.f32 %v5895_v39, %v5930_v30  ;;  %v6615_v30 = vld [vmem:[#allocation4_spill] sm:$0xff] }
 0x26a   :  { %3431 = vmatmul.f32.vlgmr.msra.gmra.mxu2 %v3430_v23  ;;  %4627 = vst.msk [vmem:[%s6597_s3 + $0x10] sm:$0xf] %vm2086_vm2, %v2901_v15  ;;  %2142 = vmax.xlane.f32.xlu1 %v2141_v58  ;;  %v6012_v13 = vpop.eup %4711  ;;  %v2144_v60 = vsel %vm110_vm1, %v5998_v12, -inf  ;;  %v2046_v24 = vadd.f32 %v6614_v42, %v2008_v61  ;;  %v2997_v25 = vadd.f32 %v5937_v59, %v2948_v36 }
 0x26b   :  { %v6010_v5 = vsub.f32 %v3402_v35, %v5994_v52  ;;  %v2276_v46 = vsel %vm2086_vm2, %v6012_v13, 0.0  ;;  %v3438_v22 = vand.u32 4294901760, %v3437_v0  ;;  %v74_v35 = vld [vmem:[%s6596_s2 + $0x60] sm:$0xff] }
 0x26c   :  { %v6031_v3 = vadd.f32 %v6615_v30, %v2046_v24 }
 0x26d   :  { %v3028_v33 = vpop.f32.mrf.mxu0  ;;  %3351 = vmatmul.f32.vlgmr.msra.gmra.mxu0 %v5751_v1  ;;  %3387 = vmatmul.f32.gmra.mxu1 %v5832_v38  ;;  %v3444_v21 = vand.u32 4294901760, %v6010_v5  ;;  %v2147_v1 = vsel %vm110_vm1, %v6015_v50, -inf }
 0x26e   :  { %v2956_v32 = vpop.f32.mrf.mxu2  ;;  %v3029_v43 = vadd.f32 %v3028_v33, %v2993_v34  ;;  %v2150_v44 = vsel %vm2086_vm2, %v6031_v3, -inf }
 0x26f   :  { %v3138_v39 = vpop.f32.mrf.mxu3  ;;  %v3445_v57 = vsub.f32 %v6010_v5, %v3444_v21  ;;  %v3001_v18 = vadd.f32 %v3000_v16, %v2956_v32 }
 0x270   :  { %2145 = vmax.xlane.f32.xlu0 %v2144_v60  ;;  %2277 = vadd.xlane.f32.xlu2 %v2276_v46  ;;  %v3065_v7 = vadd.f32 %v3064_v31, %v3029_v43  ;;  %v3070_v11 = vpop.f32.mrf.mxu1 }
 0x271   :  { %3487 = vmatmul.f32.gmra.mxu3 %v5965_v9  ;;  %v3446_v45 = vand.u32 4294901760, %v3445_v57 }
 0x272   :  { %3439 = vmatmul.f32.gmra.mxu2 %v3438_v22  ;;  %2148 = vmax.xlane.f32.xlu1 %v2147_v1  ;;  %v6616_v22 = vld [vmem:[#allocation7_spill] sm:$0xff] }
 0x275   :  { %v3033_v63 = vpop.f32.mrf.mxu0  ;;  %3355 = vmatmul.f32.gmra.mxu0 %v5832_v38  ;;  %3391 = vmatmul.f32.gmra.mxu1 %v5925_v48 }
 0x276   :  { %v3106_v53 = vpop.f32.mrf.mxu2  ;;  %v3034_v55 = vadd.f32 %v3033_v63, %v2997_v25 }
 0x277   :  { %v3107_v37 = vadd.f32 %v3106_v53, %v3065_v7  ;;  %v3142_v38 = vpop.f32.mrf.mxu3 }
 0x278   :  { %2151 = vmax.xlane.f32.xlu2 %v2150_v44  ;;  %v3071_v59 = vadd.f32 %v3070_v11, %v3034_v55  ;;  %v3076_v29 = vpop.f32.mrf.mxu1 }
 0x279   :  { %v3139_v41 = vadd.f32 %v3138_v39, %v3107_v37  ;;  %3491 = vmatmul.f32.gmra.mxu3 %v5994_v52  ;;  %v6617_v37 = vld [vmem:[#allocation6_spill] sm:$0xff] }
 0x27a   :  { %3447 = vmatmul.f32.gmra.mxu2 %v3446_v45 }
 0x27b   :  { %4628 = vst.msk [vmem:[%s6597_s3 + $0x18] sm:$0xff] %vm110_vm1, %v3139_v41 }
 0x27d   :  { %v3038_v49 = vpop.f32.mrf.mxu0  ;;  %3359 = vmatmul.f32.gmra.mxu0 %v5925_v48  ;;  %3555 = vmatmul.f32.vlgmr.msrb.gmra.mxu1 %v3428_v8 }
 0x27e   :  { %v3110_v36 = vpop.f32.mrf.mxu2  ;;  %v3039_v62 = vadd.f32 %v3038_v49, %v3001_v18 }
 0x27f   :  { %v3111_v54 = vadd.f32 %v3110_v36, %v3071_v59  ;;  %v3146_v8 = vpop.f32.mrf.mxu3 }
 0x280   :  { %v3077_v14 = vadd.f32 %v3076_v29, %v3039_v62 }
 0x281   :  { %v3143_v28 = vadd.f32 %v3142_v38, %v3111_v54  ;;  %3629 = vmatmul.f32.vlgmr.msrb.gmra.mxu3 %v5941_v6  ;;  %v79_v54 = vld [vmem:[%s6596_s2 + $0x88] sm:$0xf] }
 0x282   :  { %3597 = vmatmul.f32.vlgmr.msrb.gmra.mxu2 %v5941_v6  ;;  %v76_v6 = vld [vmem:[%s6596_s2 + $0x70] sm:$0xf] }
 0x283   :  { %4629 = vst.msk [vmem:[%s6597_s3 + $0x20] sm:$0xff] %vm110_vm1, %v3143_v28  ;;  %v3897_v28 = vsel %vm120_vm0, %v79_v54, 0 }
 0x285   :  { %3519 = vmatmul.f32.vlgmr.msrb.gmra.mxu0 %v5952_v17  ;;  %3561 = vmatmul.f32.gmra.mxu1 %v3436_v2  ;;  %v3651_v17 = vsel %vm120_vm0, %v76_v6, 0  ;;  %v77_v6 = vld [vmem:[%s6596_s2 + $0x78] sm:$0xff] }
 0x286   :  { %v3114_v23 = vpop.f32.mrf.mxu2  ;;  %v3666_v2 = vand.u32 4294901760, %v3651_v17 }
 0x287   :  { %v3115_v48 = vadd.f32 %v3114_v23, %v3077_v14  ;;  %v6091_v14 = vand.u32 4294901760, %v3897_v28  ;;  %v78_v23 = vld [vmem:[%s6596_s2 + $0x80] sm:$0xff] }
 0x288   :  { %v3711_v16 = vsub.f32 %v3651_v17, %v3666_v2  ;;  %3793 = vmatpush.msra.mxu3 %v3666_v2  ;;  %3667 = vmatpush.msra.mxu0 %v3666_v2 }
 0x289   :  { %v3147_v15 = vadd.f32 %v3146_v8, %v3115_v48  ;;  %3633 = vmatmul.f32.gmra.mxu3 %v5965_v9  ;;  %v6096_v48 = vand.u32 4294901760, %v78_v23 }
 0x28a   :  { %3601 = vmatmul.f32.gmra.mxu2 %v5965_v9  ;;  %v75_v9 = vld [vmem:[%s6596_s2 + $0x68] sm:$0xff]  ;;  %v3712_v27 = vand.u32 4294901760, %v3711_v16 }
 0x28b   :  { %4630 = vst.msk [vmem:[%s6597_s3 + $0x28] sm:$0xf] %vm2086_vm2, %v3147_v15  ;;  %3756 = vmatpush.msra.mxu2 %v3711_v16  ;;  %v3957_v15 = vsub.f32 %v3897_v28, %v6091_v14 }
 0x28c   :  { %v3713_v40 = vsub.f32 %v3711_v16, %v3712_v27 }
 0x28d   :  { %3524 = vmatmul.f32.gmra.mxu0 %v5979_v10  ;;  %3567 = vmatmul.f32.gmra.mxu1 %v3444_v21  ;;  %v3668_v10 = vand.u32 4294901760, %v75_v9 }
 0x28f   :  { %v3717_v58 = vsub.f32 %v75_v9, %v3668_v10  ;;  %3795 = vmatpush.msra.mxu3 %v3668_v10  ;;  %3669 = vmatpush.msra.mxu0 %v3668_v10 }
 0x291   :  { %3637 = vmatmul.f32.gmra.mxu3 %v5994_v52  ;;  %v3718_v61 = vand.u32 4294901760, %v3717_v58  ;;  %3759 = vmatpush.msra.mxu2 %v3717_v58 }
 0x292   :  { %3605 = vmatmul.f32.gmra.mxu2 %v5994_v52  ;;  %v3670_v52 = vand.u32 4294901760, %v74_v35 }
 0x293   :  { %v3719_v4 = vsub.f32 %v3717_v58, %v3718_v61 }
 0x294   :  { %v3723_v0 = vsub.f32 %v74_v35, %v3670_v52  ;;  %3797 = vmatpush.msra.mxu3 %v3670_v52  ;;  %3671 = vmatpush.msra.mxu0 %v3670_v52  ;;  %v6110_v35 = vand.u32 4294901760, %v77_v6 }
 0x295   :  { %3529 = vmatmul.f32.gmra.mxu0 %v6010_v5  ;;  %v3714_v5 = vand.u32 4294901760, %v3713_v40  ;;  %v3720_v32 = vand.u32 4294901760, %v3719_v4 }
 0x296   :  { %v3724_v33 = vand.u32 4294901760, %v3723_v0  ;;  %3762 = vmatpush.msra.mxu2 %v3723_v0  ;;  %3833 = vmatpush.msrb.mxu0 %v3712_v27 }
 0x297   :  { %3715 = vmatpush.msra.mxu1 %v3714_v5 }
 0x298   :  { %v3725_v34 = vsub.f32 %v3723_v0, %v3724_v33  ;;  %3837 = vmatpush.msrb.mxu0 %v3718_v61  ;;  %3913 = vmatpush.msrb.mxu2 %v6091_v14 }
 0x299   :  { %3721 = vmatpush.msra.mxu1 %v3720_v32 }
 0x29a   :  { %v3726_v60 = vand.u32 4294901760, %v3725_v34  ;;  %3841 = vmatpush.msrb.mxu0 %v3724_v33  ;;  %3915 = vmatpush.msrb.mxu2 %v6096_v48 }
 0x29c   :  { %3727 = vmatpush.msra.mxu1 %v3726_v60  ;;  %3917 = vmatpush.msrb.mxu2 %v6110_v35 }
 0x29e   :  { %3869 = vmatpush.msrb.mxu1 %v3666_v2  ;;  %v3963_v2 = vsub.f32 %v78_v23, %v6096_v48 }
 0x2a0   :  { %3871 = vmatpush.msrb.mxu1 %v3668_v10  ;;  %v3958_v10 = vand.u32 4294901760, %v3957_v15  ;;  %v3964_v0 = vand.u32 4294901760, %v3963_v2 }
 0x2a2   :  { %3873 = vmatpush.msrb.mxu1 %v3670_v52  ;;  %v3959_v61 = vsub.f32 %v3957_v15, %v3958_v10  ;;  %v3965_v60 = vsub.f32 %v3963_v2, %v3964_v0 }
 0x2a4   :  { %v3960_v34 = vand.u32 4294901760, %v3959_v61 }
 0x2a6   :  { %3961 = vmatpush.msrb.mxu3 %v3960_v34 }
 0x2af   :  { %v2263_v42 = vpop.xlane.xlu0 %2262 }
 0x2b0   :  { %4713 = vrcp.f32 %v2263_v42  ;;  %v2476_v1 = vand.u32 2147483648, %v2263_v42  ;;  %v2474_v57 = vand.u32 2147483647, %v2263_v42  ;;  %vm2470_vm13 = vweird.f32 %v2263_v42 }
 0x2b2   :  { %v2477_v63 = vor.u32 1.1754944e-38, %v2476_v1  ;;  %vm2475_vm15 = vcmp.eq.f32.partialorder %v2474_v57, 8.507059e+37 }
 0x2b6   :  { %v4714_v24 = vpop.eup %4713 }
 0x2b7   :  { %v2466_v31 = vmul.f32 %v4714_v24, %v2263_v42  ;;  %v2137_v46 = vpop.xlane.xlu0 %2136  ;;  %vm2471_vm12 = vweird.f32 %v4714_v24  ;;  %v3969_v42 = vsub.f32 %v77_v6, %v6110_v35 }
 0x2b8   :  { %v2171_v21 = vsub.f32 %v6616_v22, %v2137_v46  ;;  %vm2472_vm14 = vmor %vm2470_vm13, %vm2471_vm12 }
 0x2b9   :  { %v2467_v43 = vsub.f32 1.0, %v2466_v31 }
 0x2ba   :  { %v2213_v39 = vmul.f32 1.442695, %v2171_v21 }
 0x2bb   :  { %v2468_v30 = vmul.f32 %v4714_v24, %v2467_v43  ;;  %v3238_v18 = vpop.f32.mrf.mxu1 }
 0x2bc   :  { %4715 = vpow2.f32 %v2213_v39  ;;  %v3966_v39 = vand.u32 4294901760, %v3965_v60 }
 0x2bd   :  { %v2469_v7 = vadd.f32 %v4714_v24, %v2468_v30  ;;  %v3970_v30 = vand.u32 4294901760, %v3969_v42 }
 0x2be   :  { %3967 = vmatpush.msrb.mxu3 %v3966_v39 }
 0x2bf   :  { %v2473_v53 = vsel %vm2472_vm14, %v4714_v24, %v2469_v7 }
 0x2c0   :  { %v2478_v25 = vsel %vm2475_vm15, %v2477_v63, %v2473_v53 }
 0x2c1   :  { %v2645_v44 = vmul.f32 %v6617_v37, %v2478_v25 }
 0x2c2   :  { %v6078_v45 = vpop.eup %4715 }
 0x2c3   :  { %v2279_v55 = vsel %vm110_vm1, %v6078_v45, 0.0  ;;  %v3642_v41 = vsel %vm110_vm1, %v2645_v44, 0  ;;  %v3186_v29 = vpop.f32.mrf.mxu0  ;;  %v3274_v8 = vpop.f32.mrf.mxu2 }
 0x2c4   :  { %2280 = vadd.xlane.f32.xlu0 %v2279_v55  ;;  %v6083_v11 = vand.u32 4294901760, %v3642_v41  ;;  %v3239_v17 = vadd.f32 %v3238_v18, %v3186_v29 }
 0x2c5   :  { %v3310_v58 = vpop.f32.mrf.mxu3 }
 0x2c6   :  { %3729 = vmatmul.f32.vlgmr.msra.gmra.mxu1 %v6083_v11  ;;  %v3673_v38 = vsub.f32 %v3642_v41, %v6083_v11  ;;  %v3275_v5 = vadd.f32 %v3274_v8, %v3239_v17  ;;  %v3971_v17 = vsub.f32 %v3969_v42, %v3970_v30 }
 0x2c7   :  { %4039 = vmatpush.msra.mxu1 %v6091_v14 }
 0x2c8   :  { %3765 = vmatmul.f32.vlgmr.msra.gmra.mxu2 %v3673_v38  ;;  %v3674_v59 = vand.u32 4294901760, %v3673_v38  ;;  %v6125_v21 = vadd.f32 %v3310_v58, %v3275_v5  ;;  %v3972_v5 = vand.u32 4294901760, %v3971_v17 }
 0x2c9   :  { %4041 = vmatpush.msra.mxu1 %v6096_v48  ;;  %4079 = vmatpush.msra.mxu2 %v3958_v10 }
 0x2ca   :  { %3801 = vmatmul.f32.vlgmr.msra.gmra.mxu3 %v3674_v59  ;;  %v3675_v49 = vsub.f32 %v3673_v38, %v3674_v59 }
 0x2cb   :  { %v6105_v9 = vpop.f32.mrf.mxu1  ;;  %4043 = vmatpush.msra.mxu1 %v6110_v35  ;;  %4083 = vmatpush.msra.mxu2 %v3964_v0 }
 0x2cc   :  { %v3676_v36 = vand.u32 4294901760, %v3675_v49  ;;  %v2266_v62 = vpop.xlane.xlu1 %2265  ;;  %3973 = vmatpush.msrb.mxu3 %v3972_v5 }
 0x2cd   :  { %4717 = vrcp.f32 %v2266_v62  ;;  %v2488_v33 = vand.u32 2147483647, %v2266_v62  ;;  %v2490_v32 = vand.u32 2147483648, %v2266_v62  ;;  %vm2484_vm4 = vweird.f32 %v2266_v62  ;;  %4087 = vmatpush.msra.mxu2 %v3970_v30 }
 0x2ce   :  { %3677 = vmatmul.f32.vlgmr.msra.gmra.mxu0 %v3676_v36  ;;  %4115 = vmatpush.msra.mxu3 %v6091_v14 }
 0x2cf   :  { %4002 = vmatpush.msra.mxu0 %v3957_v15  ;;  %vm6129_vm5 = vcmp.eq.f32.partialorder %v2488_v33, 8.507059e+37  ;;  %v2491_v63 = vor.u32 1.1754944e-38, %v2490_v32 }
 0x2d0   :  { %4117 = vmatpush.msra.mxu3 %v6096_v48 }
 0x2d1   :  { %4005 = vmatpush.msra.mxu0 %v3963_v2 }
 0x2d2   :  { %4119 = vmatpush.msra.mxu3 %v6110_v35 }
 0x2d3   :  { %v6107_v16 = vpop.xlane.xlu2 %2268  ;;  %v4718_v27 = vpop.eup %4717  ;;  %4008 = vmatpush.msra.mxu0 %v3969_v42 }
 0x2d4   :  { %4719 = vrcp.f32 %v6107_v16  ;;  %v2480_v52 = vmul.f32 %v4718_v27, %v2266_v62  ;;  %vm2485_vm3 = vweird.f32 %v4718_v27  ;;  %v6120_v31 = vpop.f32.mrf.mxu2  ;;  %v2502_v46 = vand.u32 2147483647, %v6107_v16 }
 0x2d5   :  { %v6114_v40 = vpop.xlane.xlu1 %2271  ;;  %v3194_v43 = vpop.f32.mrf.mxu0  ;;  %vm2486_vm6 = vmor %vm2484_vm4, %vm2485_vm3  ;;  %vm2498_vm7 = vweird.f32 %v6107_v16  ;;  %v2504_v55 = vand.u32 2147483648, %v6107_v16 }
 0x2d6   :  { %4721 = vrcp.f32 %v6114_v40  ;;  %v2481_v4 = vsub.f32 1.0, %v2480_v52  ;;  %vm6144_vm8 = vcmp.eq.f32.partialorder %v2502_v46, 8.507059e+37  ;;  %v6150_v18 = vpop.f32.mrf.mxu3  ;;  %v2518_v6 = vand.u32 2147483648, %v6114_v40 }
 0x2d7   :  { %vm2512_vm12 = vweird.f32 %v6114_v40 }
 0x2d8   :  { %v2482_v24 = vmul.f32 %v4718_v27, %v2481_v4  ;;  %v3243_v4 = vadd.f32 %v6105_v9, %v3194_v43  ;;  %v2519_v9 = vor.u32 1.1754944e-38, %v2518_v6 }
 0x2da   :  { %v6123_v22 = vpop.eup %4719  ;;  %v2483_v57 = vadd.f32 %v4718_v27, %v2482_v24  ;;  %v6135_v25 = vpop.f32.mrf.mxu1  ;;  %v3280_v14 = vadd.f32 %v6120_v31, %v3243_v4 }
 0x2db   :  { %v6127_v1 = vpop.xlane.xlu0 %2274  ;;  %v2494_v53 = vmul.f32 %v6123_v22, %v6107_v16  ;;  %v2140_v37 = vpop.xlane.xlu2 %2139  ;;  %vm2499_vm9 = vweird.f32 %v6123_v22 }
 0x2dc   :  { %v6137_v44 = vpop.eup %4721  ;;  %v2172_v41 = vsub.f32 %v5962_v26, %v2140_v37  ;;  %4723 = vrcp.f32 %v6127_v1  ;;  %v2487_v38 = vsel %vm2486_vm6, %v4718_v27, %v2483_v57  ;;  %v2516_v26 = vand.u32 2147483647, %v6114_v40  ;;  %vm6170_vm11 = vmor %vm2498_vm7, %vm2499_vm9 }
 0x2dd   :  { %v2495_v59 = vsub.f32 1.0, %v2494_v53  ;;  %v2508_v36 = vmul.f32 %v6137_v44, %v6114_v40  ;;  %v2143_v54 = vpop.xlane.xlu1 %2142  ;;  %v2492_v62 = vsel %vm6129_vm5, %v2491_v63, %v2487_v38  ;;  %vm2513_vm10 = vweird.f32 %v6137_v44 }
 0x2de   :  { %v2215_v28 = vmul.f32 1.442695, %v2172_v41  ;;  %v2173_v8 = vsub.f32 %v5973_v20, %v2143_v54  ;;  %v2646_v15 = vmul.f32 %v5900_v56, %v2492_v62  ;;  %v2505_v20 = vor.u32 1.1754944e-38, %v2504_v55  ;;  %vm6190_vm13 = vmor %vm2512_vm12, %vm2513_vm10 }
 0x2df   :  { %v2496_v29 = vmul.f32 %v6123_v22, %v2495_v59  ;;  %v2509_v23 = vsub.f32 1.0, %v2508_v36  ;;  %v2532_v42 = vand.u32 2147483648, %v6127_v1  ;;  %vm2517_vm14 = vcmp.eq.f32.partialorder %v2516_v26, 8.507059e+37 }
 0x2e0   :  { %4725 = vpow2.f32 %v2215_v28  ;;  %v2217_v27 = vmul.f32 1.442695, %v2173_v8  ;;  %v3645_v58 = vsel %vm110_vm1, %v2646_v15, 0  ;;  %v2530_v53 = vand.u32 2147483647, %v6127_v1 }
 0x2e1   :  { %v2497_v2 = vadd.f32 %v6123_v22, %v2496_v29  ;;  %v2510_v10 = vmul.f32 %v6137_v44, %v2509_v23  ;;  %v6175_v61 = vand.u32 4294901760, %v3645_v58  ;;  %vm2526_vm3 = vweird.f32 %v6127_v1 }
 0x2e2   :  { %v6164_v52 = vpop.eup %4723  ;;  %v6184_v34 = vpop.f32.mrf.mxu0  ;;  %4727 = vpow2.f32 %v2217_v27  ;;  %v2533_v38 = vor.u32 1.1754944e-38, %v2532_v42  ;;  %vm2531_vm5 = vcmp.eq.f32.partialorder %v2530_v53, 8.507059e+37 }
 0x2e3   :  { %v2146_v0 = vpop.xlane.xlu0 %2145  ;;  %v2501_v33 = vsel %vm6170_vm11, %v6123_v22, %v2497_v2  ;;  %v2511_v32 = vadd.f32 %v6137_v44, %v2510_v10  ;;  %v2522_v16 = vmul.f32 %v6164_v52, %v6127_v1  ;;  %v6186_v60 = vpop.f32.mrf.mxu2  ;;  %3733 = vmatmul.f32.gmra.mxu1 %v6175_v61  ;;  %vm2527_vm15 = vweird.f32 %v6164_v52 }
 0x2e4   :  { %v6195_v24 = vpop.f32.mrf.mxu1  ;;  %v6198_v46 = vpop.xlane.xlu2 %2277  ;;  %v2174_v22 = vsub.f32 %v5998_v12, %v2146_v0  ;;  %v2506_v63 = vsel %vm6144_vm8, %v2505_v20, %v2501_v33  ;;  %v3681_v59 = vsub.f32 %v3645_v58, %v6175_v61  ;;  %vm2528_vm4 = vmor %vm2526_vm3, %vm2527_vm15 }
 0x2e5   :  { %v2515_v43 = vsel %vm6190_vm13, %v6137_v44, %v2511_v32  ;;  %v2523_v39 = vsub.f32 1.0, %v2522_v16  ;;  %v6204_v30 = vpop.f32.mrf.mxu3  ;;  %4729 = vrcp.f32 %v6198_v46  ;;  %v2149_v57 = vpop.xlane.xlu1 %2148  ;;  %v2647_v1 = vmul.f32 %v5927_v47, %v2506_v63 }
 0x2e6   :  { %v6208_v7 = vpop.eup %4725  ;;  %v2520_v12 = vsel %vm2517_vm14, %v2519_v9, %v2515_v43  ;;  %v2219_v55 = vmul.f32 1.442695, %v2174_v22  ;;  %v2175_v41 = vsub.f32 %v6015_v50, %v2149_v57  ;;  %3770 = vmatmul.f32.gmra.mxu2 %v3681_v59  ;;  %v3682_v48 = vand.u32 4294901760, %v3681_v59 }
 0x2e7   :  { %v2648_v37 = vmul.f32 %v5943_v51, %v2520_v12  ;;  %v2524_v44 = vmul.f32 %v6164_v52, %v2523_v39  ;;  %v2282_v31 = vsel %vm110_vm1, %v6208_v7, 0.0  ;;  %v2544_v15 = vand.u32 2147483647, %v6198_v46 }
 0x2e8   :  { %4731 = vpow2.f32 %v2219_v55  ;;  %v2221_v51 = vmul.f32 1.442695, %v2175_v41  ;;  %v6224_v54 = vpop.eup %4727  ;;  %2283 = vadd.xlane.f32.xlu1 %v2282_v31  ;;  %3807 = vmatmul.f32.gmra.mxu3 %v3682_v48  ;;  %v3683_v10 = vsub.f32 %v3681_v59, %v3682_v48  ;;  %v3648_v27 = vsel %vm110_vm1, %v2647_v1, 0 }
 0x2e9   :  { %v3888_v49 = vsel %vm110_vm1, %v2648_v37, 0  ;;  %v2525_v36 = vadd.f32 %v6164_v52, %v2524_v44  ;;  %v2285_v28 = vsel %vm2086_vm2, %v6224_v54, 0.0  ;;  %v2546_v20 = vand.u32 2147483648, %v6198_v46 }
 0x2ea   :  { %v6226_v50 = vand.u32 4294901760, %v3888_v49  ;;  %4733 = vpow2.f32 %v2221_v51  ;;  %v3352_v35 = vpop.f32.mrf.mxu0  ;;  %2286 = vadd.xlane.f32.xlu2 %v2285_v28  ;;  %v6249_v0 = vand.u32 4294901760, %v3648_v27  ;;  %v3317_v22 = vadd.f32 %v6150_v18, %v3280_v14 }
 0x2eb   :  { %v4730_v62 = vpop.eup %4729  ;;  %v2529_v26 = vsel %vm2528_vm4, %v6164_v52, %v2525_v36  ;;  %v3353_v17 = vadd.f32 %v3352_v35, %v6125_v21  ;;  %v3684_v21 = vand.u32 4294901760, %v3683_v10  ;;  %vm2540_vm7 = vweird.f32 %v6198_v46 }
 0x2ec   :  { %v6237_v29 = vsub.f32 %v3888_v49, %v6226_v50  ;;  %v2534_v23 = vsel %vm2531_vm5, %v2533_v38, %v2529_v26  ;;  %v2536_v8 = vmul.f32 %v4730_v62, %v6198_v46  ;;  %v3388_v47 = vpop.f32.mrf.mxu1  ;;  %v2152_v6 = vpop.xlane.xlu2 %2151  ;;  %vm2541_vm6 = vweird.f32 %v4730_v62  ;;  %3737 = vmatmul.f32.gmra.mxu1 %v6249_v0 }
 0x2ed   :  { %v6242_v2 = vpop.f32.mrf.mxu3  ;;  %v2176_v58 = vsub.f32 %v6031_v3, %v2152_v6  ;;  %v6246_v52 = vpop.f32.mrf.mxu2  ;;  %v3385_v4 = vadd.f32 %v6195_v24, %v3353_v17  ;;  %v2649_v32 = vmul.f32 %v5969_v19, %v2534_v23  ;;  %v3689_v3 = vsub.f32 %v3648_v27, %v6249_v0  ;;  %3685 = vmatmul.f32.gmra.mxu0 %v3684_v21  ;;  %vm2542_vm8 = vmor %vm2540_vm7, %vm2541_vm6 }
 0x2ee   :  { %v2537_v56 = vsub.f32 1.0, %v2536_v8  ;;  %v6251_v5 = vpop.eup %4731  ;;  %v3920_v9 = vand.u32 4294901760, %v6237_v29  ;;  %v3247_v24 = vadd.f32 %v6135_v25, %v6184_v34  ;;  %vm2545_vm9 = vcmp.eq.f32.partialorder %v2544_v15, 8.507059e+37 }
 0x2ef   :  { %v2223_v33 = vmul.f32 1.442695, %v2176_v58  ;;  %v2288_v40 = vsel %vm110_vm1, %v6251_v5, 0.0  ;;  %4631 = vst.msk [vmem:[%s6597_s3 + $0x30] sm:$0xff] %vm110_vm1, %v3385_v4  ;;  %v3891_v19 = vsel %vm110_vm1, %v2649_v32, 0  ;;  %3775 = vmatmul.f32.gmra.mxu2 %v3689_v3  ;;  %v3690_v39 = vand.u32 4294901760, %v3689_v3 }
 0x2f0   :  { %v2538_v16 = vmul.f32 %v4730_v62, %v2537_v56  ;;  %v6260_v42 = vpop.eup %4733  ;;  %2289 = vadd.xlane.f32.xlu0 %v2288_v40  ;;  %v2547_v25 = vor.u32 1.1754944e-38, %v2546_v20  ;;  %v6274_v57 = vand.u32 4294901760, %v3891_v19  ;;  %v3921_v46 = vsub.f32 %v6237_v29, %v3920_v9 }
 0x2f1   :  { %4735 = vpow2.f32 %v2223_v33  ;;  %v2291_v18 = vsel %vm110_vm1, %v6260_v42, 0.0  ;;  %3813 = vmatmul.f32.gmra.mxu3 %v3690_v39  ;;  %v3691_v53 = vsub.f32 %v3689_v3, %v3690_v39  ;;  %v3285_v14 = vadd.f32 %v6186_v60, %v3247_v24 }
 0x2f2   :  { %v2539_v43 = vadd.f32 %v4730_v62, %v2538_v16  ;;  %v3356_v34 = vpop.f32.mrf.mxu0  ;;  %2292 = vadd.xlane.f32.xlu1 %v2291_v18  ;;  %v6280_v41 = vsub.f32 %v3891_v19, %v6274_v57  ;;  %v3922_v48 = vand.u32 4294901760, %v3921_v46  ;;  %v3485_v10 = vadd.f32 %v6242_v2, %v6246_v52  ;;  %v81_v46 = vld [vmem:[%s6596_s2 + $0x98] sm:$0xff] }
 0x2f3   :  { %v3357_v12 = vadd.f32 %v3356_v34, %v3317_v22  ;;  %v3692_v59 = vand.u32 4294901760, %v3691_v53 }
 0x2f4   :  { %v2543_v63 = vsel %vm2542_vm8, %v4730_v62, %v2539_v43  ;;  %v3392_v51 = vpop.f32.mrf.mxu1  ;;  %3875 = vmatmul.f32.vlgmr.msrb.gmra.mxu1 %v6083_v11  ;;  %v3928_v60 = vand.u32 4294901760, %v6280_v41  ;;  %v3323_v62 = vadd.f32 %v6204_v30, %v3285_v14 }
 0x2f5   :  { %v2548_v37 = vsel %vm2545_vm9, %v2547_v25, %v2543_v63  ;;  %v3488_v44 = vpop.f32.mrf.mxu3  ;;  %v3440_v55 = vpop.f32.mrf.mxu2  ;;  %v3389_v38 = vadd.f32 %v3388_v47, %v3357_v12  ;;  %3693 = vmatmul.f32.gmra.mxu0 %v3692_v59 }
 0x2f6   :  { %v2650_v49 = vmul.f32 %v6012_v13, %v2548_v37  ;;  %v3929_v28 = vsub.f32 %v6280_v41, %v3928_v60 }
 0x2f7   :  { %v6284_v36 = vpop.eup %4735  ;;  %4632 = vst.msk [vmem:[%s6597_s3 + $0x38] sm:$0xff] %vm110_vm1, %v3389_v38  ;;  %3923 = vmatmul.f32.vlgmr.msrb.gmra.mxu2 %v3922_v48 }
 0x2f8   :  { %v2294_v31 = vsel %vm2086_vm2, %v6284_v36, 0.0  ;;  %v3894_v1 = vsel %vm110_vm1, %v2650_v49, 0  ;;  %v3930_v30 = vand.u32 4294901760, %v3929_v28 }
 0x2f9   :  { %2295 = vadd.xlane.f32.xlu2 %v2294_v31  ;;  %v6295_v13 = vand.u32 4294901760, %v3894_v1  ;;  %3975 = vmatmul.f32.vlgmr.msrb.gmra.mxu3 %v6226_v50 }
 0x2fa   :  { %v3360_v26 = vpop.f32.mrf.mxu0 }
 0x2fb   :  { %v3361_v35 = vadd.f32 %v3360_v26, %v3323_v62  ;;  %v6301_v23 = vsub.f32 %v3894_v1, %v6295_v13 }
 0x2fc   :  { %3879 = vmatmul.f32.gmra.mxu1 %v6175_v61  ;;  %v3556_v17 = vpop.f32.mrf.mxu1 }
 0x2fd   :  { %v3492_v8 = vpop.f32.mrf.mxu3  ;;  %v3448_v15 = vpop.f32.mrf.mxu2  ;;  %v3393_v47 = vadd.f32 %v3392_v51, %v3361_v35  ;;  %v3936_v6 = vand.u32 4294901760, %v6301_v23  ;;  %3843 = vmatmul.f32.vlgmr.msrb.gmra.mxu0 %v6083_v11  ;;  %v3489_v11 = vadd.f32 %v3488_v44, %v3440_v55  ;;  %v80_v44 = vld [vmem:[%s6596_s2 + $0x90] sm:$0xff] }
 0x2fe   :  { %v3493_v19 = vadd.f32 %v3492_v8, %v3448_v15  ;;  %v4162_v14 = vand.u32 4294901760, %v80_v44 }
 0x2ff   :  { %4633 = vst.msk [vmem:[%s6597_s3 + $0x40] sm:$0xf] %vm2086_vm2, %v3393_v47  ;;  %3931 = vmatmul.f32.gmra.mxu2 %v3930_v30  ;;  %v3937_v56 = vsub.f32 %v6301_v23, %v3936_v6 }
 0x300   :  { %v4215_v49 = vsub.f32 %v80_v44, %v4162_v14 }
 0x301   :  { %3979 = vmatmul.f32.gmra.mxu3 %v6274_v57  ;;  %v3938_v33 = vand.u32 4294901760, %v3937_v56 }
 0x302   :  { %v3520_v27 = vpop.f32.mrf.mxu0  ;;  %v4216_v31 = vand.u32 4294901760, %v4215_v49 }
 0x303   :  { %v3521_v58 = vadd.f32 %v3520_v27, %v3485_v10 }
 0x304   :  { %3883 = vmatmul.f32.gmra.mxu1 %v6249_v0  ;;  %v3562_v2 = vpop.f32.mrf.mxu1  ;;  %v4217_v1 = vsub.f32 %v4215_v49, %v4216_v31 }
 0x305   :  { %v3630_v20 = vpop.f32.mrf.mxu3  ;;  %v3598_v4 = vpop.f32.mrf.mxu2  ;;  %v3557_v21 = vadd.f32 %v3556_v17, %v3521_v58  ;;  %3847 = vmatmul.f32.gmra.mxu0 %v6175_v61 }
 0x307   :  { %v3599_v32 = vadd.f32 %v3598_v4, %v3557_v21  ;;  %3939 = vmatmul.f32.gmra.mxu2 %v3938_v33 }
 0x309   :  { %v3631_v16 = vadd.f32 %v3630_v20, %v3599_v32  ;;  %3983 = vmatmul.f32.gmra.mxu3 %v6295_v13  ;;  %v85_v32 = vld [vmem:[%s6596_s2 + $0xb8] sm:$0xf] }
 0x30a   :  { %v3525_v52 = vpop.f32.mrf.mxu0 }
 0x30b   :  { %4634 = vst.msk [vmem:[%s6597_s3 + $0x48] sm:$0xff] %vm110_vm1, %v3631_v16  ;;  %v3526_v3 = vadd.f32 %v3525_v52, %v3489_v11  ;;  %v4389_v11 = vsel %vm120_vm0, %v85_v32, 0  ;;  %v84_v52 = vld [vmem:[%s6596_s2 + $0xb0] sm:$0xff] }
 0x30c   :  { %4047 = vmatmul.f32.vlgmr.msra.gmra.mxu1 %v3920_v9  ;;  %v3568_v25 = vpop.f32.mrf.mxu1 }
 0x30d   :  { %v3602_v40 = vpop.f32.mrf.mxu2  ;;  %v3563_v22 = vadd.f32 %v3562_v2, %v3526_v3  ;;  %v3634_v24 = vpop.f32.mrf.mxu3  ;;  %3851 = vmatmul.f32.gmra.mxu0 %v6249_v0  ;;  %v6370_v3 = vand.u32 4294901760, %v4389_v11 }
 0x30f   :  { %v3603_v61 = vadd.f32 %v3602_v40, %v3563_v22  ;;  %4089 = vmatmul.f32.vlgmr.msra.gmra.mxu2 %v6226_v50  ;;  %v6372_v40 = vand.u32 4294901760, %v84_v52  ;;  %v83_v22 = vld [vmem:[%s6596_s2 + $0xa8] sm:$0xff] }
 0x311   :  { %v3635_v43 = vadd.f32 %v3634_v24, %v3603_v61  ;;  %4121 = vmatmul.f32.vlgmr.msra.gmra.mxu3 %v6226_v50  ;;  %v82_v50 = vld [vmem:[%s6596_s2 + $0xa0] sm:$0xf] }
 0x312   :  { %v3530_v39 = vpop.f32.mrf.mxu0 }
 0x313   :  { %4635 = vst.msk [vmem:[%s6597_s3 + $0x50] sm:$0xff] %vm110_vm1, %v3635_v43  ;;  %v3531_v18 = vadd.f32 %v3530_v39, %v3493_v19  ;;  %v4449_v19 = vsub.f32 %v4389_v11, %v6370_v3  ;;  %v4455_v43 = vsub.f32 %v84_v52, %v6372_v40 }
 0x314   :  { %4053 = vmatmul.f32.gmra.mxu1 %v3928_v60 }
 0x315   :  { %v3606_v34 = vpop.f32.mrf.mxu2  ;;  %v3569_v63 = vadd.f32 %v3568_v25, %v3531_v18  ;;  %v3638_v12 = vpop.f32.mrf.mxu3  ;;  %4011 = vmatmul.f32.vlgmr.msra.gmra.mxu0 %v6237_v29  ;;  %v4143_v29 = vsel %vm120_vm0, %v82_v50, 0  ;;  %v4450_v50 = vand.u32 4294901760, %v4449_v19 }
 0x316   :  { %v4158_v53 = vand.u32 4294901760, %v4143_v29 }
 0x317   :  { %v3607_v9 = vadd.f32 %v3606_v34, %v3569_v63  ;;  %4093 = vmatmul.f32.gmra.mxu2 %v6274_v57  ;;  %v6389_v34 = vand.u32 4294901760, %v83_v22 }
 0x318   :  { %v4203_v37 = vsub.f32 %v4143_v29, %v4158_v53  ;;  %4285 = vmatpush.msrb.mxu3 %v4158_v53  ;;  %4159 = vmatpush.msrb.mxu0 %v4158_v53  ;;  %v4456_v29 = vand.u32 4294901760, %v4455_v43 }
 0x319   :  { %v3639_v0 = vadd.f32 %v3638_v12, %v3607_v9  ;;  %4125 = vmatmul.f32.gmra.mxu3 %v6274_v57  ;;  %v4160_v57 = vand.u32 4294901760, %v81_v46 }
 0x31a   :  { %v4204_v55 = vand.u32 4294901760, %v4203_v37  ;;  %4248 = vmatpush.msrb.mxu2 %v4203_v37 }
 0x31b   :  { %4636 = vst.msk [vmem:[%s6597_s3 + $0x58] sm:$0xf] %vm2086_vm2, %v3639_v0  ;;  %4287 = vmatpush.msrb.mxu3 %v4160_v57  ;;  %4161 = vmatpush.msrb.mxu0 %v4160_v57 }
 0x31c   :  { %4059 = vmatmul.f32.gmra.mxu1 %v3936_v6  ;;  %v4205_v38 = vsub.f32 %v4203_v37, %v4204_v55 }
 0x31d   :  { %4016 = vmatmul.f32.gmra.mxu0 %v6280_v41  ;;  %v4209_v41 = vsub.f32 %v81_v46, %v4160_v57  ;;  %4289 = vmatpush.msrb.mxu3 %v4162_v14 }
 0x31e   :  { %4163 = vmatpush.msrb.mxu0 %v4162_v14  ;;  %v4206_v51 = vand.u32 4294901760, %v4205_v38  ;;  %v4451_v38 = vsub.f32 %v4449_v19, %v4450_v50 }
 0x31f   :  { %4097 = vmatmul.f32.gmra.mxu2 %v6295_v13  ;;  %v4210_v59 = vand.u32 4294901760, %v4209_v41 }
 0x320   :  { %4251 = vmatpush.msrb.mxu2 %v4209_v41  ;;  %4325 = vmatpush.msra.mxu0 %v4204_v55 }
 0x321   :  { %4129 = vmatmul.f32.gmra.mxu3 %v6295_v13  ;;  %v4211_v48 = vsub.f32 %v4209_v41, %v4210_v59  ;;  %4207 = vmatpush.msrb.mxu1 %v4206_v51  ;;  %v4218_v13 = vand.u32 4294901760, %v4217_v1  ;;  %v4452_v1 = vand.u32 4294901760, %v4451_v38 }
 0x322   :  { %4254 = vmatpush.msrb.mxu2 %v4215_v49  ;;  %4329 = vmatpush.msra.mxu0 %v4210_v59  ;;  %v4457_v59 = vsub.f32 %v4455_v43, %v4456_v29 }
 0x323   :  { %v4212_v60 = vand.u32 4294901760, %v4211_v48  ;;  %v4461_v48 = vsub.f32 %v83_v22, %v6389_v34  ;;  %4453 = vmatpush.msra.mxu3 %v4452_v1 }
 0x324   :  { %4333 = vmatpush.msra.mxu0 %v4216_v31  ;;  %4405 = vmatpush.msra.mxu2 %v6370_v3 }
 0x325   :  { %4021 = vmatmul.f32.gmra.mxu0 %v6301_v23  ;;  %4213 = vmatpush.msrb.mxu1 %v4212_v60 }
 0x326   :  { %4407 = vmatpush.msra.mxu2 %v6372_v40 }
 0x327   :  { %4219 = vmatpush.msrb.mxu1 %v4218_v13  ;;  %v4458_v13 = vand.u32 4294901760, %v4457_v59 }
 0x328   :  { %4409 = vmatpush.msra.mxu2 %v6389_v34 }
 0x329   :  { %4361 = vmatpush.msra.mxu1 %v4158_v53  ;;  %4459 = vmatpush.msra.mxu3 %v4458_v13 }
 0x32b   :  { %4363 = vmatpush.msra.mxu1 %v4160_v57 }
 0x32d   :  { %4365 = vmatpush.msra.mxu1 %v4162_v14 }
 0x337   :  { %v2281_v62 = vpop.xlane.xlu0 %2280 }
 0x338   :  { %4737 = vrcp.f32 %v2281_v62  ;;  %v2560_v23 = vand.u32 2147483648, %v2281_v62  ;;  %v2558_v15 = vand.u32 2147483647, %v2281_v62  ;;  %vm2554_vm11 = vweird.f32 %v2281_v62 }
 0x33a   :  { %v2561_v30 = vor.u32 1.1754944e-38, %v2560_v23  ;;  %vm2559_vm13 = vcmp.eq.f32.partialorder %v2558_v15, 8.507059e+37  ;;  %v4462_v23 = vand.u32 4294901760, %v4461_v48 }
 0x33e   :  { %v4738_v26 = vpop.eup %4737 }
 0x33f   :  { %v2550_v35 = vmul.f32 %v4738_v26, %v2281_v62  ;;  %vm2555_vm10 = vweird.f32 %v4738_v26 }
 0x340   :  { %vm2556_vm12 = vmor %vm2554_vm11, %vm2555_vm10 }
 0x341   :  { %v2551_v28 = vsub.f32 1.0, %v2550_v35 }
 0x343   :  { %v2552_v8 = vmul.f32 %v4738_v26, %v2551_v28  ;;  %v3730_v33 = vpop.f32.mrf.mxu1 }
 0x345   :  { %v2553_v47 = vadd.f32 %v4738_v26, %v2552_v8 }
 0x347   :  { %v2557_v6 = vsel %vm2556_vm12, %v4738_v26, %v2553_v47 }
 0x348   :  { %v2562_v17 = vsel %vm2559_vm13, %v2561_v30, %v2557_v6 }
 0x349   :  { %v2651_v10 = vmul.f32 %v6078_v45, %v2562_v17 }
 0x34b   :  { %v4134_v27 = vsel %vm110_vm1, %v2651_v10, 0  ;;  %v3678_v2 = vpop.f32.mrf.mxu0  ;;  %v3766_v25 = vpop.f32.mrf.mxu2 }
 0x34c   :  { %v6353_v58 = vand.u32 4294901760, %v4134_v27  ;;  %v3731_v24 = vadd.f32 %v3730_v33, %v3678_v2 }
 0x34d   :  { %v6401_v46 = vpop.f32.mrf.mxu3 }
 0x34e   :  { %4221 = vmatmul.f32.vlgmr.msrb.gmra.mxu1 %v6353_v58  ;;  %v4165_v56 = vsub.f32 %v4134_v27, %v6353_v58  ;;  %v6399_v53 = vadd.f32 %v3766_v25, %v3731_v24 }
 0x34f   :  { %4531 = vmatpush.msrb.mxu1 %v6370_v3 }
 0x350   :  { %4257 = vmatmul.f32.vlgmr.msrb.gmra.mxu2 %v4165_v56  ;;  %v4166_v20 = vand.u32 4294901760, %v4165_v56 }
 0x351   :  { %4533 = vmatpush.msrb.mxu1 %v6372_v40  ;;  %4571 = vmatpush.msrb.mxu2 %v4450_v50 }
 0x352   :  { %4293 = vmatmul.f32.vlgmr.msrb.gmra.mxu3 %v4166_v20  ;;  %v4167_v4 = vsub.f32 %v4165_v56, %v4166_v20 }
 0x353   :  { %4535 = vmatpush.msrb.mxu1 %v6389_v34  ;;  %4575 = vmatpush.msrb.mxu2 %v4456_v29 }
 0x354   :  { %v4168_v21 = vand.u32 4294901760, %v4167_v4 }
 0x355   :  { %4579 = vmatpush.msrb.mxu2 %v4462_v23 }
 0x356   :  { %4169 = vmatmul.f32.vlgmr.msrb.gmra.mxu0 %v4168_v21  ;;  %v4463_v21 = vsub.f32 %v4461_v48, %v4462_v23 }
 0x357   :  { %4494 = vmatpush.msrb.mxu0 %v4449_v19 }
 0x359   :  { %4497 = vmatpush.msrb.mxu0 %v4455_v43 }
 0x35b   :  { %v6360_v45 = vpop.xlane.xlu1 %2283  ;;  %4500 = vmatpush.msrb.mxu0 %v4461_v48 }
 0x35c   :  { %4739 = vrcp.f32 %v6360_v45  ;;  %v2572_v12 = vand.u32 2147483647, %v6360_v45  ;;  %vm2568_vm0 = vweird.f32 %v6360_v45  ;;  %v2574_v57 = vand.u32 2147483648, %v6360_v45 }
 0x35d   :  { %v6363_v16 = vpop.xlane.xlu2 %2286 }
 0x35e   :  { %4741 = vrcp.f32 %v6363_v16  ;;  %vm2582_vm14 = vweird.f32 %v6363_v16  ;;  %v2586_v44 = vand.u32 2147483647, %v6363_v16  ;;  %v2588_v14 = vand.u32 2147483648, %v6363_v16 }
 0x35f   :  { %vm6415_vm3 = vcmp.eq.f32.partialorder %v2572_v12, 8.507059e+37  ;;  %v2575_v26 = vor.u32 1.1754944e-38, %v2574_v57 }
 0x360   :  { %v6377_v61 = vpop.f32.mrf.mxu1  ;;  %vm6427_vm5 = vcmp.eq.f32.partialorder %v2586_v44, 8.507059e+37  ;;  %v2589_v27 = vor.u32 1.1754944e-38, %v2588_v14 }
 0x362   :  { %v6385_v18 = vpop.eup %4739 }
 0x363   :  { %v6383_v39 = vpop.xlane.xlu0 %2289  ;;  %v2564_v9 = vmul.f32 %v6385_v18, %v6360_v45  ;;  %vm2569_vm15 = vweird.f32 %v6385_v18 }
 0x364   :  { %4743 = vrcp.f32 %v6383_v39  ;;  %v6391_v63 = vpop.eup %4741  ;;  %vm6435_vm6 = vmor %vm2568_vm0, %vm2569_vm15  ;;  %v2602_v30 = vand.u32 2147483648, %v6383_v39  ;;  %vm2596_vm8 = vweird.f32 %v6383_v39  ;;  %v2600_v52 = vand.u32 2147483647, %v6383_v39 }
 0x365   :  { %v6396_v0 = vpop.xlane.xlu1 %2292  ;;  %v2578_v37 = vmul.f32 %v6391_v63, %v6363_v16  ;;  %v2565_v55 = vsub.f32 1.0, %v2564_v9  ;;  %vm2583_vm4 = vweird.f32 %v6391_v63  ;;  %v4464_v9 = vand.u32 4294901760, %v4463_v21 }
 0x366   :  { %4745 = vrcp.f32 %v6396_v0  ;;  %vm2584_vm7 = vmor %vm2582_vm14, %vm2583_vm4  ;;  %v2603_v22 = vor.u32 1.1754944e-38, %v2602_v30  ;;  %v2614_v25 = vand.u32 2147483647, %v6396_v0  ;;  %vm2601_vm12 = vcmp.eq.f32.partialorder %v2600_v52, 8.507059e+37 }
 0x367   :  { %v2579_v41 = vsub.f32 1.0, %v2578_v37  ;;  %v2566_v49 = vmul.f32 %v6385_v18, %v2565_v55  ;;  %vm2610_vm13 = vweird.f32 %v6396_v0  ;;  %4465 = vmatpush.msra.mxu3 %v4464_v9  ;;  %v3803_v30 = vadd.f32 %v6401_v46, %v6399_v53 }
 0x368   :  { %vm2615_vm14 = vcmp.eq.f32.partialorder %v2614_v25, 8.507059e+37 }
 0x369   :  { %v2580_v60 = vmul.f32 %v6391_v63, %v2579_v41  ;;  %v2567_v62 = vadd.f32 %v6385_v18, %v2566_v49  ;;  %v6440_v6 = vpop.f32.mrf.mxu1  ;;  %v6442_v17 = vpop.f32.mrf.mxu2  ;;  %4607 = vmatpush.msrb.mxu3 %v6370_v3 }
 0x36a   :  { %v4744_v31 = vpop.eup %4743  ;;  %v6452_v4 = vpop.f32.mrf.mxu0 }
 0x36b   :  { %v2592_v35 = vmul.f32 %v4744_v31, %v6383_v39  ;;  %v2581_v8 = vadd.f32 %v6391_v63, %v2580_v60  ;;  %v2571_v56 = vsel %vm6435_vm6, %v6385_v18, %v2567_v62  ;;  %v6459_v11 = vpop.f32.mrf.mxu3  ;;  %vm2597_vm9 = vweird.f32 %v4744_v31  ;;  %4609 = vmatpush.msrb.mxu3 %v6372_v40 }
 0x36c   :  { %v6424_v28 = vpop.xlane.xlu2 %2295  ;;  %v4746_v10 = vpop.eup %4745  ;;  %v2576_v32 = vsel %vm6415_vm3, %v2575_v26, %v2571_v56  ;;  %vm2598_vm10 = vmor %vm2596_vm8, %vm2597_vm9 }
 0x36d   :  { %4747 = vrcp.f32 %v6424_v28  ;;  %v2593_v20 = vsub.f32 1.0, %v2592_v35  ;;  %v2585_v33 = vsel %vm2584_vm7, %v6391_v63, %v2581_v8  ;;  %v2606_v45 = vmul.f32 %v4746_v10, %v6396_v0  ;;  %4611 = vmatpush.msrb.mxu3 %v6389_v34 }
 0x36e   :  { %v2590_v16 = vsel %vm6427_vm5, %v2589_v27, %v2585_v33  ;;  %v2652_v19 = vmul.f32 %v6208_v7, %v2576_v32  ;;  %v2616_v63 = vand.u32 2147483648, %v6396_v0  ;;  %vm2611_vm11 = vweird.f32 %v4746_v10 }
 0x36f   :  { %v2594_v2 = vmul.f32 %v4744_v31, %v2593_v20  ;;  %v2607_v24 = vsub.f32 1.0, %v2606_v45  ;;  %v2653_v43 = vmul.f32 %v6224_v54, %v2590_v16  ;;  %vm2612_vm0 = vmor %vm2610_vm13, %vm2611_vm11  ;;  %v2628_v48 = vand.u32 2147483647, %v6424_v28 }
 0x370   :  { %v4137_v29 = vsel %vm110_vm1, %v2652_v19, 0  ;;  %v2617_v38 = vor.u32 1.1754944e-38, %v2616_v63  ;;  %vm2624_vm3 = vweird.f32 %v6424_v28  ;;  %v3735_v27 = vadd.f32 %v6377_v61, %v6452_v4 }
 0x371   :  { %v2595_v18 = vadd.f32 %v4744_v31, %v2594_v2  ;;  %v2608_v50 = vmul.f32 %v4746_v10, %v2607_v24  ;;  %v4140_v37 = vsel %vm110_vm1, %v2653_v43, 0  ;;  %v6476_v41 = vand.u32 4294901760, %v4137_v29  ;;  %v3876_v49 = vpop.f32.mrf.mxu1 }
 0x372   :  { %v6474_v55 = vpop.f32.mrf.mxu2  ;;  %v6478_v39 = vand.u32 4294901760, %v4140_v37  ;;  %v3694_v59 = vpop.f32.mrf.mxu0  ;;  %vm2629_vm5 = vcmp.eq.f32.partialorder %v2628_v48, 8.507059e+37  ;;  %v3772_v2 = vadd.f32 %v6442_v17, %v3735_v27 }
 0x373   :  { %v4748_v12 = vpop.eup %4747  ;;  %v2599_v57 = vsel %vm2598_vm10, %v4744_v31, %v2595_v18  ;;  %v2609_v44 = vadd.f32 %v4746_v10, %v2608_v50  ;;  %v2630_v31 = vand.u32 2147483648, %v6424_v28  ;;  %4225 = vmatmul.f32.gmra.mxu1 %v6476_v41  ;;  %v4173_v3 = vsub.f32 %v4137_v29, %v6476_v41 }
 0x374   :  { %v2620_v7 = vmul.f32 %v4748_v12, %v6424_v28  ;;  %v2604_v54 = vsel %vm2601_vm12, %v2603_v22, %v2599_v57  ;;  %v6485_v60 = vpop.f32.mrf.mxu3  ;;  %vm2625_vm15 = vweird.f32 %v4748_v12  ;;  %v4181_v23 = vsub.f32 %v4140_v37, %v6478_v39 }
 0x375   :  { %v2654_v14 = vmul.f32 %v6251_v5, %v2604_v54  ;;  %v2613_v51 = vsel %vm2612_vm0, %v4746_v10, %v2609_v44  ;;  %4262 = vmatmul.f32.gmra.mxu2 %v4173_v3  ;;  %v4174_v35 = vand.u32 4294901760, %v4173_v3  ;;  %vm2626_vm4 = vmor %vm2624_vm3, %vm2625_vm15  ;;  %v2631_v47 = vor.u32 1.1754944e-38, %v2630_v31 }
 0x376   :  { %v2621_v0 = vsub.f32 1.0, %v2620_v7  ;;  %v2618_v1 = vsel %vm2615_vm14, %v2617_v38, %v2613_v51  ;;  %v4182_v20 = vand.u32 4294901760, %v4181_v23  ;;  %v3809_v17 = vadd.f32 %v6459_v11, %v3772_v2 }
 0x377   :  { %v4380_v5 = vsel %vm110_vm1, %v2654_v14, 0  ;;  %v2655_v26 = vmul.f32 %v6260_v42, %v2618_v1  ;;  %4299 = vmatmul.f32.gmra.mxu3 %v4174_v35  ;;  %v4175_v40 = vsub.f32 %v4173_v3, %v4174_v35  ;;  %v3739_v24 = vadd.f32 %v6440_v6, %v3694_v59 }
 0x378   :  { %v2622_v13 = vmul.f32 %v4748_v12, %v2621_v0  ;;  %v6491_v62 = vand.u32 4294901760, %v4380_v5  ;;  %v4183_v4 = vsub.f32 %v4181_v23, %v4182_v20 }
 0x379   :  { %v4383_v10 = vsel %vm110_vm1, %v2655_v26, 0  ;;  %v4176_v34 = vand.u32 4294901760, %v4175_v40  ;;  %v3880_v16 = vpop.f32.mrf.mxu1  ;;  %v3777_v29 = vadd.f32 %v6474_v55, %v3739_v24 }
 0x37a   :  { %v2623_v8 = vadd.f32 %v4748_v12, %v2622_v13  ;;  %v6498_v15 = vsub.f32 %v4380_v5, %v6491_v62  ;;  %v3924_v56 = vpop.f32.mrf.mxu2  ;;  %v3844_v21 = vpop.f32.mrf.mxu0  ;;  %v6507_v53 = vand.u32 4294901760, %v4383_v10  ;;  %v4184_v43 = vand.u32 4294901760, %v4183_v4 }
 0x37b   :  { %v3845_v33 = vadd.f32 %v3844_v21, %v3803_v30  ;;  %4177 = vmatmul.f32.gmra.mxu0 %v4176_v34  ;;  %4229 = vmatmul.f32.gmra.mxu1 %v6478_v39  ;;  %v3815_v7 = vadd.f32 %v6485_v60, %v3777_v29 }
 0x37c   :  { %v2627_v42 = vsel %vm2626_vm4, %v4748_v12, %v2623_v8  ;;  %v3976_v32 = vpop.f32.mrf.mxu3  ;;  %v4412_v45 = vand.u32 4294901760, %v6498_v15  ;;  %v6519_v22 = vsub.f32 %v4383_v10, %v6507_v53 }
 0x37d   :  { %v2632_v28 = vsel %vm2629_vm5, %v2631_v47, %v2627_v42  ;;  %v3877_v61 = vadd.f32 %v3876_v49, %v3845_v33  ;;  %4267 = vmatmul.f32.gmra.mxu2 %v4181_v23  ;;  %v3977_v48 = vadd.f32 %v3976_v32, %v3924_v56 }
 0x37e   :  { %v2656_v46 = vmul.f32 %v6284_v36, %v2632_v28  ;;  %v4413_v52 = vsub.f32 %v6498_v15, %v4412_v45  ;;  %v4420_v12 = vand.u32 4294901760, %v6519_v22 }
 0x37f   :  { %4637 = vst.msk [vmem:[%s6597_s3 + $0x60] sm:$0xff] %vm110_vm1, %v3877_v61  ;;  %4305 = vmatmul.f32.gmra.mxu3 %v4182_v20 }
 0x380   :  { %v4386_v36 = vsel %vm110_vm1, %v2656_v46, 0  ;;  %v4414_v9 = vand.u32 4294901760, %v4413_v52  ;;  %v4421_v6 = vsub.f32 %v6519_v22, %v4420_v12 }
 0x381   :  { %v6526_v50 = vand.u32 4294901760, %v4386_v36  ;;  %v3884_v11 = vpop.f32.mrf.mxu1 }
 0x382   :  { %v3932_v19 = vpop.f32.mrf.mxu2  ;;  %v3848_v18 = vpop.f32.mrf.mxu0  ;;  %v4422_v38 = vand.u32 4294901760, %v4421_v6 }
 0x383   :  { %v3849_v25 = vadd.f32 %v3848_v18, %v3809_v17  ;;  %4185 = vmatmul.f32.gmra.mxu0 %v4184_v43  ;;  %4367 = vmatmul.f32.vlgmr.msra.gmra.mxu1 %v6353_v58  ;;  %v4427_v57 = vsub.f32 %v4386_v36, %v6526_v50 }
 0x384   :  { %v3980_v63 = vpop.f32.mrf.mxu3 }
 0x385   :  { %v3881_v37 = vadd.f32 %v3880_v16, %v3849_v25  ;;  %4415 = vmatmul.f32.vlgmr.msra.gmra.mxu2 %v4414_v9  ;;  %v4428_v0 = vand.u32 4294901760, %v4427_v57  ;;  %v3981_v26 = vadd.f32 %v3980_v63, %v3932_v19 }
 0x387   :  { %4638 = vst.msk [vmem:[%s6597_s3 + $0x68] sm:$0xff] %vm110_vm1, %v3881_v37  ;;  %4467 = vmatmul.f32.vlgmr.msra.gmra.mxu3 %v6491_v62  ;;  %v4429_v49 = vsub.f32 %v4427_v57, %v4428_v0 }
 0x389   :  { %v4048_v51 = vpop.f32.mrf.mxu1 }
 0x38a   :  { %v3940_v54 = vpop.f32.mrf.mxu2  ;;  %v3852_v44 = vpop.f32.mrf.mxu0 }
 0x38b   :  { %v3853_v14 = vadd.f32 %v3852_v44, %v3815_v7  ;;  %4335 = vmatmul.f32.vlgmr.msra.gmra.mxu0 %v6353_v58  ;;  %4371 = vmatmul.f32.gmra.mxu1 %v6476_v41  ;;  %v4430_v58 = vand.u32 4294901760, %v4429_v49 }
 0x38c   :  { %v3984_v55 = vpop.f32.mrf.mxu3 }
 0x38d   :  { %v3885_v59 = vadd.f32 %v3884_v11, %v3853_v14  ;;  %4423 = vmatmul.f32.gmra.mxu2 %v4422_v38  ;;  %v3985_v10 = vadd.f32 %v3984_v55, %v3940_v54 }
 0x38f   :  { %4639 = vst.msk [vmem:[%s6597_s3 + $0x70] sm:$0xf] %vm2086_vm2, %v3885_v59  ;;  %4471 = vmatmul.f32.gmra.mxu3 %v6507_v53 }
 0x391   :  { %v4054_v23 = vpop.f32.mrf.mxu1 }
 0x392   :  { %v4012_v31 = vpop.f32.mrf.mxu0  ;;  %v4090_v60 = vpop.f32.mrf.mxu2 }
 0x393   :  { %v4013_v3 = vadd.f32 %v4012_v31, %v3977_v48  ;;  %4339 = vmatmul.f32.gmra.mxu0 %v6476_v41  ;;  %4375 = vmatmul.f32.gmra.mxu1 %v6478_v39 }
 0x394   :  { %v4122_v5 = vpop.f32.mrf.mxu3 }
 0x395   :  { %v4049_v1 = vadd.f32 %v4048_v51, %v4013_v3  ;;  %4431 = vmatmul.f32.gmra.mxu2 %v4430_v58 }
 0x397   :  { %v4091_v13 = vadd.f32 %v4090_v60, %v4049_v1  ;;  %4475 = vmatmul.f32.gmra.mxu3 %v6526_v50 }
 0x399   :  { %v4123_v35 = vadd.f32 %v4122_v5, %v4091_v13  ;;  %v4060_v56 = vpop.f32.mrf.mxu1 }
 0x39a   :  { %v4017_v8 = vpop.f32.mrf.mxu0  ;;  %v4094_v41 = vpop.f32.mrf.mxu2 }
 0x39b   :  { %4640 = vst.msk [vmem:[%s6597_s3 + $0x78] sm:$0xff] %vm110_vm1, %v4123_v35  ;;  %v4018_v47 = vadd.f32 %v4017_v8, %v3981_v26  ;;  %4343 = vmatmul.f32.gmra.mxu0 %v6478_v39  ;;  %4539 = vmatmul.f32.vlgmr.msrb.gmra.mxu1 %v4412_v45 }
 0x39c   :  { %v4126_v30 = vpop.f32.mrf.mxu3 }
 0x39d   :  { %v4055_v40 = vadd.f32 %v4054_v23, %v4018_v47  ;;  %4581 = vmatmul.f32.vlgmr.msrb.gmra.mxu2 %v6491_v62 }
 0x39f   :  { %v4095_v42 = vadd.f32 %v4094_v41, %v4055_v40  ;;  %4613 = vmatmul.f32.vlgmr.msrb.gmra.mxu3 %v6491_v62 }
 0x3a1   :  { %v4127_v27 = vadd.f32 %v4126_v30, %v4095_v42 }
 0x3a2   :  { %v4022_v28 = vpop.f32.mrf.mxu0  ;;  %v4098_v20 = vpop.f32.mrf.mxu2 }
 0x3a3   :  { %4641 = vst.msk [vmem:[%s6597_s3 + $0x80] sm:$0xff] %vm110_vm1, %v4127_v27  ;;  %v4023_v39 = vadd.f32 %v4022_v28, %v3985_v10  ;;  %4503 = vmatmul.f32.vlgmr.msrb.gmra.mxu0 %v6498_v15  ;;  %4545 = vmatmul.f32.gmra.mxu1 %v4420_v12 }
 0x3a4   :  { %v4130_v62 = vpop.f32.mrf.mxu3 }
 0x3a5   :  { %v4061_v34 = vadd.f32 %v4060_v56, %v4023_v39  ;;  %4585 = vmatmul.f32.gmra.mxu2 %v6507_v53 }
 0x3a7   :  { %v4099_v21 = vadd.f32 %v4098_v20, %v4061_v34  ;;  %4617 = vmatmul.f32.gmra.mxu3 %v6507_v53 }
 0x3a9   :  { %v4131_v33 = vadd.f32 %v4130_v62, %v4099_v21 }
 0x3ab   :  { %4642 = vst.msk [vmem:[%s6597_s3 + $0x88] sm:$0xf] %vm2086_vm2, %v4131_v33  ;;  %4508 = vmatmul.f32.gmra.mxu0 %v6519_v22  ;;  %4551 = vmatmul.f32.gmra.mxu1 %v4428_v0 }
 0x3ad   :  { %4589 = vmatmul.f32.gmra.mxu2 %v6526_v50 }
 0x3af   :  { %4621 = vmatmul.f32.gmra.mxu3 %v6526_v50 }
 0x3b3   :  { %4513 = vmatmul.f32.gmra.mxu0 %v4427_v57 }
 0x3cb   :  { %v4222_v15 = vpop.f32.mrf.mxu1 }
 0x3d3   :  { %v4170_v32 = vpop.f32.mrf.mxu0  ;;  %v4258_v46 = vpop.f32.mrf.mxu2 }
 0x3d4   :  { %v4223_v52 = vadd.f32 %v4222_v15, %v4170_v32 }
 0x3d5   :  { %v4294_v53 = vpop.f32.mrf.mxu3 }
 0x3d6   :  { %v4259_v19 = vadd.f32 %v4258_v46, %v4223_v52 }
 0x3d8   :  { %v4295_v43 = vadd.f32 %v4294_v53, %v4259_v19 }
 0x3f0   :  { %v4226_v45 = vpop.f32.mrf.mxu1 }
 0x3f8   :  { %v4178_v16 = vpop.f32.mrf.mxu0  ;;  %v4230_v2 = vpop.f32.mrf.mxu1 }
 0x3f9   :  { %v4263_v61 = vpop.f32.mrf.mxu2  ;;  %v4227_v18 = vadd.f32 %v4226_v45, %v4178_v16 }
 0x3fa   :  { %v4300_v4 = vpop.f32.mrf.mxu3 }
 0x3fb   :  { %v4264_v29 = vadd.f32 %v4263_v61, %v4227_v18 }
 0x3fd   :  { %v4301_v11 = vadd.f32 %v4300_v4, %v4264_v29 }
 0x400   :  { %v4186_v36 = vpop.f32.mrf.mxu0  ;;  %v4368_v17 = vpop.f32.mrf.mxu1 }
 0x401   :  { %v4268_v24 = vpop.f32.mrf.mxu2  ;;  %v4231_v6 = vadd.f32 %v4230_v2, %v4186_v36 }
 0x402   :  { %v4306_v22 = vpop.f32.mrf.mxu3 }
 0x403   :  { %v4269_v14 = vadd.f32 %v4268_v24, %v4231_v6 }
 0x405   :  { %v4307_v0 = vadd.f32 %v4306_v22, %v4269_v14 }
 0x408   :  { %v4336_v25 = vpop.f32.mrf.mxu0  ;;  %v4372_v12 = vpop.f32.mrf.mxu1 }
 0x409   :  { %v4337_v63 = vadd.f32 %v4336_v25, %v4295_v43  ;;  %v4416_v9 = vpop.f32.mrf.mxu2 }
 0x40a   :  { %v4468_v50 = vpop.f32.mrf.mxu3 }
 0x40b   :  { %v4369_v37 = vadd.f32 %v4368_v17, %v4337_v63  ;;  %v4469_v3 = vadd.f32 %v4468_v50, %v4416_v9 }
 0x40d   :  { %4643 = vst.msk [vmem:[%s6597_s3 + $0x90] sm:$0xff] %vm110_vm1, %v4369_v37 }
 0x410   :  { %v4340_v57 = vpop.f32.mrf.mxu0  ;;  %v4376_v38 = vpop.f32.mrf.mxu1 }
 0x411   :  { %v4341_v7 = vadd.f32 %v4340_v57, %v4301_v11  ;;  %v4424_v54 = vpop.f32.mrf.mxu2 }
 0x412   :  { %v4472_v44 = vpop.f32.mrf.mxu3 }
 0x413   :  { %v4373_v55 = vadd.f32 %v4372_v12, %v4341_v7  ;;  %v4473_v23 = vadd.f32 %v4472_v44, %v4424_v54 }
 0x415   :  { %4644 = vst.msk [vmem:[%s6597_s3 + $0x98] sm:$0xff] %vm110_vm1, %v4373_v55 }
 0x418   :  { %v4344_v59 = vpop.f32.mrf.mxu0  ;;  %v4540_v60 = vpop.f32.mrf.mxu1 }
 0x419   :  { %v4345_v49 = vadd.f32 %v4344_v59, %v4307_v0  ;;  %v4432_v51 = vpop.f32.mrf.mxu2 }
 0x41a   :  { %v4476_v48 = vpop.f32.mrf.mxu3 }
 0x41b   :  { %v4377_v31 = vadd.f32 %v4376_v38, %v4345_v49  ;;  %v4477_v28 = vadd.f32 %v4476_v48, %v4432_v51 }
 0x41d   :  { %4645 = vst.msk [vmem:[%s6597_s3 + $0xa0] sm:$0xf] %vm2086_vm2, %v4377_v31 }
 0x420   :  { %v4504_v58 = vpop.f32.mrf.mxu0  ;;  %v4546_v47 = vpop.f32.mrf.mxu1 }
 0x421   :  { %v4505_v5 = vadd.f32 %v4504_v58, %v4469_v3  ;;  %v4582_v1 = vpop.f32.mrf.mxu2 }
 0x422   :  { %v4614_v13 = vpop.f32.mrf.mxu3 }
 0x423   :  { %v4541_v26 = vadd.f32 %v4540_v60, %v4505_v5 }
 0x425   :  { %v4583_v35 = vadd.f32 %v4582_v1, %v4541_v26 }
 0x427   :  { %v4615_v8 = vadd.f32 %v4614_v13, %v4583_v35 }
 0x428   :  { %v4509_v41 = vpop.f32.mrf.mxu0  ;;  %v4552_v20 = vpop.f32.mrf.mxu1 }
 0x429   :  { %4646 = vst.msk [vmem:[%s6597_s3 + $0xa8] sm:$0xff] %vm110_vm1, %v4615_v8  ;;  %v4510_v40 = vadd.f32 %v4509_v41, %v4473_v23  ;;  %v4586_v30 = vpop.f32.mrf.mxu2 }
 0x42a   :  { %v4618_v10 = vpop.f32.mrf.mxu3 }
 0x42b   :  { %v4547_v42 = vadd.f32 %v4546_v47, %v4510_v40 }
 0x42d   :  { %v4587_v27 = vadd.f32 %v4586_v30, %v4547_v42 }
 0x42f   :  { %v4619_v39 = vadd.f32 %v4618_v10, %v4587_v27 }
 0x430   :  { %v4514_v56 = vpop.f32.mrf.mxu0 }
 0x431   :  { %4647 = vst.msk [vmem:[%s6597_s3 + $0xb0] sm:$0xff] %vm110_vm1, %v4619_v39  ;;  %v4515_v34 = vadd.f32 %v4514_v56, %v4477_v28  ;;  %v4590_v62 = vpop.f32.mrf.mxu2 }
 0x432   :  { %v4622_v15 = vpop.f32.mrf.mxu3 }
 0x433   :  { %v4553_v21 = vadd.f32 %v4552_v20, %v4515_v34 }
 0x435   :  { %v4591_v33 = vadd.f32 %v4590_v62, %v4553_v21 }
 0x437   :  { %v4623_v32 = vadd.f32 %v4622_v15, %v4591_v33 }
 0x439   :  { %4648 = vst.msk [vmem:[%s6597_s3 + $0xb8] sm:$0xf] %vm2086_vm2, %v4623_v32 }

</bundles_post_ra>
